<compile_context>
chip_gen: v7x
topology: tpu7x:2x2x1
jax: 0.10.0
libtpu: 0.0.40
codegen_flags: <defaults>
</compile_context>

<pallas_src>
import jax
import jax.numpy as jnp
from jax import lax
from jax.experimental import pallas as pl
from jax.experimental.pallas import tpu as pltpu

# ----------------------------- hyper-parameters ------------------------------
INPUT_DIM = 2
COUNT_BINS = 8                      # K
BOUND = 3.0
FLOW_LENGTH = 4
HIDDEN_DIMS = (32, 32)
PARAM_DIMS = (COUNT_BINS, COUNT_BINS, COUNT_BINS - 1, COUNT_BINS)
OUT_MULT = sum(PARAM_DIMS)          # 4K - 1 = 31
OUT_PAD = 4 * COUNT_BINS            # 32 (deriv group padded to K rows)

# spline numerical-stability constants (Pyro defaults)
MIN_BIN_WIDTH = 1e-3
MIN_BIN_HEIGHT = 1e-3
MIN_DERIVATIVE = 1e-3
MIN_LAMBDA = 0.025
EPS = 1e-6


# ------------------------------ math helpers ---------------------------------
def _softplus(x):
    return jnp.maximum(x, 0.0) + jnp.log(1.0 + jnp.exp(-jnp.abs(x)))


def _sigmoid(x):
    return 1.0 / (1.0 + jnp.exp(-x))


def _softmax(x, axis):
    m = jnp.max(x, axis=axis, keepdims=True)
    e = jnp.exp(x - m)
    return e / jnp.sum(e, axis=axis, keepdims=True)


# ---------------- column-layout spline (params on sublanes, batch on lanes) ---
def _process_spline_params_cols(p_pad, csum_matT):
    """p_pad: (32, N) padded raw params:
       rows 0:8 widths, 8:16 heights, 16:23 derivs, 23 pad, 24:32 lambdas.
       Returns scaled_w (K,N), scaled_h (K,N), d_int (K-1,N), lam (K,N)."""
    K = COUNT_BINS
    w_raw = p_pad[0:K, :]
    h_raw = p_pad[K:2 * K, :]
    d_raw = p_pad[2 * K:3 * K - 1, :]
    l_raw = p_pad[3 * K:4 * K, :]

    widths = _softmax(w_raw, axis=0)
    widths = MIN_BIN_WIDTH + (1.0 - MIN_BIN_WIDTH * K) * widths
    heights = _softmax(h_raw, axis=0)
    heights = MIN_BIN_HEIGHT + (1.0 - MIN_BIN_HEIGHT * K) * heights

    # cumulative sums along the K axis via a small (K,K)@(K,N) wide-N matmul
    cw = jnp.dot(csum_matT, widths, preferred_element_type=jnp.float32)
    ch = jnp.dot(csum_matT, heights, preferred_element_type=jnp.float32)

    scaled_w = 2.0 * BOUND * cw - BOUND
    scaled_h = 2.0 * BOUND * ch - BOUND

    d_int = MIN_DERIVATIVE + _softplus(d_raw)
    lam = (1.0 - 2.0 * MIN_LAMBDA) * _sigmoid(l_raw) + MIN_LAMBDA
    return scaled_w, scaled_h, d_int, lam


def _spline_eval_cols(x, scaled_w, scaled_h, d_int, lam, iota_k, iota_km1):
    """Linear monotonic rational spline, forward direction, batch on lanes.
       x: (1, N);  scaled_w/scaled_h/lam: (K, N) or (K, 1);
       d_int: (K-1, N) or (K-1, 1).  Returns (1, N)."""
    K = COUNT_BINS
    left, right = -BOUND, BOUND

    # ----- bin search on width knots [left, scaled_w[0..K-2], right] -----
    cnt = ((x >= left + EPS).astype(jnp.int32)
           + (x >= right + EPS).astype(jnp.int32)
           + jnp.sum((x >= scaled_w[0:K - 1, :] + EPS).astype(jnp.int32),
                     axis=0, keepdims=True))
    b = jnp.clip(cnt - 1, 0, K - 1)                       # (1, N) int32

    oh_b = (iota_k == b).astype(jnp.float32)              # (K, N)
    oh_bm1 = (iota_k == (b - 1)).astype(jnp.float32)
    ohd_b = (iota_km1 == b).astype(jnp.float32)           # (K-1, N)
    ohd_bm1 = (iota_km1 == (b - 1)).astype(jnp.float32)

    def sel(a, oh):
        return jnp.sum(a * oh, axis=0, keepdims=True)     # (1, N)

    is_first = (b == 0)
    is_last = (b == K - 1)

    xk = jnp.where(is_first, left, sel(scaled_w, oh_bm1))
    xk1 = jnp.where(is_last, right, sel(scaled_w, oh_b))
    wk = xk1 - xk
    yk = jnp.where(is_first, left, sel(scaled_h, oh_bm1))
    yk1 = jnp.where(is_last, right, sel(scaled_h, oh_b))
    hk = yk1 - yk
    inv_wk = 1.0 / wk
    delta = hk * inv_wk
    # boundary derivatives fixed to 1.0 (identity-matching at +/- bound)
    dk = jnp.where(is_first, 1.0, sel(d_int, ohd_bm1))
    dk1 = jnp.where(is_last, 1.0, sel(d_int, ohd_b))
    lam_b = sel(lam, oh_b)

    # linear rational spline (Dolatabadi et al.), wa == 1
    wb = jnp.sqrt(dk / dk1)
    wc = (lam_b * dk + (1.0 - lam_b) * wb * dk1) / delta
    ya, yb = yk, yk1
    yc = ((1.0 - lam_b) * ya + lam_b * wb * yb) / ((1.0 - lam_b) + lam_b * wb)

    theta = (x - xk) * inv_wk
    num1 = ya * (lam_b - theta) + wc * yc * theta
    den1 = (lam_b - theta) + wc * theta
    out1 = num1 / den1
    num2 = wc * yc * (1.0 - theta) + wb * yb * (theta - lam_b)
    den2 = wc * (1.0 - theta) + wb * (theta - lam_b)
    out2 = num2 / den2

    y = jnp.where(theta <= lam_b, out1, out2)
    inside = (x >= left) & (x <= right)
    return jnp.where(inside, y, x)


# ------------------------------- Pallas kernel --------------------------------
def flow_kernel(z_ref, w1c_ref, b1_ref, w2t_ref, b2_ref,
                wo1t_ref, bo1_ref, knots0_ref, out_ref):
    K = COUNT_BINS
    TB = z_ref.shape[1]

    x0 = z_ref[0:1, :]                     # (1, TB)
    x1 = z_ref[1:2, :]

    w1c = w1c_ref[...]                     # (H1, 1)  (only MADE-unmasked row)
    b1 = b1_ref[...]                       # (H1, 1)
    w2t = w2t_ref[...]                     # (H2, H1)
    b2 = b2_ref[...]                       # (H2, 1)
    wo1t = wo1t_ref[...]                   # (32, H2)  padded param rows
    bo1 = bo1_ref[...]                     # (32, 1)
    k0 = knots0_ref[...]                   # (32, 1)   precomputed dim-0 knots

    sw0 = k0[0:K, :]
    sh0 = k0[K:2 * K, :]
    d0 = k0[2 * K:3 * K - 1, :]
    lam0 = k0[3 * K:4 * K, :]

    # hoisted constants (built once per tile, reused by all flow steps / dims)
    iota_k = lax.broadcasted_iota(jnp.int32, (K, TB), 0)
    iota_km1 = lax.broadcasted_iota(jnp.int32, (K - 1, TB), 0)
    ii = lax.broadcasted_iota(jnp.int32, (K, K), 0)
    jj = lax.broadcasted_iota(jnp.int32, (K, K), 1)
    csum_matT = (jj <= ii).astype(jnp.float32)

    for s in range(FLOW_LENGTH):           # same transform applied repeatedly
        # dim-0 spline: parameters are pure bias -> constant precomputed knots
        y0 = _spline_eval_cols(x0, sw0, sh0, d0, lam0, iota_k, iota_km1)

        # dim-1 parameters: masked MLP on x0 only, batch on the wide N axis
        h1 = jnp.maximum(w1c * x0 + b1, 0.0)                                   # (H1, TB)
        h2 = jnp.maximum(jnp.dot(w2t, h1, preferred_element_type=jnp.float32)
                         + b2, 0.0)                                            # (H2, TB)
        p1 = jnp.dot(wo1t, h2, preferred_element_type=jnp.float32) + bo1       # (32, TB)
        sw1, sh1, d1, lam1 = _process_spline_params_cols(p1, csum_matT)
        y1 = _spline_eval_cols(x1, sw1, sh1, d1, lam1, iota_k, iota_km1)

        # lane-dense row stores into the (2*FLOW_LENGTH, TB) output block
        out_ref[2 * s:2 * s + 1, :] = y0
        out_ref[2 * s + 1:2 * s + 2, :] = y1
        x0, x1 = y0, y1


# --------------------------------- wrapper ------------------------------------
def _pick_tb(B):
    for tb in (2048, 1024, 512, 256, 128):
        if B % tb == 0:
            return tb
    return B


def autoregressive_spline_deep_forward(z, params):
    """Pallas equivalent of AutoregressiveSplineDeep.forward(z)."""
    B = z.shape[0]
    K = COUNT_BINS
    TB = _pick_tb(B)
    grid = (B // TB,)
    (w1, b1, w2, b2, wo0, bo0, wo1, bo1) = params
    H1, H2 = w2.shape[0], w2.shape[1]
    del wo0  # masked to exactly zero by MADE -> dim-0 params are bias only

    # ---- layout plumbing: batch on lanes, params on sublanes -----------------
    z_t = jnp.asarray(z, jnp.float32).T                        # (2, B)
    w1c = w1[0:1, :].T                                         # (H1, 1)
    b1c = b1.T                                                 # (H1, 1)
    w2t = w2.T                                                 # (H2, H1)
    b2c = b2.T                                                 # (H2, 1)

    def pad_rows(a31):                                         # (31, M) -> (32, M)
        zrow = jnp.zeros((1, a31.shape[1]), jnp.float32)
        return jnp.concatenate([a31[0:3 * K - 1], zrow, a31[3 * K - 1:]], axis=0)

    wo1t_pad = pad_rows(wo1.T)                                 # (32, H2)
    bo1_pad = pad_rows(bo1.T)                                  # (32, 1)

    # ---- precompute constant dim-0 spline knots (bias-only params) -----------
    iiw = jnp.arange(K)[:, None]
    jjw = jnp.arange(K)[None, :]
    csum_matT = (jjw <= iiw).astype(jnp.float32)
    bo0_pad = pad_rows(bo0.T)                                  # (32, 1)
    sw0, sh0, d0, lam0 = _process_spline_params_cols(bo0_pad, csum_matT)
    knots0 = jnp.concatenate(
        [sw0, sh0, d0, jnp.zeros((1, 1), jnp.float32), lam0], axis=0)  # (32, 1)

    def const2d(a):
        return pl.BlockSpec(a.shape, lambda i: (0, 0))

    out = pl.pallas_call(
        flow_kernel,
        out_shape=jax.ShapeDtypeStruct((FLOW_LENGTH * INPUT_DIM, B), jnp.float32),
        grid=grid,
        in_specs=[
            pl.BlockSpec((INPUT_DIM, TB), lambda i: (0, i)),
            const2d(w1c), const2d(b1c),
            const2d(w2t), const2d(b2c),
            const2d(wo1t_pad), const2d(bo1_pad),
            const2d(knots0),
        ],
        out_specs=pl.BlockSpec((FLOW_LENGTH * INPUT_DIM, TB), lambda i: (0, i)),
        compiler_params=pltpu.CompilerParams(
            dimension_semantics=("parallel",)),
    )(z_t, w1c, b1c, w2t, b2c, wo1t_pad, bo1_pad, knots0)

    # (FLOW*2, B) -> (FLOW, B, 2)
    out3 = out.reshape(FLOW_LENGTH, INPUT_DIM, B).transpose(0, 2, 1)
    zs = [z] + [out3[s] for s in range(FLOW_LENGTH)]
    return zs, out3[-1]


# ------------------------- deterministic parameter init -----------------------
def init_params(key):
    H1, H2 = HIDDEN_DIMS
    keys = jax.random.split(key, 6)

    def linear_init(kw, kb, fan_in, fan_out):
        bnd = 1.0 / jnp.sqrt(jnp.float32(fan_in))
        w = jax.random.uniform(kw, (fan_in, fan_out), jnp.float32, -bnd, bnd)
        b = jax.random.uniform(kb, (1, fan_out), jnp.float32, -bnd, bnd)
        return w, b

    w1, b1 = linear_init(keys[0], keys[1], INPUT_DIM, H1)
    w2, b2 = linear_init(keys[2], keys[3], H1, H2)
    wout, bout = linear_init(keys[4], keys[5], H2, INPUT_DIM * OUT_MULT)

    # MADE masks for input_dim=2 (identity permutation):
    #  - every hidden unit connects only to input dim 0
    #  - output slots for dim 0 connect to nothing (bias only); dim 1 to all hidden
    w1 = w1.at[1, :].set(0.0)
    # AutoRegressiveNN output layout: flat column index = param_slot * INPUT_DIM + dim
    wo0 = wout[:, 0::INPUT_DIM] * 0.0        # masked to zero
    bo0 = bout[:, 0::INPUT_DIM]
    wo1 = wout[:, 1::INPUT_DIM]
    bo1 = bout[:, 1::INPUT_DIM]
    return (w1, b1, w2, b2, wo0, bo0, wo1, bo1)


# ----------------------------- pure-JAX reference -----------------------------
def _spline_forward_ref(x, params):
    """Batch-first reference: x (B,1), params (B, 4K-1)."""
    K = COUNT_BINS
    tb = x.shape[0]
    left, right = -BOUND, BOUND

    w_raw = params[:, 0:K]
    h_raw = params[:, K:2 * K]
    d_raw = params[:, 2 * K:3 * K - 1]
    l_raw = params[:, 3 * K - 1:4 * K - 1]

    widths = _softmax(w_raw, axis=-1)
    widths = MIN_BIN_WIDTH + (1.0 - MIN_BIN_WIDTH * K) * widths
    heights = _softmax(h_raw, axis=-1)
    heights = MIN_BIN_HEIGHT + (1.0 - MIN_BIN_HEIGHT * K) * heights

    ii = lax.broadcasted_iota(jnp.int32, (K, K), 0)
    jj = lax.broadcasted_iota(jnp.int32, (K, K), 1)
    csum_mat = (ii <= jj).astype(jnp.float32)
    cw = widths @ csum_mat
    ch = heights @ csum_mat
    scaled_w = (right - left) * cw + left
    scaled_h = (right - left) * ch + left

    d_int = MIN_DERIVATIVE + _softplus(d_raw)
    lam = (1.0 - 2.0 * MIN_LAMBDA) * _sigmoid(l_raw) + MIN_LAMBDA

    geb = lambda a: (x >= a + EPS).astype(jnp.int32)
    cnt = geb(left) + geb(right) + jnp.sum(
        (x >= scaled_w[:, :K - 1] + EPS).astype(jnp.int32), axis=-1, keepdims=True)
    b = jnp.clip(cnt - 1, 0, K - 1)

    iota_k = lax.broadcasted_iota(jnp.int32, (tb, K), 1)
    iota_km1 = lax.broadcasted_iota(jnp.int32, (tb, K - 1), 1)
    oh_b = (iota_k == b).astype(jnp.float32)
    oh_bm1 = (iota_k == b - 1).astype(jnp.float32)
    ohd_b = (iota_km1 == b).astype(jnp.float32)
    ohd_bm1 = (iota_km1 == b - 1).astype(jnp.float32)
    sel = lambda a, oh: jnp.sum(a * oh, axis=-1, keepdims=True)

    is_first = (b == 0)
    is_last = (b == K - 1)
    xk = jnp.where(is_first, left, sel(scaled_w, oh_bm1))
    xk1 = jnp.where(is_last, right, sel(scaled_w, oh_b))
    wk = xk1 - xk
    yk = jnp.where(is_first, left, sel(scaled_h, oh_bm1))
    yk1 = jnp.where(is_last, right, sel(scaled_h, oh_b))
    hk = yk1 - yk
    delta = hk / wk
    dk = jnp.where(is_first, 1.0, sel(d_int, ohd_bm1))
    dk1 = jnp.where(is_last, 1.0, sel(d_int, ohd_b))
    lam_b = sel(lam, oh_b)

    wb = jnp.sqrt(dk / dk1)
    wc = (lam_b * dk + (1.0 - lam_b) * wb * dk1) / delta
    ya, yb = yk, yk1
    yc = ((1.0 - lam_b) * ya + lam_b * wb * yb) / ((1.0 - lam_b) + lam_b * wb)

    theta = (x - xk) / wk
    num1 = ya * (lam_b - theta) + wc * yc * theta
    den1 = (lam_b - theta) + wc * theta
    out1 = num1 / den1
    num2 = wc * yc * (1.0 - theta) + wb * yb * (theta - lam_b)
    den2 = wc * (1.0 - theta) + wb * (theta - lam_b)
    out2 = num2 / den2

    y = jnp.where(theta <= lam_b, out1, out2)
    inside = (x >= left) & (x <= right)
    return jnp.where(inside, y, x)


def reference_forward(z, params):
    (w1, b1, w2, b2, wo0, bo0, wo1, bo1) = params
    x0, x1 = z[:, 0:1], z[:, 1:2]
    outs = []
    for _ in range(FLOW_LENGTH):
        h1 = jnp.maximum(x0 * w1[0:1] + x1 * w1[1:2] + b1, 0.0)
        h2 = jnp.maximum(h1 @ w2 + b2, 0.0)
        p0 = h2 @ wo0 + bo0
        p1 = h2 @ wo1 + bo1
        y0 = _spline_forward_ref(x0, p0)
        y1 = _spline_forward_ref(x1, p1)
        outs.append(jnp.concatenate([y0, y1], axis=-1))
        x0, x1 = y0, y1
    return jnp.stack(outs, axis=0)


# TODO(synk): pyro plumbing (base_dist sampling, TransformedDistribution.log_prob,
#             model/guide/optimizer, save/load) is training/IO glue, not the
#             forward hot path, and is intentionally not ported.

if __name__ == "__main__":
    key = jax.random.PRNGKey(0)
    kp, kz = jax.random.split(key)
    params = init_params(kp)
    z = jax.random.normal(kz, (128, INPUT_DIM), dtype=jnp.float32)  # base-dist samples

    zs, z_final = autoregressive_spline_deep_forward(z, params)
    z_final = jax.block_until_ready(z_final)

    ref = reference_forward(z, params)
    got = jnp.stack(zs[1:], axis=0)
    assert jnp.allclose(got, ref, atol=1e-4, rtol=1e-4), "mismatch vs reference"
    assert z_final.shape == (128, INPUT_DIM)

    print("KERNEL_OK")
</pallas_src>

<mosaic_0001>
module attributes {stable_mosaic.version = 11 : i64} {
  func.func @flow_kernel(%arg0: i32, %arg1: memref<2x128xf32, #tpu.memory_space<vmem>>, %arg2: memref<32x1xf32, #tpu.memory_space<vmem>>, %arg3: memref<32x1xf32, #tpu.memory_space<vmem>>, %arg4: memref<32x32xf32, #tpu.memory_space<vmem>>, %arg5: memref<32x1xf32, #tpu.memory_space<vmem>>, %arg6: memref<32x32xf32, #tpu.memory_space<vmem>>, %arg7: memref<32x1xf32, #tpu.memory_space<vmem>>, %arg8: memref<32x1xf32, #tpu.memory_space<vmem>>, %arg9: memref<8x128xf32, #tpu.memory_space<vmem>>) attributes {dimension_semantics = [#tpu.dimension_semantics<parallel>], iteration_bounds = array<i64: 1>, scalar_prefetch = 0 : i64, scratch_operands = 0 : i64, tpu.core_type = #tpu.core_type<tc>, window_params = [{transform_indices = @transform_0, window_bounds = array<i64: 2, 128>}, {pipeline_mode = #tpu.pipeline_mode<synchronous>, transform_indices = @transform_1, window_bounds = array<i64: 32, 1>}, {pipeline_mode = #tpu.pipeline_mode<synchronous>, transform_indices = @transform_2, window_bounds = array<i64: 32, 1>}, {pipeline_mode = #tpu.pipeline_mode<synchronous>, transform_indices = @transform_3, window_bounds = array<i64: 32, 32>}, {pipeline_mode = #tpu.pipeline_mode<synchronous>, transform_indices = @transform_4, window_bounds = array<i64: 32, 1>}, {pipeline_mode = #tpu.pipeline_mode<synchronous>, transform_indices = @transform_5, window_bounds = array<i64: 32, 32>}, {pipeline_mode = #tpu.pipeline_mode<synchronous>, transform_indices = @transform_6, window_bounds = array<i64: 32, 1>}, {pipeline_mode = #tpu.pipeline_mode<synchronous>, transform_indices = @transform_7, window_bounds = array<i64: 32, 1>}, {transform_indices = @transform_8, window_bounds = array<i64: 8, 128>}]} {
    %c0 = arith.constant 0 : index
    %c0_0 = arith.constant 0 : index
    %0 = vector.load %arg1[%c0, %c0_0] : memref<2x128xf32, #tpu.memory_space<vmem>>, vector<1x128xf32>
    %c1 = arith.constant 1 : index
    %c0_1 = arith.constant 0 : index
    %1 = vector.load %arg1[%c1, %c0_1] : memref<2x128xf32, #tpu.memory_space<vmem>>, vector<1x128xf32>
    %c0_2 = arith.constant 0 : index
    %c0_3 = arith.constant 0 : index
    %2 = vector.load %arg2[%c0_2, %c0_3] : memref<32x1xf32, #tpu.memory_space<vmem>>, vector<32x1xf32>
    %c0_4 = arith.constant 0 : index
    %c0_5 = arith.constant 0 : index
    %3 = vector.load %arg3[%c0_4, %c0_5] : memref<32x1xf32, #tpu.memory_space<vmem>>, vector<32x1xf32>
    %c0_6 = arith.constant 0 : index
    %c0_7 = arith.constant 0 : index
    %4 = vector.load %arg4[%c0_6, %c0_7] : memref<32x32xf32, #tpu.memory_space<vmem>>, vector<32x32xf32>
    %c0_8 = arith.constant 0 : index
    %c0_9 = arith.constant 0 : index
    %5 = vector.load %arg5[%c0_8, %c0_9] : memref<32x1xf32, #tpu.memory_space<vmem>>, vector<32x1xf32>
    %c0_10 = arith.constant 0 : index
    %c0_11 = arith.constant 0 : index
    %6 = vector.load %arg6[%c0_10, %c0_11] : memref<32x32xf32, #tpu.memory_space<vmem>>, vector<32x32xf32>
    %c0_12 = arith.constant 0 : index
    %c0_13 = arith.constant 0 : index
    %7 = vector.load %arg7[%c0_12, %c0_13] : memref<32x1xf32, #tpu.memory_space<vmem>>, vector<32x1xf32>
    %c0_14 = arith.constant 0 : index
    %c0_15 = arith.constant 0 : index
    %8 = vector.load %arg8[%c0_14, %c0_15] : memref<32x1xf32, #tpu.memory_space<vmem>>, vector<32x1xf32>
    %9 = vector.extract_strided_slice %8 {offsets = [0, 0], sizes = [8, 1], strides = [1, 1]} : vector<32x1xf32> to vector<8x1xf32>
    %10 = vector.extract_strided_slice %8 {offsets = [8, 0], sizes = [8, 1], strides = [1, 1]} : vector<32x1xf32> to vector<8x1xf32>
    %11 = vector.extract_strided_slice %8 {offsets = [16, 0], sizes = [7, 1], strides = [1, 1]} : vector<32x1xf32> to vector<7x1xf32>
    %12 = vector.extract_strided_slice %8 {offsets = [24, 0], sizes = [8, 1], strides = [1, 1]} : vector<32x1xf32> to vector<8x1xf32>
    %13 = tpu.iota {dimensions = array<i32: 0>} : vector<8x128xi32>
    %14 = tpu.iota {dimensions = array<i32: 0>} : vector<7x128xi32>
    %15 = tpu.iota {dimensions = array<i32: 0>} : vector<8x8xi32>
    %16 = tpu.iota {dimensions = array<i32: 1>} : vector<8x8xi32>
    %17 = arith.cmpi sle, %16, %15 : vector<8x8xi32>
    %18 = arith.extui %17 : vector<8x8xi1> to vector<8x8xi32>
    %19 = arith.sitofp %18 : vector<8x8xi32> to vector<8x8xf32>
    %cst = arith.constant -2.99999905 : f32
    %20 = vector.broadcast %cst : f32 to vector<1x128xf32>
    %21 = arith.cmpf oge, %0, %20 : vector<1x128xf32>
    %22 = arith.extui %21 : vector<1x128xi1> to vector<1x128xi32>
    %cst_16 = arith.constant 3.00000095 : f32
    %23 = vector.broadcast %cst_16 : f32 to vector<1x128xf32>
    %24 = arith.cmpf oge, %0, %23 : vector<1x128xf32>
    %25 = arith.extui %24 : vector<1x128xi1> to vector<1x128xi32>
    %26 = arith.addi %22, %25 : vector<1x128xi32>
    %27 = vector.extract_strided_slice %9 {offsets = [0, 0], sizes = [7, 1], strides = [1, 1]} : vector<8x1xf32> to vector<7x1xf32>
    %cst_17 = arith.constant 9.99999997E-7 : f32
    %28 = vector.broadcast %cst_17 : f32 to vector<7x1xf32>
    %29 = arith.addf %27, %28 : vector<7x1xf32>
    %30 = vector.broadcast %0 : vector<1x128xf32> to vector<7x128xf32>
    %31 = vector.broadcast %29 : vector<7x1xf32> to vector<7x128xf32>
    %32 = arith.cmpf oge, %30, %31 : vector<7x128xf32>
    %33 = arith.extui %32 : vector<7x128xi1> to vector<7x128xi32>
    %cst_18 = arith.constant dense<0> : vector<128xi32>
    %34 = vector.multi_reduction <add>, %33, %cst_18 [0] : vector<7x128xi32> to vector<128xi32>
    %35 = vector.shape_cast %34 : vector<128xi32> to vector<1x128xi32>
    %36 = arith.addi %26, %35 : vector<1x128xi32>
    %c1_i32 = arith.constant 1 : i32
    %37 = vector.broadcast %c1_i32 : i32 to vector<1x128xi32>
    %38 = arith.subi %36, %37 : vector<1x128xi32>
    %c0_i32 = arith.constant 0 : i32
    %c7_i32 = arith.constant 7 : i32
    %39 = vector.broadcast %c0_i32 : i32 to vector<1x128xi32>
    %40 = arith.maxsi %39, %38 : vector<1x128xi32>
    %41 = vector.broadcast %c7_i32 : i32 to vector<1x128xi32>
    %42 = arith.minsi %41, %40 : vector<1x128xi32>
    %43 = vector.broadcast %42 : vector<1x128xi32> to vector<8x128xi32>
    %44 = arith.cmpi eq, %13, %43 : vector<8x128xi32>
    %45 = arith.extui %44 : vector<8x128xi1> to vector<8x128xi32>
    %46 = arith.sitofp %45 : vector<8x128xi32> to vector<8x128xf32>
    %c1_i32_19 = arith.constant 1 : i32
    %47 = vector.broadcast %c1_i32_19 : i32 to vector<1x128xi32>
    %48 = arith.subi %42, %47 : vector<1x128xi32>
    %49 = vector.broadcast %48 : vector<1x128xi32> to vector<8x128xi32>
    %50 = arith.cmpi eq, %13, %49 : vector<8x128xi32>
    %51 = arith.extui %50 : vector<8x128xi1> to vector<8x128xi32>
    %52 = arith.sitofp %51 : vector<8x128xi32> to vector<8x128xf32>
    %53 = vector.broadcast %42 : vector<1x128xi32> to vector<7x128xi32>
    %54 = arith.cmpi eq, %14, %53 : vector<7x128xi32>
    %55 = arith.extui %54 : vector<7x128xi1> to vector<7x128xi32>
    %56 = arith.sitofp %55 : vector<7x128xi32> to vector<7x128xf32>
    %c1_i32_20 = arith.constant 1 : i32
    %57 = vector.broadcast %c1_i32_20 : i32 to vector<1x128xi32>
    %58 = arith.subi %42, %57 : vector<1x128xi32>
    %59 = vector.broadcast %58 : vector<1x128xi32> to vector<7x128xi32>
    %60 = arith.cmpi eq, %14, %59 : vector<7x128xi32>
    %61 = arith.extui %60 : vector<7x128xi1> to vector<7x128xi32>
    %62 = arith.sitofp %61 : vector<7x128xi32> to vector<7x128xf32>
    %c0_i32_21 = arith.constant 0 : i32
    %63 = vector.broadcast %c0_i32_21 : i32 to vector<1x128xi32>
    %64 = arith.cmpi eq, %42, %63 : vector<1x128xi32>
    %c7_i32_22 = arith.constant 7 : i32
    %65 = vector.broadcast %c7_i32_22 : i32 to vector<1x128xi32>
    %66 = arith.cmpi eq, %42, %65 : vector<1x128xi32>
    %67 = vector.broadcast %9 : vector<8x1xf32> to vector<8x128xf32>
    %68 = arith.mulf %67, %52 : vector<8x128xf32>
    %cst_23 = arith.constant dense<0.000000e+00> : vector<128xf32>
    %69 = vector.multi_reduction <add>, %68, %cst_23 [0] : vector<8x128xf32> to vector<128xf32>
    %70 = vector.shape_cast %69 : vector<128xf32> to vector<1x128xf32>
    %cst_24 = arith.constant -3.000000e+00 : f32
    %71 = vector.broadcast %cst_24 : f32 to vector<1x128xf32>
    %72 = arith.select %64, %71, %70 : vector<1x128xi1>, vector<1x128xf32>
    %73 = vector.broadcast %9 : vector<8x1xf32> to vector<8x128xf32>
    %74 = arith.mulf %73, %46 : vector<8x128xf32>
    %cst_25 = arith.constant dense<0.000000e+00> : vector<128xf32>
    %75 = vector.multi_reduction <add>, %74, %cst_25 [0] : vector<8x128xf32> to vector<128xf32>
    %76 = vector.shape_cast %75 : vector<128xf32> to vector<1x128xf32>
    %cst_26 = arith.constant 3.000000e+00 : f32
    %77 = vector.broadcast %cst_26 : f32 to vector<1x128xf32>
    %78 = arith.select %66, %77, %76 : vector<1x128xi1>, vector<1x128xf32>
    %79 = arith.subf %78, %72 : vector<1x128xf32>
    %80 = vector.broadcast %10 : vector<8x1xf32> to vector<8x128xf32>
    %81 = arith.mulf %80, %52 : vector<8x128xf32>
    %cst_27 = arith.constant dense<0.000000e+00> : vector<128xf32>
    %82 = vector.multi_reduction <add>, %81, %cst_27 [0] : vector<8x128xf32> to vector<128xf32>
    %83 = vector.shape_cast %82 : vector<128xf32> to vector<1x128xf32>
    %cst_28 = arith.constant -3.000000e+00 : f32
    %84 = vector.broadcast %cst_28 : f32 to vector<1x128xf32>
    %85 = arith.select %64, %84, %83 : vector<1x128xi1>, vector<1x128xf32>
    %86 = vector.broadcast %10 : vector<8x1xf32> to vector<8x128xf32>
    %87 = arith.mulf %86, %46 : vector<8x128xf32>
    %cst_29 = arith.constant dense<0.000000e+00> : vector<128xf32>
    %88 = vector.multi_reduction <add>, %87, %cst_29 [0] : vector<8x128xf32> to vector<128xf32>
    %89 = vector.shape_cast %88 : vector<128xf32> to vector<1x128xf32>
    %cst_30 = arith.constant 3.000000e+00 : f32
    %90 = vector.broadcast %cst_30 : f32 to vector<1x128xf32>
    %91 = arith.select %66, %90, %89 : vector<1x128xi1>, vector<1x128xf32>
    %92 = arith.subf %91, %85 : vector<1x128xf32>
    %cst_31 = arith.constant 1.000000e+00 : f32
    %93 = vector.broadcast %cst_31 : f32 to vector<1x128xf32>
    %94 = arith.divf %93, %79 : vector<1x128xf32>
    %95 = arith.mulf %92, %94 : vector<1x128xf32>
    %96 = vector.broadcast %11 : vector<7x1xf32> to vector<7x128xf32>
    %97 = arith.mulf %96, %62 : vector<7x128xf32>
    %cst_32 = arith.constant dense<0.000000e+00> : vector<128xf32>
    %98 = vector.multi_reduction <add>, %97, %cst_32 [0] : vector<7x128xf32> to vector<128xf32>
    %99 = vector.shape_cast %98 : vector<128xf32> to vector<1x128xf32>
    %cst_33 = arith.constant 1.000000e+00 : f32
    %100 = vector.broadcast %cst_33 : f32 to vector<1x128xf32>
    %101 = arith.select %64, %100, %99 : vector<1x128xi1>, vector<1x128xf32>
    %102 = vector.broadcast %11 : vector<7x1xf32> to vector<7x128xf32>
    %103 = arith.mulf %102, %56 : vector<7x128xf32>
    %cst_34 = arith.constant dense<0.000000e+00> : vector<128xf32>
    %104 = vector.multi_reduction <add>, %103, %cst_34 [0] : vector<7x128xf32> to vector<128xf32>
    %105 = vector.shape_cast %104 : vector<128xf32> to vector<1x128xf32>
    %cst_35 = arith.constant 1.000000e+00 : f32
    %106 = vector.broadcast %cst_35 : f32 to vector<1x128xf32>
    %107 = arith.select %66, %106, %105 : vector<1x128xi1>, vector<1x128xf32>
    %108 = vector.broadcast %12 : vector<8x1xf32> to vector<8x128xf32>
    %109 = arith.mulf %108, %46 : vector<8x128xf32>
    %cst_36 = arith.constant dense<0.000000e+00> : vector<128xf32>
    %110 = vector.multi_reduction <add>, %109, %cst_36 [0] : vector<8x128xf32> to vector<128xf32>
    %111 = vector.shape_cast %110 : vector<128xf32> to vector<1x128xf32>
    %112 = arith.divf %101, %107 : vector<1x128xf32>
    %113 = math.sqrt %112 : vector<1x128xf32>
    %114 = arith.mulf %111, %101 : vector<1x128xf32>
    %cst_37 = arith.constant 1.000000e+00 : f32
    %115 = vector.broadcast %cst_37 : f32 to vector<1x128xf32>
    %116 = arith.subf %115, %111 : vector<1x128xf32>
    %117 = arith.mulf %116, %113 : vector<1x128xf32>
    %118 = arith.mulf %117, %107 : vector<1x128xf32>
    %119 = arith.addf %114, %118 : vector<1x128xf32>
    %120 = arith.divf %119, %95 : vector<1x128xf32>
    %cst_38 = arith.constant 1.000000e+00 : f32
    %121 = vector.broadcast %cst_38 : f32 to vector<1x128xf32>
    %122 = arith.subf %121, %111 : vector<1x128xf32>
    %123 = arith.mulf %122, %85 : vector<1x128xf32>
    %124 = arith.mulf %111, %113 : vector<1x128xf32>
    %125 = arith.mulf %124, %91 : vector<1x128xf32>
    %126 = arith.addf %123, %125 : vector<1x128xf32>
    %cst_39 = arith.constant 1.000000e+00 : f32
    %127 = vector.broadcast %cst_39 : f32 to vector<1x128xf32>
    %128 = arith.subf %127, %111 : vector<1x128xf32>
    %129 = arith.mulf %111, %113 : vector<1x128xf32>
    %130 = arith.addf %128, %129 : vector<1x128xf32>
    %131 = arith.divf %126, %130 : vector<1x128xf32>
    %132 = arith.subf %0, %72 : vector<1x128xf32>
    %133 = arith.mulf %132, %94 : vector<1x128xf32>
    %134 = arith.subf %111, %133 : vector<1x128xf32>
    %135 = arith.mulf %85, %134 : vector<1x128xf32>
    %136 = arith.mulf %120, %131 : vector<1x128xf32>
    %137 = arith.mulf %136, %133 : vector<1x128xf32>
    %138 = arith.addf %135, %137 : vector<1x128xf32>
    %139 = arith.subf %111, %133 : vector<1x128xf32>
    %140 = arith.mulf %120, %133 : vector<1x128xf32>
    %141 = arith.addf %139, %140 : vector<1x128xf32>
    %142 = arith.divf %138, %141 : vector<1x128xf32>
    %143 = arith.mulf %120, %131 : vector<1x128xf32>
    %cst_40 = arith.constant 1.000000e+00 : f32
    %144 = vector.broadcast %cst_40 : f32 to vector<1x128xf32>
    %145 = arith.subf %144, %133 : vector<1x128xf32>
    %146 = arith.mulf %143, %145 : vector<1x128xf32>
    %147 = arith.mulf %113, %91 : vector<1x128xf32>
    %148 = arith.subf %133, %111 : vector<1x128xf32>
    %149 = arith.mulf %147, %148 : vector<1x128xf32>
    %150 = arith.addf %146, %149 : vector<1x128xf32>
    %cst_41 = arith.constant 1.000000e+00 : f32
    %151 = vector.broadcast %cst_41 : f32 to vector<1x128xf32>
    %152 = arith.subf %151, %133 : vector<1x128xf32>
    %153 = arith.mulf %120, %152 : vector<1x128xf32>
    %154 = arith.subf %133, %111 : vector<1x128xf32>
    %155 = arith.mulf %113, %154 : vector<1x128xf32>
    %156 = arith.addf %153, %155 : vector<1x128xf32>
    %157 = arith.divf %150, %156 : vector<1x128xf32>
    %158 = arith.cmpf ole, %133, %111 : vector<1x128xf32>
    %159 = arith.select %158, %142, %157 : vector<1x128xi1>, vector<1x128xf32>
    %cst_42 = arith.constant -3.000000e+00 : f32
    %160 = vector.broadcast %cst_42 : f32 to vector<1x128xf32>
    %161 = arith.cmpf oge, %0, %160 : vector<1x128xf32>
    %cst_43 = arith.constant 3.000000e+00 : f32
    %162 = vector.broadcast %cst_43 : f32 to vector<1x128xf32>
    %163 = arith.cmpf ole, %0, %162 : vector<1x128xf32>
    %164 = arith.andi %161, %163 : vector<1x128xi1>
    %165 = arith.select %164, %159, %0 : vector<1x128xi1>, vector<1x128xf32>
    %166 = vector.broadcast %2 : vector<32x1xf32> to vector<32x128xf32>
    %167 = vector.broadcast %0 : vector<1x128xf32> to vector<32x128xf32>
    %168 = arith.mulf %166, %167 : vector<32x128xf32>
    %169 = vector.broadcast %3 : vector<32x1xf32> to vector<32x128xf32>
    %170 = arith.addf %168, %169 : vector<32x128xf32>
    %cst_44 = arith.constant 0.000000e+00 : f32
    %171 = vector.broadcast %cst_44 : f32 to vector<32x128xf32>
    %172 = arith.maximumf %170, %171 : vector<32x128xf32>
    %cst_45 = arith.constant dense<0.000000e+00> : vector<32x128xf32>
    %173 = tpu.matmul %4, %172, %cst_45 {dimension_numbers = #tpu.dot_dimension_numbers<[1], [0], [0], [1], [0, 0, 1, 1], [], []>} : vector<32x32xf32>, vector<32x128xf32>, vector<32x128xf32> -> vector<32x128xf32>
    %174 = vector.broadcast %5 : vector<32x1xf32> to vector<32x128xf32>
    %175 = arith.addf %173, %174 : vector<32x128xf32>
    %cst_46 = arith.constant 0.000000e+00 : f32
    %176 = vector.broadcast %cst_46 : f32 to vector<32x128xf32>
    %177 = arith.maximumf %175, %176 : vector<32x128xf32>
    %cst_47 = arith.constant dense<0.000000e+00> : vector<32x128xf32>
    %178 = tpu.matmul %6, %177, %cst_47 {dimension_numbers = #tpu.dot_dimension_numbers<[1], [0], [0], [1], [0, 0, 1, 1], [], []>} : vector<32x32xf32>, vector<32x128xf32>, vector<32x128xf32> -> vector<32x128xf32>
    %179 = vector.broadcast %7 : vector<32x1xf32> to vector<32x128xf32>
    %180 = arith.addf %178, %179 : vector<32x128xf32>
    %181 = vector.extract_strided_slice %180 {offsets = [0, 0], sizes = [8, 128], strides = [1, 1]} : vector<32x128xf32> to vector<8x128xf32>
    %182 = vector.extract_strided_slice %180 {offsets = [8, 0], sizes = [8, 128], strides = [1, 1]} : vector<32x128xf32> to vector<8x128xf32>
    %183 = vector.extract_strided_slice %180 {offsets = [16, 0], sizes = [7, 128], strides = [1, 1]} : vector<32x128xf32> to vector<7x128xf32>
    %184 = vector.extract_strided_slice %180 {offsets = [24, 0], sizes = [8, 128], strides = [1, 1]} : vector<32x128xf32> to vector<8x128xf32>
    %cst_48 = arith.constant dense<0xFF800000> : vector<128xf32>
    %185 = vector.multi_reduction <maximumf>, %181, %cst_48 [0] : vector<8x128xf32> to vector<128xf32>
    %186 = vector.shape_cast %185 : vector<128xf32> to vector<1x128xf32>
    %187 = vector.broadcast %186 : vector<1x128xf32> to vector<8x128xf32>
    %188 = arith.subf %181, %187 : vector<8x128xf32>
    %189 = math.exp %188 : vector<8x128xf32>
    %cst_49 = arith.constant dense<0.000000e+00> : vector<128xf32>
    %190 = vector.multi_reduction <add>, %189, %cst_49 [0] : vector<8x128xf32> to vector<128xf32>
    %191 = vector.shape_cast %190 : vector<128xf32> to vector<1x128xf32>
    %192 = vector.broadcast %191 : vector<1x128xf32> to vector<8x128xf32>
    %193 = arith.divf %189, %192 : vector<8x128xf32>
    %cst_50 = arith.constant 0.991999983 : f32
    %194 = vector.broadcast %cst_50 : f32 to vector<8x128xf32>
    %195 = arith.mulf %194, %193 : vector<8x128xf32>
    %cst_51 = arith.constant 1.000000e-03 : f32
    %196 = vector.broadcast %cst_51 : f32 to vector<8x128xf32>
    %197 = arith.addf %196, %195 : vector<8x128xf32>
    %cst_52 = arith.constant dense<0xFF800000> : vector<128xf32>
    %198 = vector.multi_reduction <maximumf>, %182, %cst_52 [0] : vector<8x128xf32> to vector<128xf32>
    %199 = vector.shape_cast %198 : vector<128xf32> to vector<1x128xf32>
    %200 = vector.broadcast %199 : vector<1x128xf32> to vector<8x128xf32>
    %201 = arith.subf %182, %200 : vector<8x128xf32>
    %202 = math.exp %201 : vector<8x128xf32>
    %cst_53 = arith.constant dense<0.000000e+00> : vector<128xf32>
    %203 = vector.multi_reduction <add>, %202, %cst_53 [0] : vector<8x128xf32> to vector<128xf32>
    %204 = vector.shape_cast %203 : vector<128xf32> to vector<1x128xf32>
    %205 = vector.broadcast %204 : vector<1x128xf32> to vector<8x128xf32>
    %206 = arith.divf %202, %205 : vector<8x128xf32>
    %cst_54 = arith.constant 0.991999983 : f32
    %207 = vector.broadcast %cst_54 : f32 to vector<8x128xf32>
    %208 = arith.mulf %207, %206 : vector<8x128xf32>
    %cst_55 = arith.constant 1.000000e-03 : f32
    %209 = vector.broadcast %cst_55 : f32 to vector<8x128xf32>
    %210 = arith.addf %209, %208 : vector<8x128xf32>
    %cst_56 = arith.constant dense<0.000000e+00> : vector<8x128xf32>
    %211 = tpu.matmul %19, %197, %cst_56 {dimension_numbers = #tpu.dot_dimension_numbers<[1], [0], [0], [1], [0, 0, 1, 1], [], []>} : vector<8x8xf32>, vector<8x128xf32>, vector<8x128xf32> -> vector<8x128xf32>
    %cst_57 = arith.constant dense<0.000000e+00> : vector<8x128xf32>
    %212 = tpu.matmul %19, %210, %cst_57 {dimension_numbers = #tpu.dot_dimension_numbers<[1], [0], [0], [1], [0, 0, 1, 1], [], []>} : vector<8x8xf32>, vector<8x128xf32>, vector<8x128xf32> -> vector<8x128xf32>
    %cst_58 = arith.constant 6.000000e+00 : f32
    %213 = vector.broadcast %cst_58 : f32 to vector<8x128xf32>
    %214 = arith.mulf %213, %211 : vector<8x128xf32>
    %cst_59 = arith.constant 3.000000e+00 : f32
    %215 = vector.broadcast %cst_59 : f32 to vector<8x128xf32>
    %216 = arith.subf %214, %215 : vector<8x128xf32>
    %cst_60 = arith.constant 6.000000e+00 : f32
    %217 = vector.broadcast %cst_60 : f32 to vector<8x128xf32>
    %218 = arith.mulf %217, %212 : vector<8x128xf32>
    %cst_61 = arith.constant 3.000000e+00 : f32
    %219 = vector.broadcast %cst_61 : f32 to vector<8x128xf32>
    %220 = arith.subf %218, %219 : vector<8x128xf32>
    %cst_62 = arith.constant 0.000000e+00 : f32
    %221 = vector.broadcast %cst_62 : f32 to vector<7x128xf32>
    %222 = arith.maximumf %183, %221 : vector<7x128xf32>
    %223 = math.absf %183 : vector<7x128xf32>
    %cst_63 = arith.constant 0.000000e+00 : f32
    %224 = vector.broadcast %cst_63 : f32 to vector<7x128xf32>
    %225 = arith.subf %224, %223 : vector<7x128xf32>
    %226 = math.exp %225 : vector<7x128xf32>
    %cst_64 = arith.constant 1.000000e+00 : f32
    %227 = vector.broadcast %cst_64 : f32 to vector<7x128xf32>
    %228 = arith.addf %227, %226 : vector<7x128xf32>
    %229 = math.log %228 : vector<7x128xf32>
    %230 = arith.addf %222, %229 : vector<7x128xf32>
    %cst_65 = arith.constant 1.000000e-03 : f32
    %231 = vector.broadcast %cst_65 : f32 to vector<7x128xf32>
    %232 = arith.addf %231, %230 : vector<7x128xf32>
    %cst_66 = arith.constant 0.000000e+00 : f32
    %233 = vector.broadcast %cst_66 : f32 to vector<8x128xf32>
    %234 = arith.subf %233, %184 : vector<8x128xf32>
    %235 = math.exp %234 : vector<8x128xf32>
    %cst_67 = arith.constant 1.000000e+00 : f32
    %236 = vector.broadcast %cst_67 : f32 to vector<8x128xf32>
    %237 = arith.addf %236, %235 : vector<8x128xf32>
    %cst_68 = arith.constant 1.000000e+00 : f32
    %238 = vector.broadcast %cst_68 : f32 to vector<8x128xf32>
    %239 = arith.divf %238, %237 : vector<8x128xf32>
    %cst_69 = arith.constant 0.949999988 : f32
    %240 = vector.broadcast %cst_69 : f32 to vector<8x128xf32>
    %241 = arith.mulf %240, %239 : vector<8x128xf32>
    %cst_70 = arith.constant 2.500000e-02 : f32
    %242 = vector.broadcast %cst_70 : f32 to vector<8x128xf32>
    %243 = arith.addf %241, %242 : vector<8x128xf32>
    %cst_71 = arith.constant -2.99999905 : f32
    %244 = vector.broadcast %cst_71 : f32 to vector<1x128xf32>
    %245 = arith.cmpf oge, %1, %244 : vector<1x128xf32>
    %246 = arith.extui %245 : vector<1x128xi1> to vector<1x128xi32>
    %cst_72 = arith.constant 3.00000095 : f32
    %247 = vector.broadcast %cst_72 : f32 to vector<1x128xf32>
    %248 = arith.cmpf oge, %1, %247 : vector<1x128xf32>
    %249 = arith.extui %248 : vector<1x128xi1> to vector<1x128xi32>
    %250 = arith.addi %246, %249 : vector<1x128xi32>
    %251 = vector.extract_strided_slice %216 {offsets = [0, 0], sizes = [7, 128], strides = [1, 1]} : vector<8x128xf32> to vector<7x128xf32>
    %cst_73 = arith.constant 9.99999997E-7 : f32
    %252 = vector.broadcast %cst_73 : f32 to vector<7x128xf32>
    %253 = arith.addf %251, %252 : vector<7x128xf32>
    %254 = vector.broadcast %1 : vector<1x128xf32> to vector<7x128xf32>
    %255 = arith.cmpf oge, %254, %253 : vector<7x128xf32>
    %256 = arith.extui %255 : vector<7x128xi1> to vector<7x128xi32>
    %cst_74 = arith.constant dense<0> : vector<128xi32>
    %257 = vector.multi_reduction <add>, %256, %cst_74 [0] : vector<7x128xi32> to vector<128xi32>
    %258 = vector.shape_cast %257 : vector<128xi32> to vector<1x128xi32>
    %259 = arith.addi %250, %258 : vector<1x128xi32>
    %c1_i32_75 = arith.constant 1 : i32
    %260 = vector.broadcast %c1_i32_75 : i32 to vector<1x128xi32>
    %261 = arith.subi %259, %260 : vector<1x128xi32>
    %c0_i32_76 = arith.constant 0 : i32
    %c7_i32_77 = arith.constant 7 : i32
    %262 = vector.broadcast %c0_i32_76 : i32 to vector<1x128xi32>
    %263 = arith.maxsi %262, %261 : vector<1x128xi32>
    %264 = vector.broadcast %c7_i32_77 : i32 to vector<1x128xi32>
    %265 = arith.minsi %264, %263 : vector<1x128xi32>
    %266 = vector.broadcast %265 : vector<1x128xi32> to vector<8x128xi32>
    %267 = arith.cmpi eq, %13, %266 : vector<8x128xi32>
    %268 = arith.extui %267 : vector<8x128xi1> to vector<8x128xi32>
    %269 = arith.sitofp %268 : vector<8x128xi32> to vector<8x128xf32>
    %c1_i32_78 = arith.constant 1 : i32
    %270 = vector.broadcast %c1_i32_78 : i32 to vector<1x128xi32>
    %271 = arith.subi %265, %270 : vector<1x128xi32>
    %272 = vector.broadcast %271 : vector<1x128xi32> to vector<8x128xi32>
    %273 = arith.cmpi eq, %13, %272 : vector<8x128xi32>
    %274 = arith.extui %273 : vector<8x128xi1> to vector<8x128xi32>
    %275 = arith.sitofp %274 : vector<8x128xi32> to vector<8x128xf32>
    %276 = vector.broadcast %265 : vector<1x128xi32> to vector<7x128xi32>
    %277 = arith.cmpi eq, %14, %276 : vector<7x128xi32>
    %278 = arith.extui %277 : vector<7x128xi1> to vector<7x128xi32>
    %279 = arith.sitofp %278 : vector<7x128xi32> to vector<7x128xf32>
    %c1_i32_79 = arith.constant 1 : i32
    %280 = vector.broadcast %c1_i32_79 : i32 to vector<1x128xi32>
    %281 = arith.subi %265, %280 : vector<1x128xi32>
    %282 = vector.broadcast %281 : vector<1x128xi32> to vector<7x128xi32>
    %283 = arith.cmpi eq, %14, %282 : vector<7x128xi32>
    %284 = arith.extui %283 : vector<7x128xi1> to vector<7x128xi32>
    %285 = arith.sitofp %284 : vector<7x128xi32> to vector<7x128xf32>
    %c0_i32_80 = arith.constant 0 : i32
    %286 = vector.broadcast %c0_i32_80 : i32 to vector<1x128xi32>
    %287 = arith.cmpi eq, %265, %286 : vector<1x128xi32>
    %c7_i32_81 = arith.constant 7 : i32
    %288 = vector.broadcast %c7_i32_81 : i32 to vector<1x128xi32>
    %289 = arith.cmpi eq, %265, %288 : vector<1x128xi32>
    %290 = arith.mulf %216, %275 : vector<8x128xf32>
    %cst_82 = arith.constant dense<0.000000e+00> : vector<128xf32>
    %291 = vector.multi_reduction <add>, %290, %cst_82 [0] : vector<8x128xf32> to vector<128xf32>
    %292 = vector.shape_cast %291 : vector<128xf32> to vector<1x128xf32>
    %cst_83 = arith.constant -3.000000e+00 : f32
    %293 = vector.broadcast %cst_83 : f32 to vector<1x128xf32>
    %294 = arith.select %287, %293, %292 : vector<1x128xi1>, vector<1x128xf32>
    %295 = arith.mulf %216, %269 : vector<8x128xf32>
    %cst_84 = arith.constant dense<0.000000e+00> : vector<128xf32>
    %296 = vector.multi_reduction <add>, %295, %cst_84 [0] : vector<8x128xf32> to vector<128xf32>
    %297 = vector.shape_cast %296 : vector<128xf32> to vector<1x128xf32>
    %cst_85 = arith.constant 3.000000e+00 : f32
    %298 = vector.broadcast %cst_85 : f32 to vector<1x128xf32>
    %299 = arith.select %289, %298, %297 : vector<1x128xi1>, vector<1x128xf32>
    %300 = arith.subf %299, %294 : vector<1x128xf32>
    %301 = arith.mulf %220, %275 : vector<8x128xf32>
    %cst_86 = arith.constant dense<0.000000e+00> : vector<128xf32>
    %302 = vector.multi_reduction <add>, %301, %cst_86 [0] : vector<8x128xf32> to vector<128xf32>
    %303 = vector.shape_cast %302 : vector<128xf32> to vector<1x128xf32>
    %cst_87 = arith.constant -3.000000e+00 : f32
    %304 = vector.broadcast %cst_87 : f32 to vector<1x128xf32>
    %305 = arith.select %287, %304, %303 : vector<1x128xi1>, vector<1x128xf32>
    %306 = arith.mulf %220, %269 : vector<8x128xf32>
    %cst_88 = arith.constant dense<0.000000e+00> : vector<128xf32>
    %307 = vector.multi_reduction <add>, %306, %cst_88 [0] : vector<8x128xf32> to vector<128xf32>
    %308 = vector.shape_cast %307 : vector<128xf32> to vector<1x128xf32>
    %cst_89 = arith.constant 3.000000e+00 : f32
    %309 = vector.broadcast %cst_89 : f32 to vector<1x128xf32>
    %310 = arith.select %289, %309, %308 : vector<1x128xi1>, vector<1x128xf32>
    %311 = arith.subf %310, %305 : vector<1x128xf32>
    %cst_90 = arith.constant 1.000000e+00 : f32
    %312 = vector.broadcast %cst_90 : f32 to vector<1x128xf32>
    %313 = arith.divf %312, %300 : vector<1x128xf32>
    %314 = arith.mulf %311, %313 : vector<1x128xf32>
    %315 = arith.mulf %232, %285 : vector<7x128xf32>
    %cst_91 = arith.constant dense<0.000000e+00> : vector<128xf32>
    %316 = vector.multi_reduction <add>, %315, %cst_91 [0] : vector<7x128xf32> to vector<128xf32>
    %317 = vector.shape_cast %316 : vector<128xf32> to vector<1x128xf32>
    %cst_92 = arith.constant 1.000000e+00 : f32
    %318 = vector.broadcast %cst_92 : f32 to vector<1x128xf32>
    %319 = arith.select %287, %318, %317 : vector<1x128xi1>, vector<1x128xf32>
    %320 = arith.mulf %232, %279 : vector<7x128xf32>
    %cst_93 = arith.constant dense<0.000000e+00> : vector<128xf32>
    %321 = vector.multi_reduction <add>, %320, %cst_93 [0] : vector<7x128xf32> to vector<128xf32>
    %322 = vector.shape_cast %321 : vector<128xf32> to vector<1x128xf32>
    %cst_94 = arith.constant 1.000000e+00 : f32
    %323 = vector.broadcast %cst_94 : f32 to vector<1x128xf32>
    %324 = arith.select %289, %323, %322 : vector<1x128xi1>, vector<1x128xf32>
    %325 = arith.mulf %243, %269 : vector<8x128xf32>
    %cst_95 = arith.constant dense<0.000000e+00> : vector<128xf32>
    %326 = vector.multi_reduction <add>, %325, %cst_95 [0] : vector<8x128xf32> to vector<128xf32>
    %327 = vector.shape_cast %326 : vector<128xf32> to vector<1x128xf32>
    %328 = arith.divf %319, %324 : vector<1x128xf32>
    %329 = math.sqrt %328 : vector<1x128xf32>
    %330 = arith.mulf %327, %319 : vector<1x128xf32>
    %cst_96 = arith.constant 1.000000e+00 : f32
    %331 = vector.broadcast %cst_96 : f32 to vector<1x128xf32>
    %332 = arith.subf %331, %327 : vector<1x128xf32>
    %333 = arith.mulf %332, %329 : vector<1x128xf32>
    %334 = arith.mulf %333, %324 : vector<1x128xf32>
    %335 = arith.addf %330, %334 : vector<1x128xf32>
    %336 = arith.divf %335, %314 : vector<1x128xf32>
    %cst_97 = arith.constant 1.000000e+00 : f32
    %337 = vector.broadcast %cst_97 : f32 to vector<1x128xf32>
    %338 = arith.subf %337, %327 : vector<1x128xf32>
    %339 = arith.mulf %338, %305 : vector<1x128xf32>
    %340 = arith.mulf %327, %329 : vector<1x128xf32>
    %341 = arith.mulf %340, %310 : vector<1x128xf32>
    %342 = arith.addf %339, %341 : vector<1x128xf32>
    %cst_98 = arith.constant 1.000000e+00 : f32
    %343 = vector.broadcast %cst_98 : f32 to vector<1x128xf32>
    %344 = arith.subf %343, %327 : vector<1x128xf32>
    %345 = arith.mulf %327, %329 : vector<1x128xf32>
    %346 = arith.addf %344, %345 : vector<1x128xf32>
    %347 = arith.divf %342, %346 : vector<1x128xf32>
    %348 = arith.subf %1, %294 : vector<1x128xf32>
    %349 = arith.mulf %348, %313 : vector<1x128xf32>
    %350 = arith.subf %327, %349 : vector<1x128xf32>
    %351 = arith.mulf %305, %350 : vector<1x128xf32>
    %352 = arith.mulf %336, %347 : vector<1x128xf32>
    %353 = arith.mulf %352, %349 : vector<1x128xf32>
    %354 = arith.addf %351, %353 : vector<1x128xf32>
    %355 = arith.subf %327, %349 : vector<1x128xf32>
    %356 = arith.mulf %336, %349 : vector<1x128xf32>
    %357 = arith.addf %355, %356 : vector<1x128xf32>
    %358 = arith.divf %354, %357 : vector<1x128xf32>
    %359 = arith.mulf %336, %347 : vector<1x128xf32>
    %cst_99 = arith.constant 1.000000e+00 : f32
    %360 = vector.broadcast %cst_99 : f32 to vector<1x128xf32>
    %361 = arith.subf %360, %349 : vector<1x128xf32>
    %362 = arith.mulf %359, %361 : vector<1x128xf32>
    %363 = arith.mulf %329, %310 : vector<1x128xf32>
    %364 = arith.subf %349, %327 : vector<1x128xf32>
    %365 = arith.mulf %363, %364 : vector<1x128xf32>
    %366 = arith.addf %362, %365 : vector<1x128xf32>
    %cst_100 = arith.constant 1.000000e+00 : f32
    %367 = vector.broadcast %cst_100 : f32 to vector<1x128xf32>
    %368 = arith.subf %367, %349 : vector<1x128xf32>
    %369 = arith.mulf %336, %368 : vector<1x128xf32>
    %370 = arith.subf %349, %327 : vector<1x128xf32>
    %371 = arith.mulf %329, %370 : vector<1x128xf32>
    %372 = arith.addf %369, %371 : vector<1x128xf32>
    %373 = arith.divf %366, %372 : vector<1x128xf32>
    %374 = arith.cmpf ole, %349, %327 : vector<1x128xf32>
    %375 = arith.select %374, %358, %373 : vector<1x128xi1>, vector<1x128xf32>
    %cst_101 = arith.constant -3.000000e+00 : f32
    %376 = vector.broadcast %cst_101 : f32 to vector<1x128xf32>
    %377 = arith.cmpf oge, %1, %376 : vector<1x128xf32>
    %cst_102 = arith.constant 3.000000e+00 : f32
    %378 = vector.broadcast %cst_102 : f32 to vector<1x128xf32>
    %379 = arith.cmpf ole, %1, %378 : vector<1x128xf32>
    %380 = arith.andi %377, %379 : vector<1x128xi1>
    %381 = arith.select %380, %375, %1 : vector<1x128xi1>, vector<1x128xf32>
    %c0_103 = arith.constant 0 : index
    %c0_104 = arith.constant 0 : index
    %382 = vector.load %arg9[%c0_103, %c0_104] : memref<8x128xf32, #tpu.memory_space<vmem>>, vector<1x128xf32>
    tpu.vector_store %arg9[%c0_103, %c0_104], %165 {strides = array<i32>} : memref<8x128xf32, #tpu.memory_space<vmem>>, vector<1x128xf32>,
    %c1_105 = arith.constant 1 : index
    %c0_106 = arith.constant 0 : index
    %383 = vector.load %arg9[%c1_105, %c0_106] : memref<8x128xf32, #tpu.memory_space<vmem>>, vector<1x128xf32>
    tpu.vector_store %arg9[%c1_105, %c0_106], %381 {strides = array<i32>} : memref<8x128xf32, #tpu.memory_space<vmem>>, vector<1x128xf32>,
    %cst_107 = arith.constant -2.99999905 : f32
    %384 = vector.broadcast %cst_107 : f32 to vector<1x128xf32>
    %385 = arith.cmpf oge, %165, %384 : vector<1x128xf32>
    %386 = arith.extui %385 : vector<1x128xi1> to vector<1x128xi32>
    %cst_108 = arith.constant 3.00000095 : f32
    %387 = vector.broadcast %cst_108 : f32 to vector<1x128xf32>
    %388 = arith.cmpf oge, %165, %387 : vector<1x128xf32>
    %389 = arith.extui %388 : vector<1x128xi1> to vector<1x128xi32>
    %390 = arith.addi %386, %389 : vector<1x128xi32>
    %391 = vector.extract_strided_slice %9 {offsets = [0, 0], sizes = [7, 1], strides = [1, 1]} : vector<8x1xf32> to vector<7x1xf32>
    %cst_109 = arith.constant 9.99999997E-7 : f32
    %392 = vector.broadcast %cst_109 : f32 to vector<7x1xf32>
    %393 = arith.addf %391, %392 : vector<7x1xf32>
    %394 = vector.broadcast %165 : vector<1x128xf32> to vector<7x128xf32>
    %395 = vector.broadcast %393 : vector<7x1xf32> to vector<7x128xf32>
    %396 = arith.cmpf oge, %394, %395 : vector<7x128xf32>
    %397 = arith.extui %396 : vector<7x128xi1> to vector<7x128xi32>
    %cst_110 = arith.constant dense<0> : vector<128xi32>
    %398 = vector.multi_reduction <add>, %397, %cst_110 [0] : vector<7x128xi32> to vector<128xi32>
    %399 = vector.shape_cast %398 : vector<128xi32> to vector<1x128xi32>
    %400 = arith.addi %390, %399 : vector<1x128xi32>
    %c1_i32_111 = arith.constant 1 : i32
    %401 = vector.broadcast %c1_i32_111 : i32 to vector<1x128xi32>
    %402 = arith.subi %400, %401 : vector<1x128xi32>
    %c0_i32_112 = arith.constant 0 : i32
    %c7_i32_113 = arith.constant 7 : i32
    %403 = vector.broadcast %c0_i32_112 : i32 to vector<1x128xi32>
    %404 = arith.maxsi %403, %402 : vector<1x128xi32>
    %405 = vector.broadcast %c7_i32_113 : i32 to vector<1x128xi32>
    %406 = arith.minsi %405, %404 : vector<1x128xi32>
    %407 = vector.broadcast %406 : vector<1x128xi32> to vector<8x128xi32>
    %408 = arith.cmpi eq, %13, %407 : vector<8x128xi32>
    %409 = arith.extui %408 : vector<8x128xi1> to vector<8x128xi32>
    %410 = arith.sitofp %409 : vector<8x128xi32> to vector<8x128xf32>
    %c1_i32_114 = arith.constant 1 : i32
    %411 = vector.broadcast %c1_i32_114 : i32 to vector<1x128xi32>
    %412 = arith.subi %406, %411 : vector<1x128xi32>
    %413 = vector.broadcast %412 : vector<1x128xi32> to vector<8x128xi32>
    %414 = arith.cmpi eq, %13, %413 : vector<8x128xi32>
    %415 = arith.extui %414 : vector<8x128xi1> to vector<8x128xi32>
    %416 = arith.sitofp %415 : vector<8x128xi32> to vector<8x128xf32>
    %417 = vector.broadcast %406 : vector<1x128xi32> to vector<7x128xi32>
    %418 = arith.cmpi eq, %14, %417 : vector<7x128xi32>
    %419 = arith.extui %418 : vector<7x128xi1> to vector<7x128xi32>
    %420 = arith.sitofp %419 : vector<7x128xi32> to vector<7x128xf32>
    %c1_i32_115 = arith.constant 1 : i32
    %421 = vector.broadcast %c1_i32_115 : i32 to vector<1x128xi32>
    %422 = arith.subi %406, %421 : vector<1x128xi32>
    %423 = vector.broadcast %422 : vector<1x128xi32> to vector<7x128xi32>
    %424 = arith.cmpi eq, %14, %423 : vector<7x128xi32>
    %425 = arith.extui %424 : vector<7x128xi1> to vector<7x128xi32>
    %426 = arith.sitofp %425 : vector<7x128xi32> to vector<7x128xf32>
    %c0_i32_116 = arith.constant 0 : i32
    %427 = vector.broadcast %c0_i32_116 : i32 to vector<1x128xi32>
    %428 = arith.cmpi eq, %406, %427 : vector<1x128xi32>
    %c7_i32_117 = arith.constant 7 : i32
    %429 = vector.broadcast %c7_i32_117 : i32 to vector<1x128xi32>
    %430 = arith.cmpi eq, %406, %429 : vector<1x128xi32>
    %431 = vector.broadcast %9 : vector<8x1xf32> to vector<8x128xf32>
    %432 = arith.mulf %431, %416 : vector<8x128xf32>
    %cst_118 = arith.constant dense<0.000000e+00> : vector<128xf32>
    %433 = vector.multi_reduction <add>, %432, %cst_118 [0] : vector<8x128xf32> to vector<128xf32>
    %434 = vector.shape_cast %433 : vector<128xf32> to vector<1x128xf32>
    %cst_119 = arith.constant -3.000000e+00 : f32
    %435 = vector.broadcast %cst_119 : f32 to vector<1x128xf32>
    %436 = arith.select %428, %435, %434 : vector<1x128xi1>, vector<1x128xf32>
    %437 = vector.broadcast %9 : vector<8x1xf32> to vector<8x128xf32>
    %438 = arith.mulf %437, %410 : vector<8x128xf32>
    %cst_120 = arith.constant dense<0.000000e+00> : vector<128xf32>
    %439 = vector.multi_reduction <add>, %438, %cst_120 [0] : vector<8x128xf32> to vector<128xf32>
    %440 = vector.shape_cast %439 : vector<128xf32> to vector<1x128xf32>
    %cst_121 = arith.constant 3.000000e+00 : f32
    %441 = vector.broadcast %cst_121 : f32 to vector<1x128xf32>
    %442 = arith.select %430, %441, %440 : vector<1x128xi1>, vector<1x128xf32>
    %443 = arith.subf %442, %436 : vector<1x128xf32>
    %444 = vector.broadcast %10 : vector<8x1xf32> to vector<8x128xf32>
    %445 = arith.mulf %444, %416 : vector<8x128xf32>
    %cst_122 = arith.constant dense<0.000000e+00> : vector<128xf32>
    %446 = vector.multi_reduction <add>, %445, %cst_122 [0] : vector<8x128xf32> to vector<128xf32>
    %447 = vector.shape_cast %446 : vector<128xf32> to vector<1x128xf32>
    %cst_123 = arith.constant -3.000000e+00 : f32
    %448 = vector.broadcast %cst_123 : f32 to vector<1x128xf32>
    %449 = arith.select %428, %448, %447 : vector<1x128xi1>, vector<1x128xf32>
    %450 = vector.broadcast %10 : vector<8x1xf32> to vector<8x128xf32>
    %451 = arith.mulf %450, %410 : vector<8x128xf32>
    %cst_124 = arith.constant dense<0.000000e+00> : vector<128xf32>
    %452 = vector.multi_reduction <add>, %451, %cst_124 [0] : vector<8x128xf32> to vector<128xf32>
    %453 = vector.shape_cast %452 : vector<128xf32> to vector<1x128xf32>
    %cst_125 = arith.constant 3.000000e+00 : f32
    %454 = vector.broadcast %cst_125 : f32 to vector<1x128xf32>
    %455 = arith.select %430, %454, %453 : vector<1x128xi1>, vector<1x128xf32>
    %456 = arith.subf %455, %449 : vector<1x128xf32>
    %cst_126 = arith.constant 1.000000e+00 : f32
    %457 = vector.broadcast %cst_126 : f32 to vector<1x128xf32>
    %458 = arith.divf %457, %443 : vector<1x128xf32>
    %459 = arith.mulf %456, %458 : vector<1x128xf32>
    %460 = vector.broadcast %11 : vector<7x1xf32> to vector<7x128xf32>
    %461 = arith.mulf %460, %426 : vector<7x128xf32>
    %cst_127 = arith.constant dense<0.000000e+00> : vector<128xf32>
    %462 = vector.multi_reduction <add>, %461, %cst_127 [0] : vector<7x128xf32> to vector<128xf32>
    %463 = vector.shape_cast %462 : vector<128xf32> to vector<1x128xf32>
    %cst_128 = arith.constant 1.000000e+00 : f32
    %464 = vector.broadcast %cst_128 : f32 to vector<1x128xf32>
    %465 = arith.select %428, %464, %463 : vector<1x128xi1>, vector<1x128xf32>
    %466 = vector.broadcast %11 : vector<7x1xf32> to vector<7x128xf32>
    %467 = arith.mulf %466, %420 : vector<7x128xf32>
    %cst_129 = arith.constant dense<0.000000e+00> : vector<128xf32>
    %468 = vector.multi_reduction <add>, %467, %cst_129 [0] : vector<7x128xf32> to vector<128xf32>
    %469 = vector.shape_cast %468 : vector<128xf32> to vector<1x128xf32>
    %cst_130 = arith.constant 1.000000e+00 : f32
    %470 = vector.broadcast %cst_130 : f32 to vector<1x128xf32>
    %471 = arith.select %430, %470, %469 : vector<1x128xi1>, vector<1x128xf32>
    %472 = vector.broadcast %12 : vector<8x1xf32> to vector<8x128xf32>
    %473 = arith.mulf %472, %410 : vector<8x128xf32>
    %cst_131 = arith.constant dense<0.000000e+00> : vector<128xf32>
    %474 = vector.multi_reduction <add>, %473, %cst_131 [0] : vector<8x128xf32> to vector<128xf32>
    %475 = vector.shape_cast %474 : vector<128xf32> to vector<1x128xf32>
    %476 = arith.divf %465, %471 : vector<1x128xf32>
    %477 = math.sqrt %476 : vector<1x128xf32>
    %478 = arith.mulf %475, %465 : vector<1x128xf32>
    %cst_132 = arith.constant 1.000000e+00 : f32
    %479 = vector.broadcast %cst_132 : f32 to vector<1x128xf32>
    %480 = arith.subf %479, %475 : vector<1x128xf32>
    %481 = arith.mulf %480, %477 : vector<1x128xf32>
    %482 = arith.mulf %481, %471 : vector<1x128xf32>
    %483 = arith.addf %478, %482 : vector<1x128xf32>
    %484 = arith.divf %483, %459 : vector<1x128xf32>
    %cst_133 = arith.constant 1.000000e+00 : f32
    %485 = vector.broadcast %cst_133 : f32 to vector<1x128xf32>
    %486 = arith.subf %485, %475 : vector<1x128xf32>
    %487 = arith.mulf %486, %449 : vector<1x128xf32>
    %488 = arith.mulf %475, %477 : vector<1x128xf32>
    %489 = arith.mulf %488, %455 : vector<1x128xf32>
    %490 = arith.addf %487, %489 : vector<1x128xf32>
    %cst_134 = arith.constant 1.000000e+00 : f32
    %491 = vector.broadcast %cst_134 : f32 to vector<1x128xf32>
    %492 = arith.subf %491, %475 : vector<1x128xf32>
    %493 = arith.mulf %475, %477 : vector<1x128xf32>
    %494 = arith.addf %492, %493 : vector<1x128xf32>
    %495 = arith.divf %490, %494 : vector<1x128xf32>
    %496 = arith.subf %165, %436 : vector<1x128xf32>
    %497 = arith.mulf %496, %458 : vector<1x128xf32>
    %498 = arith.subf %475, %497 : vector<1x128xf32>
    %499 = arith.mulf %449, %498 : vector<1x128xf32>
    %500 = arith.mulf %484, %495 : vector<1x128xf32>
    %501 = arith.mulf %500, %497 : vector<1x128xf32>
    %502 = arith.addf %499, %501 : vector<1x128xf32>
    %503 = arith.subf %475, %497 : vector<1x128xf32>
    %504 = arith.mulf %484, %497 : vector<1x128xf32>
    %505 = arith.addf %503, %504 : vector<1x128xf32>
    %506 = arith.divf %502, %505 : vector<1x128xf32>
    %507 = arith.mulf %484, %495 : vector<1x128xf32>
    %cst_135 = arith.constant 1.000000e+00 : f32
    %508 = vector.broadcast %cst_135 : f32 to vector<1x128xf32>
    %509 = arith.subf %508, %497 : vector<1x128xf32>
    %510 = arith.mulf %507, %509 : vector<1x128xf32>
    %511 = arith.mulf %477, %455 : vector<1x128xf32>
    %512 = arith.subf %497, %475 : vector<1x128xf32>
    %513 = arith.mulf %511, %512 : vector<1x128xf32>
    %514 = arith.addf %510, %513 : vector<1x128xf32>
    %cst_136 = arith.constant 1.000000e+00 : f32
    %515 = vector.broadcast %cst_136 : f32 to vector<1x128xf32>
    %516 = arith.subf %515, %497 : vector<1x128xf32>
    %517 = arith.mulf %484, %516 : vector<1x128xf32>
    %518 = arith.subf %497, %475 : vector<1x128xf32>
    %519 = arith.mulf %477, %518 : vector<1x128xf32>
    %520 = arith.addf %517, %519 : vector<1x128xf32>
    %521 = arith.divf %514, %520 : vector<1x128xf32>
    %522 = arith.cmpf ole, %497, %475 : vector<1x128xf32>
    %523 = arith.select %522, %506, %521 : vector<1x128xi1>, vector<1x128xf32>
    %cst_137 = arith.constant -3.000000e+00 : f32
    %524 = vector.broadcast %cst_137 : f32 to vector<1x128xf32>
    %525 = arith.cmpf oge, %165, %524 : vector<1x128xf32>
    %cst_138 = arith.constant 3.000000e+00 : f32
    %526 = vector.broadcast %cst_138 : f32 to vector<1x128xf32>
    %527 = arith.cmpf ole, %165, %526 : vector<1x128xf32>
    %528 = arith.andi %525, %527 : vector<1x128xi1>
    %529 = arith.select %528, %523, %165 : vector<1x128xi1>, vector<1x128xf32>
    %530 = vector.broadcast %2 : vector<32x1xf32> to vector<32x128xf32>
    %531 = vector.broadcast %165 : vector<1x128xf32> to vector<32x128xf32>
    %532 = arith.mulf %530, %531 : vector<32x128xf32>
    %533 = vector.broadcast %3 : vector<32x1xf32> to vector<32x128xf32>
    %534 = arith.addf %532, %533 : vector<32x128xf32>
    %cst_139 = arith.constant 0.000000e+00 : f32
    %535 = vector.broadcast %cst_139 : f32 to vector<32x128xf32>
    %536 = arith.maximumf %534, %535 : vector<32x128xf32>
    %cst_140 = arith.constant dense<0.000000e+00> : vector<32x128xf32>
    %537 = tpu.matmul %4, %536, %cst_140 {dimension_numbers = #tpu.dot_dimension_numbers<[1], [0], [0], [1], [0, 0, 1, 1], [], []>} : vector<32x32xf32>, vector<32x128xf32>, vector<32x128xf32> -> vector<32x128xf32>
    %538 = vector.broadcast %5 : vector<32x1xf32> to vector<32x128xf32>
    %539 = arith.addf %537, %538 : vector<32x128xf32>
    %cst_141 = arith.constant 0.000000e+00 : f32
    %540 = vector.broadcast %cst_141 : f32 to vector<32x128xf32>
    %541 = arith.maximumf %539, %540 : vector<32x128xf32>
    %cst_142 = arith.constant dense<0.000000e+00> : vector<32x128xf32>
    %542 = tpu.matmul %6, %541, %cst_142 {dimension_numbers = #tpu.dot_dimension_numbers<[1], [0], [0], [1], [0, 0, 1, 1], [], []>} : vector<32x32xf32>, vector<32x128xf32>, vector<32x128xf32> -> vector<32x128xf32>
    %543 = vector.broadcast %7 : vector<32x1xf32> to vector<32x128xf32>
    %544 = arith.addf %542, %543 : vector<32x128xf32>
    %545 = vector.extract_strided_slice %544 {offsets = [0, 0], sizes = [8, 128], strides = [1, 1]} : vector<32x128xf32> to vector<8x128xf32>
    %546 = vector.extract_strided_slice %544 {offsets = [8, 0], sizes = [8, 128], strides = [1, 1]} : vector<32x128xf32> to vector<8x128xf32>
    %547 = vector.extract_strided_slice %544 {offsets = [16, 0], sizes = [7, 128], strides = [1, 1]} : vector<32x128xf32> to vector<7x128xf32>
    %548 = vector.extract_strided_slice %544 {offsets = [24, 0], sizes = [8, 128], strides = [1, 1]} : vector<32x128xf32> to vector<8x128xf32>
    %cst_143 = arith.constant dense<0xFF800000> : vector<128xf32>
    %549 = vector.multi_reduction <maximumf>, %545, %cst_143 [0] : vector<8x128xf32> to vector<128xf32>
    %550 = vector.shape_cast %549 : vector<128xf32> to vector<1x128xf32>
    %551 = vector.broadcast %550 : vector<1x128xf32> to vector<8x128xf32>
    %552 = arith.subf %545, %551 : vector<8x128xf32>
    %553 = math.exp %552 : vector<8x128xf32>
    %cst_144 = arith.constant dense<0.000000e+00> : vector<128xf32>
    %554 = vector.multi_reduction <add>, %553, %cst_144 [0] : vector<8x128xf32> to vector<128xf32>
    %555 = vector.shape_cast %554 : vector<128xf32> to vector<1x128xf32>
    %556 = vector.broadcast %555 : vector<1x128xf32> to vector<8x128xf32>
    %557 = arith.divf %553, %556 : vector<8x128xf32>
    %cst_145 = arith.constant 0.991999983 : f32
    %558 = vector.broadcast %cst_145 : f32 to vector<8x128xf32>
    %559 = arith.mulf %558, %557 : vector<8x128xf32>
    %cst_146 = arith.constant 1.000000e-03 : f32
    %560 = vector.broadcast %cst_146 : f32 to vector<8x128xf32>
    %561 = arith.addf %560, %559 : vector<8x128xf32>
    %cst_147 = arith.constant dense<0xFF800000> : vector<128xf32>
    %562 = vector.multi_reduction <maximumf>, %546, %cst_147 [0] : vector<8x128xf32> to vector<128xf32>
    %563 = vector.shape_cast %562 : vector<128xf32> to vector<1x128xf32>
    %564 = vector.broadcast %563 : vector<1x128xf32> to vector<8x128xf32>
    %565 = arith.subf %546, %564 : vector<8x128xf32>
    %566 = math.exp %565 : vector<8x128xf32>
    %cst_148 = arith.constant dense<0.000000e+00> : vector<128xf32>
    %567 = vector.multi_reduction <add>, %566, %cst_148 [0] : vector<8x128xf32> to vector<128xf32>
    %568 = vector.shape_cast %567 : vector<128xf32> to vector<1x128xf32>
    %569 = vector.broadcast %568 : vector<1x128xf32> to vector<8x128xf32>
    %570 = arith.divf %566, %569 : vector<8x128xf32>
    %cst_149 = arith.constant 0.991999983 : f32
    %571 = vector.broadcast %cst_149 : f32 to vector<8x128xf32>
    %572 = arith.mulf %571, %570 : vector<8x128xf32>
    %cst_150 = arith.constant 1.000000e-03 : f32
    %573 = vector.broadcast %cst_150 : f32 to vector<8x128xf32>
    %574 = arith.addf %573, %572 : vector<8x128xf32>
    %cst_151 = arith.constant dense<0.000000e+00> : vector<8x128xf32>
    %575 = tpu.matmul %19, %561, %cst_151 {dimension_numbers = #tpu.dot_dimension_numbers<[1], [0], [0], [1], [0, 0, 1, 1], [], []>} : vector<8x8xf32>, vector<8x128xf32>, vector<8x128xf32> -> vector<8x128xf32>
    %cst_152 = arith.constant dense<0.000000e+00> : vector<8x128xf32>
    %576 = tpu.matmul %19, %574, %cst_152 {dimension_numbers = #tpu.dot_dimension_numbers<[1], [0], [0], [1], [0, 0, 1, 1], [], []>} : vector<8x8xf32>, vector<8x128xf32>, vector<8x128xf32> -> vector<8x128xf32>
    %cst_153 = arith.constant 6.000000e+00 : f32
    %577 = vector.broadcast %cst_153 : f32 to vector<8x128xf32>
    %578 = arith.mulf %577, %575 : vector<8x128xf32>
    %cst_154 = arith.constant 3.000000e+00 : f32
    %579 = vector.broadcast %cst_154 : f32 to vector<8x128xf32>
    %580 = arith.subf %578, %579 : vector<8x128xf32>
    %cst_155 = arith.constant 6.000000e+00 : f32
    %581 = vector.broadcast %cst_155 : f32 to vector<8x128xf32>
    %582 = arith.mulf %581, %576 : vector<8x128xf32>
    %cst_156 = arith.constant 3.000000e+00 : f32
    %583 = vector.broadcast %cst_156 : f32 to vector<8x128xf32>
    %584 = arith.subf %582, %583 : vector<8x128xf32>
    %cst_157 = arith.constant 0.000000e+00 : f32
    %585 = vector.broadcast %cst_157 : f32 to vector<7x128xf32>
    %586 = arith.maximumf %547, %585 : vector<7x128xf32>
    %587 = math.absf %547 : vector<7x128xf32>
    %cst_158 = arith.constant 0.000000e+00 : f32
    %588 = vector.broadcast %cst_158 : f32 to vector<7x128xf32>
    %589 = arith.subf %588, %587 : vector<7x128xf32>
    %590 = math.exp %589 : vector<7x128xf32>
    %cst_159 = arith.constant 1.000000e+00 : f32
    %591 = vector.broadcast %cst_159 : f32 to vector<7x128xf32>
    %592 = arith.addf %591, %590 : vector<7x128xf32>
    %593 = math.log %592 : vector<7x128xf32>
    %594 = arith.addf %586, %593 : vector<7x128xf32>
    %cst_160 = arith.constant 1.000000e-03 : f32
    %595 = vector.broadcast %cst_160 : f32 to vector<7x128xf32>
    %596 = arith.addf %595, %594 : vector<7x128xf32>
    %cst_161 = arith.constant 0.000000e+00 : f32
    %597 = vector.broadcast %cst_161 : f32 to vector<8x128xf32>
    %598 = arith.subf %597, %548 : vector<8x128xf32>
    %599 = math.exp %598 : vector<8x128xf32>
    %cst_162 = arith.constant 1.000000e+00 : f32
    %600 = vector.broadcast %cst_162 : f32 to vector<8x128xf32>
    %601 = arith.addf %600, %599 : vector<8x128xf32>
    %cst_163 = arith.constant 1.000000e+00 : f32
    %602 = vector.broadcast %cst_163 : f32 to vector<8x128xf32>
    %603 = arith.divf %602, %601 : vector<8x128xf32>
    %cst_164 = arith.constant 0.949999988 : f32
    %604 = vector.broadcast %cst_164 : f32 to vector<8x128xf32>
    %605 = arith.mulf %604, %603 : vector<8x128xf32>
    %cst_165 = arith.constant 2.500000e-02 : f32
    %606 = vector.broadcast %cst_165 : f32 to vector<8x128xf32>
    %607 = arith.addf %605, %606 : vector<8x128xf32>
    %cst_166 = arith.constant -2.99999905 : f32
    %608 = vector.broadcast %cst_166 : f32 to vector<1x128xf32>
    %609 = arith.cmpf oge, %381, %608 : vector<1x128xf32>
    %610 = arith.extui %609 : vector<1x128xi1> to vector<1x128xi32>
    %cst_167 = arith.constant 3.00000095 : f32
    %611 = vector.broadcast %cst_167 : f32 to vector<1x128xf32>
    %612 = arith.cmpf oge, %381, %611 : vector<1x128xf32>
    %613 = arith.extui %612 : vector<1x128xi1> to vector<1x128xi32>
    %614 = arith.addi %610, %613 : vector<1x128xi32>
    %615 = vector.extract_strided_slice %580 {offsets = [0, 0], sizes = [7, 128], strides = [1, 1]} : vector<8x128xf32> to vector<7x128xf32>
    %cst_168 = arith.constant 9.99999997E-7 : f32
    %616 = vector.broadcast %cst_168 : f32 to vector<7x128xf32>
    %617 = arith.addf %615, %616 : vector<7x128xf32>
    %618 = vector.broadcast %381 : vector<1x128xf32> to vector<7x128xf32>
    %619 = arith.cmpf oge, %618, %617 : vector<7x128xf32>
    %620 = arith.extui %619 : vector<7x128xi1> to vector<7x128xi32>
    %cst_169 = arith.constant dense<0> : vector<128xi32>
    %621 = vector.multi_reduction <add>, %620, %cst_169 [0] : vector<7x128xi32> to vector<128xi32>
    %622 = vector.shape_cast %621 : vector<128xi32> to vector<1x128xi32>
    %623 = arith.addi %614, %622 : vector<1x128xi32>
    %c1_i32_170 = arith.constant 1 : i32
    %624 = vector.broadcast %c1_i32_170 : i32 to vector<1x128xi32>
    %625 = arith.subi %623, %624 : vector<1x128xi32>
    %c0_i32_171 = arith.constant 0 : i32
    %c7_i32_172 = arith.constant 7 : i32
    %626 = vector.broadcast %c0_i32_171 : i32 to vector<1x128xi32>
    %627 = arith.maxsi %626, %625 : vector<1x128xi32>
    %628 = vector.broadcast %c7_i32_172 : i32 to vector<1x128xi32>
    %629 = arith.minsi %628, %627 : vector<1x128xi32>
    %630 = vector.broadcast %629 : vector<1x128xi32> to vector<8x128xi32>
    %631 = arith.cmpi eq, %13, %630 : vector<8x128xi32>
    %632 = arith.extui %631 : vector<8x128xi1> to vector<8x128xi32>
    %633 = arith.sitofp %632 : vector<8x128xi32> to vector<8x128xf32>
    %c1_i32_173 = arith.constant 1 : i32
    %634 = vector.broadcast %c1_i32_173 : i32 to vector<1x128xi32>
    %635 = arith.subi %629, %634 : vector<1x128xi32>
    %636 = vector.broadcast %635 : vector<1x128xi32> to vector<8x128xi32>
    %637 = arith.cmpi eq, %13, %636 : vector<8x128xi32>
    %638 = arith.extui %637 : vector<8x128xi1> to vector<8x128xi32>
    %639 = arith.sitofp %638 : vector<8x128xi32> to vector<8x128xf32>
    %640 = vector.broadcast %629 : vector<1x128xi32> to vector<7x128xi32>
    %641 = arith.cmpi eq, %14, %640 : vector<7x128xi32>
    %642 = arith.extui %641 : vector<7x128xi1> to vector<7x128xi32>
    %643 = arith.sitofp %642 : vector<7x128xi32> to vector<7x128xf32>
    %c1_i32_174 = arith.constant 1 : i32
    %644 = vector.broadcast %c1_i32_174 : i32 to vector<1x128xi32>
    %645 = arith.subi %629, %644 : vector<1x128xi32>
    %646 = vector.broadcast %645 : vector<1x128xi32> to vector<7x128xi32>
    %647 = arith.cmpi eq, %14, %646 : vector<7x128xi32>
    %648 = arith.extui %647 : vector<7x128xi1> to vector<7x128xi32>
    %649 = arith.sitofp %648 : vector<7x128xi32> to vector<7x128xf32>
    %c0_i32_175 = arith.constant 0 : i32
    %650 = vector.broadcast %c0_i32_175 : i32 to vector<1x128xi32>
    %651 = arith.cmpi eq, %629, %650 : vector<1x128xi32>
    %c7_i32_176 = arith.constant 7 : i32
    %652 = vector.broadcast %c7_i32_176 : i32 to vector<1x128xi32>
    %653 = arith.cmpi eq, %629, %652 : vector<1x128xi32>
    %654 = arith.mulf %580, %639 : vector<8x128xf32>
    %cst_177 = arith.constant dense<0.000000e+00> : vector<128xf32>
    %655 = vector.multi_reduction <add>, %654, %cst_177 [0] : vector<8x128xf32> to vector<128xf32>
    %656 = vector.shape_cast %655 : vector<128xf32> to vector<1x128xf32>
    %cst_178 = arith.constant -3.000000e+00 : f32
    %657 = vector.broadcast %cst_178 : f32 to vector<1x128xf32>
    %658 = arith.select %651, %657, %656 : vector<1x128xi1>, vector<1x128xf32>
    %659 = arith.mulf %580, %633 : vector<8x128xf32>
    %cst_179 = arith.constant dense<0.000000e+00> : vector<128xf32>
    %660 = vector.multi_reduction <add>, %659, %cst_179 [0] : vector<8x128xf32> to vector<128xf32>
    %661 = vector.shape_cast %660 : vector<128xf32> to vector<1x128xf32>
    %cst_180 = arith.constant 3.000000e+00 : f32
    %662 = vector.broadcast %cst_180 : f32 to vector<1x128xf32>
    %663 = arith.select %653, %662, %661 : vector<1x128xi1>, vector<1x128xf32>
    %664 = arith.subf %663, %658 : vector<1x128xf32>
    %665 = arith.mulf %584, %639 : vector<8x128xf32>
    %cst_181 = arith.constant dense<0.000000e+00> : vector<128xf32>
    %666 = vector.multi_reduction <add>, %665, %cst_181 [0] : vector<8x128xf32> to vector<128xf32>
    %667 = vector.shape_cast %666 : vector<128xf32> to vector<1x128xf32>
    %cst_182 = arith.constant -3.000000e+00 : f32
    %668 = vector.broadcast %cst_182 : f32 to vector<1x128xf32>
    %669 = arith.select %651, %668, %667 : vector<1x128xi1>, vector<1x128xf32>
    %670 = arith.mulf %584, %633 : vector<8x128xf32>
    %cst_183 = arith.constant dense<0.000000e+00> : vector<128xf32>
    %671 = vector.multi_reduction <add>, %670, %cst_183 [0] : vector<8x128xf32> to vector<128xf32>
    %672 = vector.shape_cast %671 : vector<128xf32> to vector<1x128xf32>
    %cst_184 = arith.constant 3.000000e+00 : f32
    %673 = vector.broadcast %cst_184 : f32 to vector<1x128xf32>
    %674 = arith.select %653, %673, %672 : vector<1x128xi1>, vector<1x128xf32>
    %675 = arith.subf %674, %669 : vector<1x128xf32>
    %cst_185 = arith.constant 1.000000e+00 : f32
    %676 = vector.broadcast %cst_185 : f32 to vector<1x128xf32>
    %677 = arith.divf %676, %664 : vector<1x128xf32>
    %678 = arith.mulf %675, %677 : vector<1x128xf32>
    %679 = arith.mulf %596, %649 : vector<7x128xf32>
    %cst_186 = arith.constant dense<0.000000e+00> : vector<128xf32>
    %680 = vector.multi_reduction <add>, %679, %cst_186 [0] : vector<7x128xf32> to vector<128xf32>
    %681 = vector.shape_cast %680 : vector<128xf32> to vector<1x128xf32>
    %cst_187 = arith.constant 1.000000e+00 : f32
    %682 = vector.broadcast %cst_187 : f32 to vector<1x128xf32>
    %683 = arith.select %651, %682, %681 : vector<1x128xi1>, vector<1x128xf32>
    %684 = arith.mulf %596, %643 : vector<7x128xf32>
    %cst_188 = arith.constant dense<0.000000e+00> : vector<128xf32>
    %685 = vector.multi_reduction <add>, %684, %cst_188 [0] : vector<7x128xf32> to vector<128xf32>
    %686 = vector.shape_cast %685 : vector<128xf32> to vector<1x128xf32>
    %cst_189 = arith.constant 1.000000e+00 : f32
    %687 = vector.broadcast %cst_189 : f32 to vector<1x128xf32>
    %688 = arith.select %653, %687, %686 : vector<1x128xi1>, vector<1x128xf32>
    %689 = arith.mulf %607, %633 : vector<8x128xf32>
    %cst_190 = arith.constant dense<0.000000e+00> : vector<128xf32>
    %690 = vector.multi_reduction <add>, %689, %cst_190 [0] : vector<8x128xf32> to vector<128xf32>
    %691 = vector.shape_cast %690 : vector<128xf32> to vector<1x128xf32>
    %692 = arith.divf %683, %688 : vector<1x128xf32>
    %693 = math.sqrt %692 : vector<1x128xf32>
    %694 = arith.mulf %691, %683 : vector<1x128xf32>
    %cst_191 = arith.constant 1.000000e+00 : f32
    %695 = vector.broadcast %cst_191 : f32 to vector<1x128xf32>
    %696 = arith.subf %695, %691 : vector<1x128xf32>
    %697 = arith.mulf %696, %693 : vector<1x128xf32>
    %698 = arith.mulf %697, %688 : vector<1x128xf32>
    %699 = arith.addf %694, %698 : vector<1x128xf32>
    %700 = arith.divf %699, %678 : vector<1x128xf32>
    %cst_192 = arith.constant 1.000000e+00 : f32
    %701 = vector.broadcast %cst_192 : f32 to vector<1x128xf32>
    %702 = arith.subf %701, %691 : vector<1x128xf32>
    %703 = arith.mulf %702, %669 : vector<1x128xf32>
    %704 = arith.mulf %691, %693 : vector<1x128xf32>
    %705 = arith.mulf %704, %674 : vector<1x128xf32>
    %706 = arith.addf %703, %705 : vector<1x128xf32>
    %cst_193 = arith.constant 1.000000e+00 : f32
    %707 = vector.broadcast %cst_193 : f32 to vector<1x128xf32>
    %708 = arith.subf %707, %691 : vector<1x128xf32>
    %709 = arith.mulf %691, %693 : vector<1x128xf32>
    %710 = arith.addf %708, %709 : vector<1x128xf32>
    %711 = arith.divf %706, %710 : vector<1x128xf32>
    %712 = arith.subf %381, %658 : vector<1x128xf32>
    %713 = arith.mulf %712, %677 : vector<1x128xf32>
    %714 = arith.subf %691, %713 : vector<1x128xf32>
    %715 = arith.mulf %669, %714 : vector<1x128xf32>
    %716 = arith.mulf %700, %711 : vector<1x128xf32>
    %717 = arith.mulf %716, %713 : vector<1x128xf32>
    %718 = arith.addf %715, %717 : vector<1x128xf32>
    %719 = arith.subf %691, %713 : vector<1x128xf32>
    %720 = arith.mulf %700, %713 : vector<1x128xf32>
    %721 = arith.addf %719, %720 : vector<1x128xf32>
    %722 = arith.divf %718, %721 : vector<1x128xf32>
    %723 = arith.mulf %700, %711 : vector<1x128xf32>
    %cst_194 = arith.constant 1.000000e+00 : f32
    %724 = vector.broadcast %cst_194 : f32 to vector<1x128xf32>
    %725 = arith.subf %724, %713 : vector<1x128xf32>
    %726 = arith.mulf %723, %725 : vector<1x128xf32>
    %727 = arith.mulf %693, %674 : vector<1x128xf32>
    %728 = arith.subf %713, %691 : vector<1x128xf32>
    %729 = arith.mulf %727, %728 : vector<1x128xf32>
    %730 = arith.addf %726, %729 : vector<1x128xf32>
    %cst_195 = arith.constant 1.000000e+00 : f32
    %731 = vector.broadcast %cst_195 : f32 to vector<1x128xf32>
    %732 = arith.subf %731, %713 : vector<1x128xf32>
    %733 = arith.mulf %700, %732 : vector<1x128xf32>
    %734 = arith.subf %713, %691 : vector<1x128xf32>
    %735 = arith.mulf %693, %734 : vector<1x128xf32>
    %736 = arith.addf %733, %735 : vector<1x128xf32>
    %737 = arith.divf %730, %736 : vector<1x128xf32>
    %738 = arith.cmpf ole, %713, %691 : vector<1x128xf32>
    %739 = arith.select %738, %722, %737 : vector<1x128xi1>, vector<1x128xf32>
    %cst_196 = arith.constant -3.000000e+00 : f32
    %740 = vector.broadcast %cst_196 : f32 to vector<1x128xf32>
    %741 = arith.cmpf oge, %381, %740 : vector<1x128xf32>
    %cst_197 = arith.constant 3.000000e+00 : f32
    %742 = vector.broadcast %cst_197 : f32 to vector<1x128xf32>
    %743 = arith.cmpf ole, %381, %742 : vector<1x128xf32>
    %744 = arith.andi %741, %743 : vector<1x128xi1>
    %745 = arith.select %744, %739, %381 : vector<1x128xi1>, vector<1x128xf32>
    %c2 = arith.constant 2 : index
    %c0_198 = arith.constant 0 : index
    %746 = vector.load %arg9[%c2, %c0_198] : memref<8x128xf32, #tpu.memory_space<vmem>>, vector<1x128xf32>
    tpu.vector_store %arg9[%c2, %c0_198], %529 {strides = array<i32>} : memref<8x128xf32, #tpu.memory_space<vmem>>, vector<1x128xf32>,
    %c3 = arith.constant 3 : index
    %c0_199 = arith.constant 0 : index
    %747 = vector.load %arg9[%c3, %c0_199] : memref<8x128xf32, #tpu.memory_space<vmem>>, vector<1x128xf32>
    tpu.vector_store %arg9[%c3, %c0_199], %745 {strides = array<i32>} : memref<8x128xf32, #tpu.memory_space<vmem>>, vector<1x128xf32>,
    %cst_200 = arith.constant -2.99999905 : f32
    %748 = vector.broadcast %cst_200 : f32 to vector<1x128xf32>
    %749 = arith.cmpf oge, %529, %748 : vector<1x128xf32>
    %750 = arith.extui %749 : vector<1x128xi1> to vector<1x128xi32>
    %cst_201 = arith.constant 3.00000095 : f32
    %751 = vector.broadcast %cst_201 : f32 to vector<1x128xf32>
    %752 = arith.cmpf oge, %529, %751 : vector<1x128xf32>
    %753 = arith.extui %752 : vector<1x128xi1> to vector<1x128xi32>
    %754 = arith.addi %750, %753 : vector<1x128xi32>
    %755 = vector.extract_strided_slice %9 {offsets = [0, 0], sizes = [7, 1], strides = [1, 1]} : vector<8x1xf32> to vector<7x1xf32>
    %cst_202 = arith.constant 9.99999997E-7 : f32
    %756 = vector.broadcast %cst_202 : f32 to vector<7x1xf32>
    %757 = arith.addf %755, %756 : vector<7x1xf32>
    %758 = vector.broadcast %529 : vector<1x128xf32> to vector<7x128xf32>
    %759 = vector.broadcast %757 : vector<7x1xf32> to vector<7x128xf32>
    %760 = arith.cmpf oge, %758, %759 : vector<7x128xf32>
    %761 = arith.extui %760 : vector<7x128xi1> to vector<7x128xi32>
    %cst_203 = arith.constant dense<0> : vector<128xi32>
    %762 = vector.multi_reduction <add>, %761, %cst_203 [0] : vector<7x128xi32> to vector<128xi32>
    %763 = vector.shape_cast %762 : vector<128xi32> to vector<1x128xi32>
    %764 = arith.addi %754, %763 : vector<1x128xi32>
    %c1_i32_204 = arith.constant 1 : i32
    %765 = vector.broadcast %c1_i32_204 : i32 to vector<1x128xi32>
    %766 = arith.subi %764, %765 : vector<1x128xi32>
    %c0_i32_205 = arith.constant 0 : i32
    %c7_i32_206 = arith.constant 7 : i32
    %767 = vector.broadcast %c0_i32_205 : i32 to vector<1x128xi32>
    %768 = arith.maxsi %767, %766 : vector<1x128xi32>
    %769 = vector.broadcast %c7_i32_206 : i32 to vector<1x128xi32>
    %770 = arith.minsi %769, %768 : vector<1x128xi32>
    %771 = vector.broadcast %770 : vector<1x128xi32> to vector<8x128xi32>
    %772 = arith.cmpi eq, %13, %771 : vector<8x128xi32>
    %773 = arith.extui %772 : vector<8x128xi1> to vector<8x128xi32>
    %774 = arith.sitofp %773 : vector<8x128xi32> to vector<8x128xf32>
    %c1_i32_207 = arith.constant 1 : i32
    %775 = vector.broadcast %c1_i32_207 : i32 to vector<1x128xi32>
    %776 = arith.subi %770, %775 : vector<1x128xi32>
    %777 = vector.broadcast %776 : vector<1x128xi32> to vector<8x128xi32>
    %778 = arith.cmpi eq, %13, %777 : vector<8x128xi32>
    %779 = arith.extui %778 : vector<8x128xi1> to vector<8x128xi32>
    %780 = arith.sitofp %779 : vector<8x128xi32> to vector<8x128xf32>
    %781 = vector.broadcast %770 : vector<1x128xi32> to vector<7x128xi32>
    %782 = arith.cmpi eq, %14, %781 : vector<7x128xi32>
    %783 = arith.extui %782 : vector<7x128xi1> to vector<7x128xi32>
    %784 = arith.sitofp %783 : vector<7x128xi32> to vector<7x128xf32>
    %c1_i32_208 = arith.constant 1 : i32
    %785 = vector.broadcast %c1_i32_208 : i32 to vector<1x128xi32>
    %786 = arith.subi %770, %785 : vector<1x128xi32>
    %787 = vector.broadcast %786 : vector<1x128xi32> to vector<7x128xi32>
    %788 = arith.cmpi eq, %14, %787 : vector<7x128xi32>
    %789 = arith.extui %788 : vector<7x128xi1> to vector<7x128xi32>
    %790 = arith.sitofp %789 : vector<7x128xi32> to vector<7x128xf32>
    %c0_i32_209 = arith.constant 0 : i32
    %791 = vector.broadcast %c0_i32_209 : i32 to vector<1x128xi32>
    %792 = arith.cmpi eq, %770, %791 : vector<1x128xi32>
    %c7_i32_210 = arith.constant 7 : i32
    %793 = vector.broadcast %c7_i32_210 : i32 to vector<1x128xi32>
    %794 = arith.cmpi eq, %770, %793 : vector<1x128xi32>
    %795 = vector.broadcast %9 : vector<8x1xf32> to vector<8x128xf32>
    %796 = arith.mulf %795, %780 : vector<8x128xf32>
    %cst_211 = arith.constant dense<0.000000e+00> : vector<128xf32>
    %797 = vector.multi_reduction <add>, %796, %cst_211 [0] : vector<8x128xf32> to vector<128xf32>
    %798 = vector.shape_cast %797 : vector<128xf32> to vector<1x128xf32>
    %cst_212 = arith.constant -3.000000e+00 : f32
    %799 = vector.broadcast %cst_212 : f32 to vector<1x128xf32>
    %800 = arith.select %792, %799, %798 : vector<1x128xi1>, vector<1x128xf32>
    %801 = vector.broadcast %9 : vector<8x1xf32> to vector<8x128xf32>
    %802 = arith.mulf %801, %774 : vector<8x128xf32>
    %cst_213 = arith.constant dense<0.000000e+00> : vector<128xf32>
    %803 = vector.multi_reduction <add>, %802, %cst_213 [0] : vector<8x128xf32> to vector<128xf32>
    %804 = vector.shape_cast %803 : vector<128xf32> to vector<1x128xf32>
    %cst_214 = arith.constant 3.000000e+00 : f32
    %805 = vector.broadcast %cst_214 : f32 to vector<1x128xf32>
    %806 = arith.select %794, %805, %804 : vector<1x128xi1>, vector<1x128xf32>
    %807 = arith.subf %806, %800 : vector<1x128xf32>
    %808 = vector.broadcast %10 : vector<8x1xf32> to vector<8x128xf32>
    %809 = arith.mulf %808, %780 : vector<8x128xf32>
    %cst_215 = arith.constant dense<0.000000e+00> : vector<128xf32>
    %810 = vector.multi_reduction <add>, %809, %cst_215 [0] : vector<8x128xf32> to vector<128xf32>
    %811 = vector.shape_cast %810 : vector<128xf32> to vector<1x128xf32>
    %cst_216 = arith.constant -3.000000e+00 : f32
    %812 = vector.broadcast %cst_216 : f32 to vector<1x128xf32>
    %813 = arith.select %792, %812, %811 : vector<1x128xi1>, vector<1x128xf32>
    %814 = vector.broadcast %10 : vector<8x1xf32> to vector<8x128xf32>
    %815 = arith.mulf %814, %774 : vector<8x128xf32>
    %cst_217 = arith.constant dense<0.000000e+00> : vector<128xf32>
    %816 = vector.multi_reduction <add>, %815, %cst_217 [0] : vector<8x128xf32> to vector<128xf32>
    %817 = vector.shape_cast %816 : vector<128xf32> to vector<1x128xf32>
    %cst_218 = arith.constant 3.000000e+00 : f32
    %818 = vector.broadcast %cst_218 : f32 to vector<1x128xf32>
    %819 = arith.select %794, %818, %817 : vector<1x128xi1>, vector<1x128xf32>
    %820 = arith.subf %819, %813 : vector<1x128xf32>
    %cst_219 = arith.constant 1.000000e+00 : f32
    %821 = vector.broadcast %cst_219 : f32 to vector<1x128xf32>
    %822 = arith.divf %821, %807 : vector<1x128xf32>
    %823 = arith.mulf %820, %822 : vector<1x128xf32>
    %824 = vector.broadcast %11 : vector<7x1xf32> to vector<7x128xf32>
    %825 = arith.mulf %824, %790 : vector<7x128xf32>
    %cst_220 = arith.constant dense<0.000000e+00> : vector<128xf32>
    %826 = vector.multi_reduction <add>, %825, %cst_220 [0] : vector<7x128xf32> to vector<128xf32>
    %827 = vector.shape_cast %826 : vector<128xf32> to vector<1x128xf32>
    %cst_221 = arith.constant 1.000000e+00 : f32
    %828 = vector.broadcast %cst_221 : f32 to vector<1x128xf32>
    %829 = arith.select %792, %828, %827 : vector<1x128xi1>, vector<1x128xf32>
    %830 = vector.broadcast %11 : vector<7x1xf32> to vector<7x128xf32>
    %831 = arith.mulf %830, %784 : vector<7x128xf32>
    %cst_222 = arith.constant dense<0.000000e+00> : vector<128xf32>
    %832 = vector.multi_reduction <add>, %831, %cst_222 [0] : vector<7x128xf32> to vector<128xf32>
    %833 = vector.shape_cast %832 : vector<128xf32> to vector<1x128xf32>
    %cst_223 = arith.constant 1.000000e+00 : f32
    %834 = vector.broadcast %cst_223 : f32 to vector<1x128xf32>
    %835 = arith.select %794, %834, %833 : vector<1x128xi1>, vector<1x128xf32>
    %836 = vector.broadcast %12 : vector<8x1xf32> to vector<8x128xf32>
    %837 = arith.mulf %836, %774 : vector<8x128xf32>
    %cst_224 = arith.constant dense<0.000000e+00> : vector<128xf32>
    %838 = vector.multi_reduction <add>, %837, %cst_224 [0] : vector<8x128xf32> to vector<128xf32>
    %839 = vector.shape_cast %838 : vector<128xf32> to vector<1x128xf32>
    %840 = arith.divf %829, %835 : vector<1x128xf32>
    %841 = math.sqrt %840 : vector<1x128xf32>
    %842 = arith.mulf %839, %829 : vector<1x128xf32>
    %cst_225 = arith.constant 1.000000e+00 : f32
    %843 = vector.broadcast %cst_225 : f32 to vector<1x128xf32>
    %844 = arith.subf %843, %839 : vector<1x128xf32>
    %845 = arith.mulf %844, %841 : vector<1x128xf32>
    %846 = arith.mulf %845, %835 : vector<1x128xf32>
    %847 = arith.addf %842, %846 : vector<1x128xf32>
    %848 = arith.divf %847, %823 : vector<1x128xf32>
    %cst_226 = arith.constant 1.000000e+00 : f32
    %849 = vector.broadcast %cst_226 : f32 to vector<1x128xf32>
    %850 = arith.subf %849, %839 : vector<1x128xf32>
    %851 = arith.mulf %850, %813 : vector<1x128xf32>
    %852 = arith.mulf %839, %841 : vector<1x128xf32>
    %853 = arith.mulf %852, %819 : vector<1x128xf32>
    %854 = arith.addf %851, %853 : vector<1x128xf32>
    %cst_227 = arith.constant 1.000000e+00 : f32
    %855 = vector.broadcast %cst_227 : f32 to vector<1x128xf32>
    %856 = arith.subf %855, %839 : vector<1x128xf32>
    %857 = arith.mulf %839, %841 : vector<1x128xf32>
    %858 = arith.addf %856, %857 : vector<1x128xf32>
    %859 = arith.divf %854, %858 : vector<1x128xf32>
    %860 = arith.subf %529, %800 : vector<1x128xf32>
    %861 = arith.mulf %860, %822 : vector<1x128xf32>
    %862 = arith.subf %839, %861 : vector<1x128xf32>
    %863 = arith.mulf %813, %862 : vector<1x128xf32>
    %864 = arith.mulf %848, %859 : vector<1x128xf32>
    %865 = arith.mulf %864, %861 : vector<1x128xf32>
    %866 = arith.addf %863, %865 : vector<1x128xf32>
    %867 = arith.subf %839, %861 : vector<1x128xf32>
    %868 = arith.mulf %848, %861 : vector<1x128xf32>
    %869 = arith.addf %867, %868 : vector<1x128xf32>
    %870 = arith.divf %866, %869 : vector<1x128xf32>
    %871 = arith.mulf %848, %859 : vector<1x128xf32>
    %cst_228 = arith.constant 1.000000e+00 : f32
    %872 = vector.broadcast %cst_228 : f32 to vector<1x128xf32>
    %873 = arith.subf %872, %861 : vector<1x128xf32>
    %874 = arith.mulf %871, %873 : vector<1x128xf32>
    %875 = arith.mulf %841, %819 : vector<1x128xf32>
    %876 = arith.subf %861, %839 : vector<1x128xf32>
    %877 = arith.mulf %875, %876 : vector<1x128xf32>
    %878 = arith.addf %874, %877 : vector<1x128xf32>
    %cst_229 = arith.constant 1.000000e+00 : f32
    %879 = vector.broadcast %cst_229 : f32 to vector<1x128xf32>
    %880 = arith.subf %879, %861 : vector<1x128xf32>
    %881 = arith.mulf %848, %880 : vector<1x128xf32>
    %882 = arith.subf %861, %839 : vector<1x128xf32>
    %883 = arith.mulf %841, %882 : vector<1x128xf32>
    %884 = arith.addf %881, %883 : vector<1x128xf32>
    %885 = arith.divf %878, %884 : vector<1x128xf32>
    %886 = arith.cmpf ole, %861, %839 : vector<1x128xf32>
    %887 = arith.select %886, %870, %885 : vector<1x128xi1>, vector<1x128xf32>
    %cst_230 = arith.constant -3.000000e+00 : f32
    %888 = vector.broadcast %cst_230 : f32 to vector<1x128xf32>
    %889 = arith.cmpf oge, %529, %888 : vector<1x128xf32>
    %cst_231 = arith.constant 3.000000e+00 : f32
    %890 = vector.broadcast %cst_231 : f32 to vector<1x128xf32>
    %891 = arith.cmpf ole, %529, %890 : vector<1x128xf32>
    %892 = arith.andi %889, %891 : vector<1x128xi1>
    %893 = arith.select %892, %887, %529 : vector<1x128xi1>, vector<1x128xf32>
    %894 = vector.broadcast %2 : vector<32x1xf32> to vector<32x128xf32>
    %895 = vector.broadcast %529 : vector<1x128xf32> to vector<32x128xf32>
    %896 = arith.mulf %894, %895 : vector<32x128xf32>
    %897 = vector.broadcast %3 : vector<32x1xf32> to vector<32x128xf32>
    %898 = arith.addf %896, %897 : vector<32x128xf32>
    %cst_232 = arith.constant 0.000000e+00 : f32
    %899 = vector.broadcast %cst_232 : f32 to vector<32x128xf32>
    %900 = arith.maximumf %898, %899 : vector<32x128xf32>
    %cst_233 = arith.constant dense<0.000000e+00> : vector<32x128xf32>
    %901 = tpu.matmul %4, %900, %cst_233 {dimension_numbers = #tpu.dot_dimension_numbers<[1], [0], [0], [1], [0, 0, 1, 1], [], []>} : vector<32x32xf32>, vector<32x128xf32>, vector<32x128xf32> -> vector<32x128xf32>
    %902 = vector.broadcast %5 : vector<32x1xf32> to vector<32x128xf32>
    %903 = arith.addf %901, %902 : vector<32x128xf32>
    %cst_234 = arith.constant 0.000000e+00 : f32
    %904 = vector.broadcast %cst_234 : f32 to vector<32x128xf32>
    %905 = arith.maximumf %903, %904 : vector<32x128xf32>
    %cst_235 = arith.constant dense<0.000000e+00> : vector<32x128xf32>
    %906 = tpu.matmul %6, %905, %cst_235 {dimension_numbers = #tpu.dot_dimension_numbers<[1], [0], [0], [1], [0, 0, 1, 1], [], []>} : vector<32x32xf32>, vector<32x128xf32>, vector<32x128xf32> -> vector<32x128xf32>
    %907 = vector.broadcast %7 : vector<32x1xf32> to vector<32x128xf32>
    %908 = arith.addf %906, %907 : vector<32x128xf32>
    %909 = vector.extract_strided_slice %908 {offsets = [0, 0], sizes = [8, 128], strides = [1, 1]} : vector<32x128xf32> to vector<8x128xf32>
    %910 = vector.extract_strided_slice %908 {offsets = [8, 0], sizes = [8, 128], strides = [1, 1]} : vector<32x128xf32> to vector<8x128xf32>
    %911 = vector.extract_strided_slice %908 {offsets = [16, 0], sizes = [7, 128], strides = [1, 1]} : vector<32x128xf32> to vector<7x128xf32>
    %912 = vector.extract_strided_slice %908 {offsets = [24, 0], sizes = [8, 128], strides = [1, 1]} : vector<32x128xf32> to vector<8x128xf32>
    %cst_236 = arith.constant dense<0xFF800000> : vector<128xf32>
    %913 = vector.multi_reduction <maximumf>, %909, %cst_236 [0] : vector<8x128xf32> to vector<128xf32>
    %914 = vector.shape_cast %913 : vector<128xf32> to vector<1x128xf32>
    %915 = vector.broadcast %914 : vector<1x128xf32> to vector<8x128xf32>
    %916 = arith.subf %909, %915 : vector<8x128xf32>
    %917 = math.exp %916 : vector<8x128xf32>
    %cst_237 = arith.constant dense<0.000000e+00> : vector<128xf32>
    %918 = vector.multi_reduction <add>, %917, %cst_237 [0] : vector<8x128xf32> to vector<128xf32>
    %919 = vector.shape_cast %918 : vector<128xf32> to vector<1x128xf32>
    %920 = vector.broadcast %919 : vector<1x128xf32> to vector<8x128xf32>
    %921 = arith.divf %917, %920 : vector<8x128xf32>
    %cst_238 = arith.constant 0.991999983 : f32
    %922 = vector.broadcast %cst_238 : f32 to vector<8x128xf32>
    %923 = arith.mulf %922, %921 : vector<8x128xf32>
    %cst_239 = arith.constant 1.000000e-03 : f32
    %924 = vector.broadcast %cst_239 : f32 to vector<8x128xf32>
    %925 = arith.addf %924, %923 : vector<8x128xf32>
    %cst_240 = arith.constant dense<0xFF800000> : vector<128xf32>
    %926 = vector.multi_reduction <maximumf>, %910, %cst_240 [0] : vector<8x128xf32> to vector<128xf32>
    %927 = vector.shape_cast %926 : vector<128xf32> to vector<1x128xf32>
    %928 = vector.broadcast %927 : vector<1x128xf32> to vector<8x128xf32>
    %929 = arith.subf %910, %928 : vector<8x128xf32>
    %930 = math.exp %929 : vector<8x128xf32>
    %cst_241 = arith.constant dense<0.000000e+00> : vector<128xf32>
    %931 = vector.multi_reduction <add>, %930, %cst_241 [0] : vector<8x128xf32> to vector<128xf32>
    %932 = vector.shape_cast %931 : vector<128xf32> to vector<1x128xf32>
    %933 = vector.broadcast %932 : vector<1x128xf32> to vector<8x128xf32>
    %934 = arith.divf %930, %933 : vector<8x128xf32>
    %cst_242 = arith.constant 0.991999983 : f32
    %935 = vector.broadcast %cst_242 : f32 to vector<8x128xf32>
    %936 = arith.mulf %935, %934 : vector<8x128xf32>
    %cst_243 = arith.constant 1.000000e-03 : f32
    %937 = vector.broadcast %cst_243 : f32 to vector<8x128xf32>
    %938 = arith.addf %937, %936 : vector<8x128xf32>
    %cst_244 = arith.constant dense<0.000000e+00> : vector<8x128xf32>
    %939 = tpu.matmul %19, %925, %cst_244 {dimension_numbers = #tpu.dot_dimension_numbers<[1], [0], [0], [1], [0, 0, 1, 1], [], []>} : vector<8x8xf32>, vector<8x128xf32>, vector<8x128xf32> -> vector<8x128xf32>
    %cst_245 = arith.constant dense<0.000000e+00> : vector<8x128xf32>
    %940 = tpu.matmul %19, %938, %cst_245 {dimension_numbers = #tpu.dot_dimension_numbers<[1], [0], [0], [1], [0, 0, 1, 1], [], []>} : vector<8x8xf32>, vector<8x128xf32>, vector<8x128xf32> -> vector<8x128xf32>
    %cst_246 = arith.constant 6.000000e+00 : f32
    %941 = vector.broadcast %cst_246 : f32 to vector<8x128xf32>
    %942 = arith.mulf %941, %939 : vector<8x128xf32>
    %cst_247 = arith.constant 3.000000e+00 : f32
    %943 = vector.broadcast %cst_247 : f32 to vector<8x128xf32>
    %944 = arith.subf %942, %943 : vector<8x128xf32>
    %cst_248 = arith.constant 6.000000e+00 : f32
    %945 = vector.broadcast %cst_248 : f32 to vector<8x128xf32>
    %946 = arith.mulf %945, %940 : vector<8x128xf32>
    %cst_249 = arith.constant 3.000000e+00 : f32
    %947 = vector.broadcast %cst_249 : f32 to vector<8x128xf32>
    %948 = arith.subf %946, %947 : vector<8x128xf32>
    %cst_250 = arith.constant 0.000000e+00 : f32
    %949 = vector.broadcast %cst_250 : f32 to vector<7x128xf32>
    %950 = arith.maximumf %911, %949 : vector<7x128xf32>
    %951 = math.absf %911 : vector<7x128xf32>
    %cst_251 = arith.constant 0.000000e+00 : f32
    %952 = vector.broadcast %cst_251 : f32 to vector<7x128xf32>
    %953 = arith.subf %952, %951 : vector<7x128xf32>
    %954 = math.exp %953 : vector<7x128xf32>
    %cst_252 = arith.constant 1.000000e+00 : f32
    %955 = vector.broadcast %cst_252 : f32 to vector<7x128xf32>
    %956 = arith.addf %955, %954 : vector<7x128xf32>
    %957 = math.log %956 : vector<7x128xf32>
    %958 = arith.addf %950, %957 : vector<7x128xf32>
    %cst_253 = arith.constant 1.000000e-03 : f32
    %959 = vector.broadcast %cst_253 : f32 to vector<7x128xf32>
    %960 = arith.addf %959, %958 : vector<7x128xf32>
    %cst_254 = arith.constant 0.000000e+00 : f32
    %961 = vector.broadcast %cst_254 : f32 to vector<8x128xf32>
    %962 = arith.subf %961, %912 : vector<8x128xf32>
    %963 = math.exp %962 : vector<8x128xf32>
    %cst_255 = arith.constant 1.000000e+00 : f32
    %964 = vector.broadcast %cst_255 : f32 to vector<8x128xf32>
    %965 = arith.addf %964, %963 : vector<8x128xf32>
    %cst_256 = arith.constant 1.000000e+00 : f32
    %966 = vector.broadcast %cst_256 : f32 to vector<8x128xf32>
    %967 = arith.divf %966, %965 : vector<8x128xf32>
    %cst_257 = arith.constant 0.949999988 : f32
    %968 = vector.broadcast %cst_257 : f32 to vector<8x128xf32>
    %969 = arith.mulf %968, %967 : vector<8x128xf32>
    %cst_258 = arith.constant 2.500000e-02 : f32
    %970 = vector.broadcast %cst_258 : f32 to vector<8x128xf32>
    %971 = arith.addf %969, %970 : vector<8x128xf32>
    %cst_259 = arith.constant -2.99999905 : f32
    %972 = vector.broadcast %cst_259 : f32 to vector<1x128xf32>
    %973 = arith.cmpf oge, %745, %972 : vector<1x128xf32>
    %974 = arith.extui %973 : vector<1x128xi1> to vector<1x128xi32>
    %cst_260 = arith.constant 3.00000095 : f32
    %975 = vector.broadcast %cst_260 : f32 to vector<1x128xf32>
    %976 = arith.cmpf oge, %745, %975 : vector<1x128xf32>
    %977 = arith.extui %976 : vector<1x128xi1> to vector<1x128xi32>
    %978 = arith.addi %974, %977 : vector<1x128xi32>
    %979 = vector.extract_strided_slice %944 {offsets = [0, 0], sizes = [7, 128], strides = [1, 1]} : vector<8x128xf32> to vector<7x128xf32>
    %cst_261 = arith.constant 9.99999997E-7 : f32
    %980 = vector.broadcast %cst_261 : f32 to vector<7x128xf32>
    %981 = arith.addf %979, %980 : vector<7x128xf32>
    %982 = vector.broadcast %745 : vector<1x128xf32> to vector<7x128xf32>
    %983 = arith.cmpf oge, %982, %981 : vector<7x128xf32>
    %984 = arith.extui %983 : vector<7x128xi1> to vector<7x128xi32>
    %cst_262 = arith.constant dense<0> : vector<128xi32>
    %985 = vector.multi_reduction <add>, %984, %cst_262 [0] : vector<7x128xi32> to vector<128xi32>
    %986 = vector.shape_cast %985 : vector<128xi32> to vector<1x128xi32>
    %987 = arith.addi %978, %986 : vector<1x128xi32>
    %c1_i32_263 = arith.constant 1 : i32
    %988 = vector.broadcast %c1_i32_263 : i32 to vector<1x128xi32>
    %989 = arith.subi %987, %988 : vector<1x128xi32>
    %c0_i32_264 = arith.constant 0 : i32
    %c7_i32_265 = arith.constant 7 : i32
    %990 = vector.broadcast %c0_i32_264 : i32 to vector<1x128xi32>
    %991 = arith.maxsi %990, %989 : vector<1x128xi32>
    %992 = vector.broadcast %c7_i32_265 : i32 to vector<1x128xi32>
    %993 = arith.minsi %992, %991 : vector<1x128xi32>
    %994 = vector.broadcast %993 : vector<1x128xi32> to vector<8x128xi32>
    %995 = arith.cmpi eq, %13, %994 : vector<8x128xi32>
    %996 = arith.extui %995 : vector<8x128xi1> to vector<8x128xi32>
    %997 = arith.sitofp %996 : vector<8x128xi32> to vector<8x128xf32>
    %c1_i32_266 = arith.constant 1 : i32
    %998 = vector.broadcast %c1_i32_266 : i32 to vector<1x128xi32>
    %999 = arith.subi %993, %998 : vector<1x128xi32>
    %1000 = vector.broadcast %999 : vector<1x128xi32> to vector<8x128xi32>
    %1001 = arith.cmpi eq, %13, %1000 : vector<8x128xi32>
    %1002 = arith.extui %1001 : vector<8x128xi1> to vector<8x128xi32>
    %1003 = arith.sitofp %1002 : vector<8x128xi32> to vector<8x128xf32>
    %1004 = vector.broadcast %993 : vector<1x128xi32> to vector<7x128xi32>
    %1005 = arith.cmpi eq, %14, %1004 : vector<7x128xi32>
    %1006 = arith.extui %1005 : vector<7x128xi1> to vector<7x128xi32>
    %1007 = arith.sitofp %1006 : vector<7x128xi32> to vector<7x128xf32>
    %c1_i32_267 = arith.constant 1 : i32
    %1008 = vector.broadcast %c1_i32_267 : i32 to vector<1x128xi32>
    %1009 = arith.subi %993, %1008 : vector<1x128xi32>
    %1010 = vector.broadcast %1009 : vector<1x128xi32> to vector<7x128xi32>
    %1011 = arith.cmpi eq, %14, %1010 : vector<7x128xi32>
    %1012 = arith.extui %1011 : vector<7x128xi1> to vector<7x128xi32>
    %1013 = arith.sitofp %1012 : vector<7x128xi32> to vector<7x128xf32>
    %c0_i32_268 = arith.constant 0 : i32
    %1014 = vector.broadcast %c0_i32_268 : i32 to vector<1x128xi32>
    %1015 = arith.cmpi eq, %993, %1014 : vector<1x128xi32>
    %c7_i32_269 = arith.constant 7 : i32
    %1016 = vector.broadcast %c7_i32_269 : i32 to vector<1x128xi32>
    %1017 = arith.cmpi eq, %993, %1016 : vector<1x128xi32>
    %1018 = arith.mulf %944, %1003 : vector<8x128xf32>
    %cst_270 = arith.constant dense<0.000000e+00> : vector<128xf32>
    %1019 = vector.multi_reduction <add>, %1018, %cst_270 [0] : vector<8x128xf32> to vector<128xf32>
    %1020 = vector.shape_cast %1019 : vector<128xf32> to vector<1x128xf32>
    %cst_271 = arith.constant -3.000000e+00 : f32
    %1021 = vector.broadcast %cst_271 : f32 to vector<1x128xf32>
    %1022 = arith.select %1015, %1021, %1020 : vector<1x128xi1>, vector<1x128xf32>
    %1023 = arith.mulf %944, %997 : vector<8x128xf32>
    %cst_272 = arith.constant dense<0.000000e+00> : vector<128xf32>
    %1024 = vector.multi_reduction <add>, %1023, %cst_272 [0] : vector<8x128xf32> to vector<128xf32>
    %1025 = vector.shape_cast %1024 : vector<128xf32> to vector<1x128xf32>
    %cst_273 = arith.constant 3.000000e+00 : f32
    %1026 = vector.broadcast %cst_273 : f32 to vector<1x128xf32>
    %1027 = arith.select %1017, %1026, %1025 : vector<1x128xi1>, vector<1x128xf32>
    %1028 = arith.subf %1027, %1022 : vector<1x128xf32>
    %1029 = arith.mulf %948, %1003 : vector<8x128xf32>
    %cst_274 = arith.constant dense<0.000000e+00> : vector<128xf32>
    %1030 = vector.multi_reduction <add>, %1029, %cst_274 [0] : vector<8x128xf32> to vector<128xf32>
    %1031 = vector.shape_cast %1030 : vector<128xf32> to vector<1x128xf32>
    %cst_275 = arith.constant -3.000000e+00 : f32
    %1032 = vector.broadcast %cst_275 : f32 to vector<1x128xf32>
    %1033 = arith.select %1015, %1032, %1031 : vector<1x128xi1>, vector<1x128xf32>
    %1034 = arith.mulf %948, %997 : vector<8x128xf32>
    %cst_276 = arith.constant dense<0.000000e+00> : vector<128xf32>
    %1035 = vector.multi_reduction <add>, %1034, %cst_276 [0] : vector<8x128xf32> to vector<128xf32>
    %1036 = vector.shape_cast %1035 : vector<128xf32> to vector<1x128xf32>
    %cst_277 = arith.constant 3.000000e+00 : f32
    %1037 = vector.broadcast %cst_277 : f32 to vector<1x128xf32>
    %1038 = arith.select %1017, %1037, %1036 : vector<1x128xi1>, vector<1x128xf32>
    %1039 = arith.subf %1038, %1033 : vector<1x128xf32>
    %cst_278 = arith.constant 1.000000e+00 : f32
    %1040 = vector.broadcast %cst_278 : f32 to vector<1x128xf32>
    %1041 = arith.divf %1040, %1028 : vector<1x128xf32>
    %1042 = arith.mulf %1039, %1041 : vector<1x128xf32>
    %1043 = arith.mulf %960, %1013 : vector<7x128xf32>
    %cst_279 = arith.constant dense<0.000000e+00> : vector<128xf32>
    %1044 = vector.multi_reduction <add>, %1043, %cst_279 [0] : vector<7x128xf32> to vector<128xf32>
    %1045 = vector.shape_cast %1044 : vector<128xf32> to vector<1x128xf32>
    %cst_280 = arith.constant 1.000000e+00 : f32
    %1046 = vector.broadcast %cst_280 : f32 to vector<1x128xf32>
    %1047 = arith.select %1015, %1046, %1045 : vector<1x128xi1>, vector<1x128xf32>
    %1048 = arith.mulf %960, %1007 : vector<7x128xf32>
    %cst_281 = arith.constant dense<0.000000e+00> : vector<128xf32>
    %1049 = vector.multi_reduction <add>, %1048, %cst_281 [0] : vector<7x128xf32> to vector<128xf32>
    %1050 = vector.shape_cast %1049 : vector<128xf32> to vector<1x128xf32>
    %cst_282 = arith.constant 1.000000e+00 : f32
    %1051 = vector.broadcast %cst_282 : f32 to vector<1x128xf32>
    %1052 = arith.select %1017, %1051, %1050 : vector<1x128xi1>, vector<1x128xf32>
    %1053 = arith.mulf %971, %997 : vector<8x128xf32>
    %cst_283 = arith.constant dense<0.000000e+00> : vector<128xf32>
    %1054 = vector.multi_reduction <add>, %1053, %cst_283 [0] : vector<8x128xf32> to vector<128xf32>
    %1055 = vector.shape_cast %1054 : vector<128xf32> to vector<1x128xf32>
    %1056 = arith.divf %1047, %1052 : vector<1x128xf32>
    %1057 = math.sqrt %1056 : vector<1x128xf32>
    %1058 = arith.mulf %1055, %1047 : vector<1x128xf32>
    %cst_284 = arith.constant 1.000000e+00 : f32
    %1059 = vector.broadcast %cst_284 : f32 to vector<1x128xf32>
    %1060 = arith.subf %1059, %1055 : vector<1x128xf32>
    %1061 = arith.mulf %1060, %1057 : vector<1x128xf32>
    %1062 = arith.mulf %1061, %1052 : vector<1x128xf32>
    %1063 = arith.addf %1058, %1062 : vector<1x128xf32>
    %1064 = arith.divf %1063, %1042 : vector<1x128xf32>
    %cst_285 = arith.constant 1.000000e+00 : f32
    %1065 = vector.broadcast %cst_285 : f32 to vector<1x128xf32>
    %1066 = arith.subf %1065, %1055 : vector<1x128xf32>
    %1067 = arith.mulf %1066, %1033 : vector<1x128xf32>
    %1068 = arith.mulf %1055, %1057 : vector<1x128xf32>
    %1069 = arith.mulf %1068, %1038 : vector<1x128xf32>
    %1070 = arith.addf %1067, %1069 : vector<1x128xf32>
    %cst_286 = arith.constant 1.000000e+00 : f32
    %1071 = vector.broadcast %cst_286 : f32 to vector<1x128xf32>
    %1072 = arith.subf %1071, %1055 : vector<1x128xf32>
    %1073 = arith.mulf %1055, %1057 : vector<1x128xf32>
    %1074 = arith.addf %1072, %1073 : vector<1x128xf32>
    %1075 = arith.divf %1070, %1074 : vector<1x128xf32>
    %1076 = arith.subf %745, %1022 : vector<1x128xf32>
    %1077 = arith.mulf %1076, %1041 : vector<1x128xf32>
    %1078 = arith.subf %1055, %1077 : vector<1x128xf32>
    %1079 = arith.mulf %1033, %1078 : vector<1x128xf32>
    %1080 = arith.mulf %1064, %1075 : vector<1x128xf32>
    %1081 = arith.mulf %1080, %1077 : vector<1x128xf32>
    %1082 = arith.addf %1079, %1081 : vector<1x128xf32>
    %1083 = arith.subf %1055, %1077 : vector<1x128xf32>
    %1084 = arith.mulf %1064, %1077 : vector<1x128xf32>
    %1085 = arith.addf %1083, %1084 : vector<1x128xf32>
    %1086 = arith.divf %1082, %1085 : vector<1x128xf32>
    %1087 = arith.mulf %1064, %1075 : vector<1x128xf32>
    %cst_287 = arith.constant 1.000000e+00 : f32
    %1088 = vector.broadcast %cst_287 : f32 to vector<1x128xf32>
    %1089 = arith.subf %1088, %1077 : vector<1x128xf32>
    %1090 = arith.mulf %1087, %1089 : vector<1x128xf32>
    %1091 = arith.mulf %1057, %1038 : vector<1x128xf32>
    %1092 = arith.subf %1077, %1055 : vector<1x128xf32>
    %1093 = arith.mulf %1091, %1092 : vector<1x128xf32>
    %1094 = arith.addf %1090, %1093 : vector<1x128xf32>
    %cst_288 = arith.constant 1.000000e+00 : f32
    %1095 = vector.broadcast %cst_288 : f32 to vector<1x128xf32>
    %1096 = arith.subf %1095, %1077 : vector<1x128xf32>
    %1097 = arith.mulf %1064, %1096 : vector<1x128xf32>
    %1098 = arith.subf %1077, %1055 : vector<1x128xf32>
    %1099 = arith.mulf %1057, %1098 : vector<1x128xf32>
    %1100 = arith.addf %1097, %1099 : vector<1x128xf32>
    %1101 = arith.divf %1094, %1100 : vector<1x128xf32>
    %1102 = arith.cmpf ole, %1077, %1055 : vector<1x128xf32>
    %1103 = arith.select %1102, %1086, %1101 : vector<1x128xi1>, vector<1x128xf32>
    %cst_289 = arith.constant -3.000000e+00 : f32
    %1104 = vector.broadcast %cst_289 : f32 to vector<1x128xf32>
    %1105 = arith.cmpf oge, %745, %1104 : vector<1x128xf32>
    %cst_290 = arith.constant 3.000000e+00 : f32
    %1106 = vector.broadcast %cst_290 : f32 to vector<1x128xf32>
    %1107 = arith.cmpf ole, %745, %1106 : vector<1x128xf32>
    %1108 = arith.andi %1105, %1107 : vector<1x128xi1>
    %1109 = arith.select %1108, %1103, %745 : vector<1x128xi1>, vector<1x128xf32>
    %c4 = arith.constant 4 : index
    %c0_291 = arith.constant 0 : index
    %1110 = vector.load %arg9[%c4, %c0_291] : memref<8x128xf32, #tpu.memory_space<vmem>>, vector<1x128xf32>
    tpu.vector_store %arg9[%c4, %c0_291], %893 {strides = array<i32>} : memref<8x128xf32, #tpu.memory_space<vmem>>, vector<1x128xf32>,
    %c5 = arith.constant 5 : index
    %c0_292 = arith.constant 0 : index
    %1111 = vector.load %arg9[%c5, %c0_292] : memref<8x128xf32, #tpu.memory_space<vmem>>, vector<1x128xf32>
    tpu.vector_store %arg9[%c5, %c0_292], %1109 {strides = array<i32>} : memref<8x128xf32, #tpu.memory_space<vmem>>, vector<1x128xf32>,
    %cst_293 = arith.constant -2.99999905 : f32
    %1112 = vector.broadcast %cst_293 : f32 to vector<1x128xf32>
    %1113 = arith.cmpf oge, %893, %1112 : vector<1x128xf32>
    %1114 = arith.extui %1113 : vector<1x128xi1> to vector<1x128xi32>
    %cst_294 = arith.constant 3.00000095 : f32
    %1115 = vector.broadcast %cst_294 : f32 to vector<1x128xf32>
    %1116 = arith.cmpf oge, %893, %1115 : vector<1x128xf32>
    %1117 = arith.extui %1116 : vector<1x128xi1> to vector<1x128xi32>
    %1118 = arith.addi %1114, %1117 : vector<1x128xi32>
    %1119 = vector.extract_strided_slice %9 {offsets = [0, 0], sizes = [7, 1], strides = [1, 1]} : vector<8x1xf32> to vector<7x1xf32>
    %cst_295 = arith.constant 9.99999997E-7 : f32
    %1120 = vector.broadcast %cst_295 : f32 to vector<7x1xf32>
    %1121 = arith.addf %1119, %1120 : vector<7x1xf32>
    %1122 = vector.broadcast %893 : vector<1x128xf32> to vector<7x128xf32>
    %1123 = vector.broadcast %1121 : vector<7x1xf32> to vector<7x128xf32>
    %1124 = arith.cmpf oge, %1122, %1123 : vector<7x128xf32>
    %1125 = arith.extui %1124 : vector<7x128xi1> to vector<7x128xi32>
    %cst_296 = arith.constant dense<0> : vector<128xi32>
    %1126 = vector.multi_reduction <add>, %1125, %cst_296 [0] : vector<7x128xi32> to vector<128xi32>
    %1127 = vector.shape_cast %1126 : vector<128xi32> to vector<1x128xi32>
    %1128 = arith.addi %1118, %1127 : vector<1x128xi32>
    %c1_i32_297 = arith.constant 1 : i32
    %1129 = vector.broadcast %c1_i32_297 : i32 to vector<1x128xi32>
    %1130 = arith.subi %1128, %1129 : vector<1x128xi32>
    %c0_i32_298 = arith.constant 0 : i32
    %c7_i32_299 = arith.constant 7 : i32
    %1131 = vector.broadcast %c0_i32_298 : i32 to vector<1x128xi32>
    %1132 = arith.maxsi %1131, %1130 : vector<1x128xi32>
    %1133 = vector.broadcast %c7_i32_299 : i32 to vector<1x128xi32>
    %1134 = arith.minsi %1133, %1132 : vector<1x128xi32>
    %1135 = vector.broadcast %1134 : vector<1x128xi32> to vector<8x128xi32>
    %1136 = arith.cmpi eq, %13, %1135 : vector<8x128xi32>
    %1137 = arith.extui %1136 : vector<8x128xi1> to vector<8x128xi32>
    %1138 = arith.sitofp %1137 : vector<8x128xi32> to vector<8x128xf32>
    %c1_i32_300 = arith.constant 1 : i32
    %1139 = vector.broadcast %c1_i32_300 : i32 to vector<1x128xi32>
    %1140 = arith.subi %1134, %1139 : vector<1x128xi32>
    %1141 = vector.broadcast %1140 : vector<1x128xi32> to vector<8x128xi32>
    %1142 = arith.cmpi eq, %13, %1141 : vector<8x128xi32>
    %1143 = arith.extui %1142 : vector<8x128xi1> to vector<8x128xi32>
    %1144 = arith.sitofp %1143 : vector<8x128xi32> to vector<8x128xf32>
    %1145 = vector.broadcast %1134 : vector<1x128xi32> to vector<7x128xi32>
    %1146 = arith.cmpi eq, %14, %1145 : vector<7x128xi32>
    %1147 = arith.extui %1146 : vector<7x128xi1> to vector<7x128xi32>
    %1148 = arith.sitofp %1147 : vector<7x128xi32> to vector<7x128xf32>
    %c1_i32_301 = arith.constant 1 : i32
    %1149 = vector.broadcast %c1_i32_301 : i32 to vector<1x128xi32>
    %1150 = arith.subi %1134, %1149 : vector<1x128xi32>
    %1151 = vector.broadcast %1150 : vector<1x128xi32> to vector<7x128xi32>
    %1152 = arith.cmpi eq, %14, %1151 : vector<7x128xi32>
    %1153 = arith.extui %1152 : vector<7x128xi1> to vector<7x128xi32>
    %1154 = arith.sitofp %1153 : vector<7x128xi32> to vector<7x128xf32>
    %c0_i32_302 = arith.constant 0 : i32
    %1155 = vector.broadcast %c0_i32_302 : i32 to vector<1x128xi32>
    %1156 = arith.cmpi eq, %1134, %1155 : vector<1x128xi32>
    %c7_i32_303 = arith.constant 7 : i32
    %1157 = vector.broadcast %c7_i32_303 : i32 to vector<1x128xi32>
    %1158 = arith.cmpi eq, %1134, %1157 : vector<1x128xi32>
    %1159 = vector.broadcast %9 : vector<8x1xf32> to vector<8x128xf32>
    %1160 = arith.mulf %1159, %1144 : vector<8x128xf32>
    %cst_304 = arith.constant dense<0.000000e+00> : vector<128xf32>
    %1161 = vector.multi_reduction <add>, %1160, %cst_304 [0] : vector<8x128xf32> to vector<128xf32>
    %1162 = vector.shape_cast %1161 : vector<128xf32> to vector<1x128xf32>
    %cst_305 = arith.constant -3.000000e+00 : f32
    %1163 = vector.broadcast %cst_305 : f32 to vector<1x128xf32>
    %1164 = arith.select %1156, %1163, %1162 : vector<1x128xi1>, vector<1x128xf32>
    %1165 = vector.broadcast %9 : vector<8x1xf32> to vector<8x128xf32>
    %1166 = arith.mulf %1165, %1138 : vector<8x128xf32>
    %cst_306 = arith.constant dense<0.000000e+00> : vector<128xf32>
    %1167 = vector.multi_reduction <add>, %1166, %cst_306 [0] : vector<8x128xf32> to vector<128xf32>
    %1168 = vector.shape_cast %1167 : vector<128xf32> to vector<1x128xf32>
    %cst_307 = arith.constant 3.000000e+00 : f32
    %1169 = vector.broadcast %cst_307 : f32 to vector<1x128xf32>
    %1170 = arith.select %1158, %1169, %1168 : vector<1x128xi1>, vector<1x128xf32>
    %1171 = arith.subf %1170, %1164 : vector<1x128xf32>
    %1172 = vector.broadcast %10 : vector<8x1xf32> to vector<8x128xf32>
    %1173 = arith.mulf %1172, %1144 : vector<8x128xf32>
    %cst_308 = arith.constant dense<0.000000e+00> : vector<128xf32>
    %1174 = vector.multi_reduction <add>, %1173, %cst_308 [0] : vector<8x128xf32> to vector<128xf32>
    %1175 = vector.shape_cast %1174 : vector<128xf32> to vector<1x128xf32>
    %cst_309 = arith.constant -3.000000e+00 : f32
    %1176 = vector.broadcast %cst_309 : f32 to vector<1x128xf32>
    %1177 = arith.select %1156, %1176, %1175 : vector<1x128xi1>, vector<1x128xf32>
    %1178 = vector.broadcast %10 : vector<8x1xf32> to vector<8x128xf32>
    %1179 = arith.mulf %1178, %1138 : vector<8x128xf32>
    %cst_310 = arith.constant dense<0.000000e+00> : vector<128xf32>
    %1180 = vector.multi_reduction <add>, %1179, %cst_310 [0] : vector<8x128xf32> to vector<128xf32>
    %1181 = vector.shape_cast %1180 : vector<128xf32> to vector<1x128xf32>
    %cst_311 = arith.constant 3.000000e+00 : f32
    %1182 = vector.broadcast %cst_311 : f32 to vector<1x128xf32>
    %1183 = arith.select %1158, %1182, %1181 : vector<1x128xi1>, vector<1x128xf32>
    %1184 = arith.subf %1183, %1177 : vector<1x128xf32>
    %cst_312 = arith.constant 1.000000e+00 : f32
    %1185 = vector.broadcast %cst_312 : f32 to vector<1x128xf32>
    %1186 = arith.divf %1185, %1171 : vector<1x128xf32>
    %1187 = arith.mulf %1184, %1186 : vector<1x128xf32>
    %1188 = vector.broadcast %11 : vector<7x1xf32> to vector<7x128xf32>
    %1189 = arith.mulf %1188, %1154 : vector<7x128xf32>
    %cst_313 = arith.constant dense<0.000000e+00> : vector<128xf32>
    %1190 = vector.multi_reduction <add>, %1189, %cst_313 [0] : vector<7x128xf32> to vector<128xf32>
    %1191 = vector.shape_cast %1190 : vector<128xf32> to vector<1x128xf32>
    %cst_314 = arith.constant 1.000000e+00 : f32
    %1192 = vector.broadcast %cst_314 : f32 to vector<1x128xf32>
    %1193 = arith.select %1156, %1192, %1191 : vector<1x128xi1>, vector<1x128xf32>
    %1194 = vector.broadcast %11 : vector<7x1xf32> to vector<7x128xf32>
    %1195 = arith.mulf %1194, %1148 : vector<7x128xf32>
    %cst_315 = arith.constant dense<0.000000e+00> : vector<128xf32>
    %1196 = vector.multi_reduction <add>, %1195, %cst_315 [0] : vector<7x128xf32> to vector<128xf32>
    %1197 = vector.shape_cast %1196 : vector<128xf32> to vector<1x128xf32>
    %cst_316 = arith.constant 1.000000e+00 : f32
    %1198 = vector.broadcast %cst_316 : f32 to vector<1x128xf32>
    %1199 = arith.select %1158, %1198, %1197 : vector<1x128xi1>, vector<1x128xf32>
    %1200 = vector.broadcast %12 : vector<8x1xf32> to vector<8x128xf32>
    %1201 = arith.mulf %1200, %1138 : vector<8x128xf32>
    %cst_317 = arith.constant dense<0.000000e+00> : vector<128xf32>
    %1202 = vector.multi_reduction <add>, %1201, %cst_317 [0] : vector<8x128xf32> to vector<128xf32>
    %1203 = vector.shape_cast %1202 : vector<128xf32> to vector<1x128xf32>
    %1204 = arith.divf %1193, %1199 : vector<1x128xf32>
    %1205 = math.sqrt %1204 : vector<1x128xf32>
    %1206 = arith.mulf %1203, %1193 : vector<1x128xf32>
    %cst_318 = arith.constant 1.000000e+00 : f32
    %1207 = vector.broadcast %cst_318 : f32 to vector<1x128xf32>
    %1208 = arith.subf %1207, %1203 : vector<1x128xf32>
    %1209 = arith.mulf %1208, %1205 : vector<1x128xf32>
    %1210 = arith.mulf %1209, %1199 : vector<1x128xf32>
    %1211 = arith.addf %1206, %1210 : vector<1x128xf32>
    %1212 = arith.divf %1211, %1187 : vector<1x128xf32>
    %cst_319 = arith.constant 1.000000e+00 : f32
    %1213 = vector.broadcast %cst_319 : f32 to vector<1x128xf32>
    %1214 = arith.subf %1213, %1203 : vector<1x128xf32>
    %1215 = arith.mulf %1214, %1177 : vector<1x128xf32>
    %1216 = arith.mulf %1203, %1205 : vector<1x128xf32>
    %1217 = arith.mulf %1216, %1183 : vector<1x128xf32>
    %1218 = arith.addf %1215, %1217 : vector<1x128xf32>
    %cst_320 = arith.constant 1.000000e+00 : f32
    %1219 = vector.broadcast %cst_320 : f32 to vector<1x128xf32>
    %1220 = arith.subf %1219, %1203 : vector<1x128xf32>
    %1221 = arith.mulf %1203, %1205 : vector<1x128xf32>
    %1222 = arith.addf %1220, %1221 : vector<1x128xf32>
    %1223 = arith.divf %1218, %1222 : vector<1x128xf32>
    %1224 = arith.subf %893, %1164 : vector<1x128xf32>
    %1225 = arith.mulf %1224, %1186 : vector<1x128xf32>
    %1226 = arith.subf %1203, %1225 : vector<1x128xf32>
    %1227 = arith.mulf %1177, %1226 : vector<1x128xf32>
    %1228 = arith.mulf %1212, %1223 : vector<1x128xf32>
    %1229 = arith.mulf %1228, %1225 : vector<1x128xf32>
    %1230 = arith.addf %1227, %1229 : vector<1x128xf32>
    %1231 = arith.subf %1203, %1225 : vector<1x128xf32>
    %1232 = arith.mulf %1212, %1225 : vector<1x128xf32>
    %1233 = arith.addf %1231, %1232 : vector<1x128xf32>
    %1234 = arith.divf %1230, %1233 : vector<1x128xf32>
    %1235 = arith.mulf %1212, %1223 : vector<1x128xf32>
    %cst_321 = arith.constant 1.000000e+00 : f32
    %1236 = vector.broadcast %cst_321 : f32 to vector<1x128xf32>
    %1237 = arith.subf %1236, %1225 : vector<1x128xf32>
    %1238 = arith.mulf %1235, %1237 : vector<1x128xf32>
    %1239 = arith.mulf %1205, %1183 : vector<1x128xf32>
    %1240 = arith.subf %1225, %1203 : vector<1x128xf32>
    %1241 = arith.mulf %1239, %1240 : vector<1x128xf32>
    %1242 = arith.addf %1238, %1241 : vector<1x128xf32>
    %cst_322 = arith.constant 1.000000e+00 : f32
    %1243 = vector.broadcast %cst_322 : f32 to vector<1x128xf32>
    %1244 = arith.subf %1243, %1225 : vector<1x128xf32>
    %1245 = arith.mulf %1212, %1244 : vector<1x128xf32>
    %1246 = arith.subf %1225, %1203 : vector<1x128xf32>
    %1247 = arith.mulf %1205, %1246 : vector<1x128xf32>
    %1248 = arith.addf %1245, %1247 : vector<1x128xf32>
    %1249 = arith.divf %1242, %1248 : vector<1x128xf32>
    %1250 = arith.cmpf ole, %1225, %1203 : vector<1x128xf32>
    %1251 = arith.select %1250, %1234, %1249 : vector<1x128xi1>, vector<1x128xf32>
    %cst_323 = arith.constant -3.000000e+00 : f32
    %1252 = vector.broadcast %cst_323 : f32 to vector<1x128xf32>
    %1253 = arith.cmpf oge, %893, %1252 : vector<1x128xf32>
    %cst_324 = arith.constant 3.000000e+00 : f32
    %1254 = vector.broadcast %cst_324 : f32 to vector<1x128xf32>
    %1255 = arith.cmpf ole, %893, %1254 : vector<1x128xf32>
    %1256 = arith.andi %1253, %1255 : vector<1x128xi1>
    %1257 = arith.select %1256, %1251, %893 : vector<1x128xi1>, vector<1x128xf32>
    %1258 = vector.broadcast %2 : vector<32x1xf32> to vector<32x128xf32>
    %1259 = vector.broadcast %893 : vector<1x128xf32> to vector<32x128xf32>
    %1260 = arith.mulf %1258, %1259 : vector<32x128xf32>
    %1261 = vector.broadcast %3 : vector<32x1xf32> to vector<32x128xf32>
    %1262 = arith.addf %1260, %1261 : vector<32x128xf32>
    %cst_325 = arith.constant 0.000000e+00 : f32
    %1263 = vector.broadcast %cst_325 : f32 to vector<32x128xf32>
    %1264 = arith.maximumf %1262, %1263 : vector<32x128xf32>
    %cst_326 = arith.constant dense<0.000000e+00> : vector<32x128xf32>
    %1265 = tpu.matmul %4, %1264, %cst_326 {dimension_numbers = #tpu.dot_dimension_numbers<[1], [0], [0], [1], [0, 0, 1, 1], [], []>} : vector<32x32xf32>, vector<32x128xf32>, vector<32x128xf32> -> vector<32x128xf32>
    %1266 = vector.broadcast %5 : vector<32x1xf32> to vector<32x128xf32>
    %1267 = arith.addf %1265, %1266 : vector<32x128xf32>
    %cst_327 = arith.constant 0.000000e+00 : f32
    %1268 = vector.broadcast %cst_327 : f32 to vector<32x128xf32>
    %1269 = arith.maximumf %1267, %1268 : vector<32x128xf32>
    %cst_328 = arith.constant dense<0.000000e+00> : vector<32x128xf32>
    %1270 = tpu.matmul %6, %1269, %cst_328 {dimension_numbers = #tpu.dot_dimension_numbers<[1], [0], [0], [1], [0, 0, 1, 1], [], []>} : vector<32x32xf32>, vector<32x128xf32>, vector<32x128xf32> -> vector<32x128xf32>
    %1271 = vector.broadcast %7 : vector<32x1xf32> to vector<32x128xf32>
    %1272 = arith.addf %1270, %1271 : vector<32x128xf32>
    %1273 = vector.extract_strided_slice %1272 {offsets = [0, 0], sizes = [8, 128], strides = [1, 1]} : vector<32x128xf32> to vector<8x128xf32>
    %1274 = vector.extract_strided_slice %1272 {offsets = [8, 0], sizes = [8, 128], strides = [1, 1]} : vector<32x128xf32> to vector<8x128xf32>
    %1275 = vector.extract_strided_slice %1272 {offsets = [16, 0], sizes = [7, 128], strides = [1, 1]} : vector<32x128xf32> to vector<7x128xf32>
    %1276 = vector.extract_strided_slice %1272 {offsets = [24, 0], sizes = [8, 128], strides = [1, 1]} : vector<32x128xf32> to vector<8x128xf32>
    %cst_329 = arith.constant dense<0xFF800000> : vector<128xf32>
    %1277 = vector.multi_reduction <maximumf>, %1273, %cst_329 [0] : vector<8x128xf32> to vector<128xf32>
    %1278 = vector.shape_cast %1277 : vector<128xf32> to vector<1x128xf32>
    %1279 = vector.broadcast %1278 : vector<1x128xf32> to vector<8x128xf32>
    %1280 = arith.subf %1273, %1279 : vector<8x128xf32>
    %1281 = math.exp %1280 : vector<8x128xf32>
    %cst_330 = arith.constant dense<0.000000e+00> : vector<128xf32>
    %1282 = vector.multi_reduction <add>, %1281, %cst_330 [0] : vector<8x128xf32> to vector<128xf32>
    %1283 = vector.shape_cast %1282 : vector<128xf32> to vector<1x128xf32>
    %1284 = vector.broadcast %1283 : vector<1x128xf32> to vector<8x128xf32>
    %1285 = arith.divf %1281, %1284 : vector<8x128xf32>
    %cst_331 = arith.constant 0.991999983 : f32
    %1286 = vector.broadcast %cst_331 : f32 to vector<8x128xf32>
    %1287 = arith.mulf %1286, %1285 : vector<8x128xf32>
    %cst_332 = arith.constant 1.000000e-03 : f32
    %1288 = vector.broadcast %cst_332 : f32 to vector<8x128xf32>
    %1289 = arith.addf %1288, %1287 : vector<8x128xf32>
    %cst_333 = arith.constant dense<0xFF800000> : vector<128xf32>
    %1290 = vector.multi_reduction <maximumf>, %1274, %cst_333 [0] : vector<8x128xf32> to vector<128xf32>
    %1291 = vector.shape_cast %1290 : vector<128xf32> to vector<1x128xf32>
    %1292 = vector.broadcast %1291 : vector<1x128xf32> to vector<8x128xf32>
    %1293 = arith.subf %1274, %1292 : vector<8x128xf32>
    %1294 = math.exp %1293 : vector<8x128xf32>
    %cst_334 = arith.constant dense<0.000000e+00> : vector<128xf32>
    %1295 = vector.multi_reduction <add>, %1294, %cst_334 [0] : vector<8x128xf32> to vector<128xf32>
    %1296 = vector.shape_cast %1295 : vector<128xf32> to vector<1x128xf32>
    %1297 = vector.broadcast %1296 : vector<1x128xf32> to vector<8x128xf32>
    %1298 = arith.divf %1294, %1297 : vector<8x128xf32>
    %cst_335 = arith.constant 0.991999983 : f32
    %1299 = vector.broadcast %cst_335 : f32 to vector<8x128xf32>
    %1300 = arith.mulf %1299, %1298 : vector<8x128xf32>
    %cst_336 = arith.constant 1.000000e-03 : f32
    %1301 = vector.broadcast %cst_336 : f32 to vector<8x128xf32>
    %1302 = arith.addf %1301, %1300 : vector<8x128xf32>
    %cst_337 = arith.constant dense<0.000000e+00> : vector<8x128xf32>
    %1303 = tpu.matmul %19, %1289, %cst_337 {dimension_numbers = #tpu.dot_dimension_numbers<[1], [0], [0], [1], [0, 0, 1, 1], [], []>} : vector<8x8xf32>, vector<8x128xf32>, vector<8x128xf32> -> vector<8x128xf32>
    %cst_338 = arith.constant dense<0.000000e+00> : vector<8x128xf32>
    %1304 = tpu.matmul %19, %1302, %cst_338 {dimension_numbers = #tpu.dot_dimension_numbers<[1], [0], [0], [1], [0, 0, 1, 1], [], []>} : vector<8x8xf32>, vector<8x128xf32>, vector<8x128xf32> -> vector<8x128xf32>
    %cst_339 = arith.constant 6.000000e+00 : f32
    %1305 = vector.broadcast %cst_339 : f32 to vector<8x128xf32>
    %1306 = arith.mulf %1305, %1303 : vector<8x128xf32>
    %cst_340 = arith.constant 3.000000e+00 : f32
    %1307 = vector.broadcast %cst_340 : f32 to vector<8x128xf32>
    %1308 = arith.subf %1306, %1307 : vector<8x128xf32>
    %cst_341 = arith.constant 6.000000e+00 : f32
    %1309 = vector.broadcast %cst_341 : f32 to vector<8x128xf32>
    %1310 = arith.mulf %1309, %1304 : vector<8x128xf32>
    %cst_342 = arith.constant 3.000000e+00 : f32
    %1311 = vector.broadcast %cst_342 : f32 to vector<8x128xf32>
    %1312 = arith.subf %1310, %1311 : vector<8x128xf32>
    %cst_343 = arith.constant 0.000000e+00 : f32
    %1313 = vector.broadcast %cst_343 : f32 to vector<7x128xf32>
    %1314 = arith.maximumf %1275, %1313 : vector<7x128xf32>
    %1315 = math.absf %1275 : vector<7x128xf32>
    %cst_344 = arith.constant 0.000000e+00 : f32
    %1316 = vector.broadcast %cst_344 : f32 to vector<7x128xf32>
    %1317 = arith.subf %1316, %1315 : vector<7x128xf32>
    %1318 = math.exp %1317 : vector<7x128xf32>
    %cst_345 = arith.constant 1.000000e+00 : f32
    %1319 = vector.broadcast %cst_345 : f32 to vector<7x128xf32>
    %1320 = arith.addf %1319, %1318 : vector<7x128xf32>
    %1321 = math.log %1320 : vector<7x128xf32>
    %1322 = arith.addf %1314, %1321 : vector<7x128xf32>
    %cst_346 = arith.constant 1.000000e-03 : f32
    %1323 = vector.broadcast %cst_346 : f32 to vector<7x128xf32>
    %1324 = arith.addf %1323, %1322 : vector<7x128xf32>
    %cst_347 = arith.constant 0.000000e+00 : f32
    %1325 = vector.broadcast %cst_347 : f32 to vector<8x128xf32>
    %1326 = arith.subf %1325, %1276 : vector<8x128xf32>
    %1327 = math.exp %1326 : vector<8x128xf32>
    %cst_348 = arith.constant 1.000000e+00 : f32
    %1328 = vector.broadcast %cst_348 : f32 to vector<8x128xf32>
    %1329 = arith.addf %1328, %1327 : vector<8x128xf32>
    %cst_349 = arith.constant 1.000000e+00 : f32
    %1330 = vector.broadcast %cst_349 : f32 to vector<8x128xf32>
    %1331 = arith.divf %1330, %1329 : vector<8x128xf32>
    %cst_350 = arith.constant 0.949999988 : f32
    %1332 = vector.broadcast %cst_350 : f32 to vector<8x128xf32>
    %1333 = arith.mulf %1332, %1331 : vector<8x128xf32>
    %cst_351 = arith.constant 2.500000e-02 : f32
    %1334 = vector.broadcast %cst_351 : f32 to vector<8x128xf32>
    %1335 = arith.addf %1333, %1334 : vector<8x128xf32>
    %cst_352 = arith.constant -2.99999905 : f32
    %1336 = vector.broadcast %cst_352 : f32 to vector<1x128xf32>
    %1337 = arith.cmpf oge, %1109, %1336 : vector<1x128xf32>
    %1338 = arith.extui %1337 : vector<1x128xi1> to vector<1x128xi32>
    %cst_353 = arith.constant 3.00000095 : f32
    %1339 = vector.broadcast %cst_353 : f32 to vector<1x128xf32>
    %1340 = arith.cmpf oge, %1109, %1339 : vector<1x128xf32>
    %1341 = arith.extui %1340 : vector<1x128xi1> to vector<1x128xi32>
    %1342 = arith.addi %1338, %1341 : vector<1x128xi32>
    %1343 = vector.extract_strided_slice %1308 {offsets = [0, 0], sizes = [7, 128], strides = [1, 1]} : vector<8x128xf32> to vector<7x128xf32>
    %cst_354 = arith.constant 9.99999997E-7 : f32
    %1344 = vector.broadcast %cst_354 : f32 to vector<7x128xf32>
    %1345 = arith.addf %1343, %1344 : vector<7x128xf32>
    %1346 = vector.broadcast %1109 : vector<1x128xf32> to vector<7x128xf32>
    %1347 = arith.cmpf oge, %1346, %1345 : vector<7x128xf32>
    %1348 = arith.extui %1347 : vector<7x128xi1> to vector<7x128xi32>
    %cst_355 = arith.constant dense<0> : vector<128xi32>
    %1349 = vector.multi_reduction <add>, %1348, %cst_355 [0] : vector<7x128xi32> to vector<128xi32>
    %1350 = vector.shape_cast %1349 : vector<128xi32> to vector<1x128xi32>
    %1351 = arith.addi %1342, %1350 : vector<1x128xi32>
    %c1_i32_356 = arith.constant 1 : i32
    %1352 = vector.broadcast %c1_i32_356 : i32 to vector<1x128xi32>
    %1353 = arith.subi %1351, %1352 : vector<1x128xi32>
    %c0_i32_357 = arith.constant 0 : i32
    %c7_i32_358 = arith.constant 7 : i32
    %1354 = vector.broadcast %c0_i32_357 : i32 to vector<1x128xi32>
    %1355 = arith.maxsi %1354, %1353 : vector<1x128xi32>
    %1356 = vector.broadcast %c7_i32_358 : i32 to vector<1x128xi32>
    %1357 = arith.minsi %1356, %1355 : vector<1x128xi32>
    %1358 = vector.broadcast %1357 : vector<1x128xi32> to vector<8x128xi32>
    %1359 = arith.cmpi eq, %13, %1358 : vector<8x128xi32>
    %1360 = arith.extui %1359 : vector<8x128xi1> to vector<8x128xi32>
    %1361 = arith.sitofp %1360 : vector<8x128xi32> to vector<8x128xf32>
    %c1_i32_359 = arith.constant 1 : i32
    %1362 = vector.broadcast %c1_i32_359 : i32 to vector<1x128xi32>
    %1363 = arith.subi %1357, %1362 : vector<1x128xi32>
    %1364 = vector.broadcast %1363 : vector<1x128xi32> to vector<8x128xi32>
    %1365 = arith.cmpi eq, %13, %1364 : vector<8x128xi32>
    %1366 = arith.extui %1365 : vector<8x128xi1> to vector<8x128xi32>
    %1367 = arith.sitofp %1366 : vector<8x128xi32> to vector<8x128xf32>
    %1368 = vector.broadcast %1357 : vector<1x128xi32> to vector<7x128xi32>
    %1369 = arith.cmpi eq, %14, %1368 : vector<7x128xi32>
    %1370 = arith.extui %1369 : vector<7x128xi1> to vector<7x128xi32>
    %1371 = arith.sitofp %1370 : vector<7x128xi32> to vector<7x128xf32>
    %c1_i32_360 = arith.constant 1 : i32
    %1372 = vector.broadcast %c1_i32_360 : i32 to vector<1x128xi32>
    %1373 = arith.subi %1357, %1372 : vector<1x128xi32>
    %1374 = vector.broadcast %1373 : vector<1x128xi32> to vector<7x128xi32>
    %1375 = arith.cmpi eq, %14, %1374 : vector<7x128xi32>
    %1376 = arith.extui %1375 : vector<7x128xi1> to vector<7x128xi32>
    %1377 = arith.sitofp %1376 : vector<7x128xi32> to vector<7x128xf32>
    %c0_i32_361 = arith.constant 0 : i32
    %1378 = vector.broadcast %c0_i32_361 : i32 to vector<1x128xi32>
    %1379 = arith.cmpi eq, %1357, %1378 : vector<1x128xi32>
    %c7_i32_362 = arith.constant 7 : i32
    %1380 = vector.broadcast %c7_i32_362 : i32 to vector<1x128xi32>
    %1381 = arith.cmpi eq, %1357, %1380 : vector<1x128xi32>
    %1382 = arith.mulf %1308, %1367 : vector<8x128xf32>
    %cst_363 = arith.constant dense<0.000000e+00> : vector<128xf32>
    %1383 = vector.multi_reduction <add>, %1382, %cst_363 [0] : vector<8x128xf32> to vector<128xf32>
    %1384 = vector.shape_cast %1383 : vector<128xf32> to vector<1x128xf32>
    %cst_364 = arith.constant -3.000000e+00 : f32
    %1385 = vector.broadcast %cst_364 : f32 to vector<1x128xf32>
    %1386 = arith.select %1379, %1385, %1384 : vector<1x128xi1>, vector<1x128xf32>
    %1387 = arith.mulf %1308, %1361 : vector<8x128xf32>
    %cst_365 = arith.constant dense<0.000000e+00> : vector<128xf32>
    %1388 = vector.multi_reduction <add>, %1387, %cst_365 [0] : vector<8x128xf32> to vector<128xf32>
    %1389 = vector.shape_cast %1388 : vector<128xf32> to vector<1x128xf32>
    %cst_366 = arith.constant 3.000000e+00 : f32
    %1390 = vector.broadcast %cst_366 : f32 to vector<1x128xf32>
    %1391 = arith.select %1381, %1390, %1389 : vector<1x128xi1>, vector<1x128xf32>
    %1392 = arith.subf %1391, %1386 : vector<1x128xf32>
    %1393 = arith.mulf %1312, %1367 : vector<8x128xf32>
    %cst_367 = arith.constant dense<0.000000e+00> : vector<128xf32>
    %1394 = vector.multi_reduction <add>, %1393, %cst_367 [0] : vector<8x128xf32> to vector<128xf32>
    %1395 = vector.shape_cast %1394 : vector<128xf32> to vector<1x128xf32>
    %cst_368 = arith.constant -3.000000e+00 : f32
    %1396 = vector.broadcast %cst_368 : f32 to vector<1x128xf32>
    %1397 = arith.select %1379, %1396, %1395 : vector<1x128xi1>, vector<1x128xf32>
    %1398 = arith.mulf %1312, %1361 : vector<8x128xf32>
    %cst_369 = arith.constant dense<0.000000e+00> : vector<128xf32>
    %1399 = vector.multi_reduction <add>, %1398, %cst_369 [0] : vector<8x128xf32> to vector<128xf32>
    %1400 = vector.shape_cast %1399 : vector<128xf32> to vector<1x128xf32>
    %cst_370 = arith.constant 3.000000e+00 : f32
    %1401 = vector.broadcast %cst_370 : f32 to vector<1x128xf32>
    %1402 = arith.select %1381, %1401, %1400 : vector<1x128xi1>, vector<1x128xf32>
    %1403 = arith.subf %1402, %1397 : vector<1x128xf32>
    %cst_371 = arith.constant 1.000000e+00 : f32
    %1404 = vector.broadcast %cst_371 : f32 to vector<1x128xf32>
    %1405 = arith.divf %1404, %1392 : vector<1x128xf32>
    %1406 = arith.mulf %1403, %1405 : vector<1x128xf32>
    %1407 = arith.mulf %1324, %1377 : vector<7x128xf32>
    %cst_372 = arith.constant dense<0.000000e+00> : vector<128xf32>
    %1408 = vector.multi_reduction <add>, %1407, %cst_372 [0] : vector<7x128xf32> to vector<128xf32>
    %1409 = vector.shape_cast %1408 : vector<128xf32> to vector<1x128xf32>
    %cst_373 = arith.constant 1.000000e+00 : f32
    %1410 = vector.broadcast %cst_373 : f32 to vector<1x128xf32>
    %1411 = arith.select %1379, %1410, %1409 : vector<1x128xi1>, vector<1x128xf32>
    %1412 = arith.mulf %1324, %1371 : vector<7x128xf32>
    %cst_374 = arith.constant dense<0.000000e+00> : vector<128xf32>
    %1413 = vector.multi_reduction <add>, %1412, %cst_374 [0] : vector<7x128xf32> to vector<128xf32>
    %1414 = vector.shape_cast %1413 : vector<128xf32> to vector<1x128xf32>
    %cst_375 = arith.constant 1.000000e+00 : f32
    %1415 = vector.broadcast %cst_375 : f32 to vector<1x128xf32>
    %1416 = arith.select %1381, %1415, %1414 : vector<1x128xi1>, vector<1x128xf32>
    %1417 = arith.mulf %1335, %1361 : vector<8x128xf32>
    %cst_376 = arith.constant dense<0.000000e+00> : vector<128xf32>
    %1418 = vector.multi_reduction <add>, %1417, %cst_376 [0] : vector<8x128xf32> to vector<128xf32>
    %1419 = vector.shape_cast %1418 : vector<128xf32> to vector<1x128xf32>
    %1420 = arith.divf %1411, %1416 : vector<1x128xf32>
    %1421 = math.sqrt %1420 : vector<1x128xf32>
    %1422 = arith.mulf %1419, %1411 : vector<1x128xf32>
    %cst_377 = arith.constant 1.000000e+00 : f32
    %1423 = vector.broadcast %cst_377 : f32 to vector<1x128xf32>
    %1424 = arith.subf %1423, %1419 : vector<1x128xf32>
    %1425 = arith.mulf %1424, %1421 : vector<1x128xf32>
    %1426 = arith.mulf %1425, %1416 : vector<1x128xf32>
    %1427 = arith.addf %1422, %1426 : vector<1x128xf32>
    %1428 = arith.divf %1427, %1406 : vector<1x128xf32>
    %cst_378 = arith.constant 1.000000e+00 : f32
    %1429 = vector.broadcast %cst_378 : f32 to vector<1x128xf32>
    %1430 = arith.subf %1429, %1419 : vector<1x128xf32>
    %1431 = arith.mulf %1430, %1397 : vector<1x128xf32>
    %1432 = arith.mulf %1419, %1421 : vector<1x128xf32>
    %1433 = arith.mulf %1432, %1402 : vector<1x128xf32>
    %1434 = arith.addf %1431, %1433 : vector<1x128xf32>
    %cst_379 = arith.constant 1.000000e+00 : f32
    %1435 = vector.broadcast %cst_379 : f32 to vector<1x128xf32>
    %1436 = arith.subf %1435, %1419 : vector<1x128xf32>
    %1437 = arith.mulf %1419, %1421 : vector<1x128xf32>
    %1438 = arith.addf %1436, %1437 : vector<1x128xf32>
    %1439 = arith.divf %1434, %1438 : vector<1x128xf32>
    %1440 = arith.subf %1109, %1386 : vector<1x128xf32>
    %1441 = arith.mulf %1440, %1405 : vector<1x128xf32>
    %1442 = arith.subf %1419, %1441 : vector<1x128xf32>
    %1443 = arith.mulf %1397, %1442 : vector<1x128xf32>
    %1444 = arith.mulf %1428, %1439 : vector<1x128xf32>
    %1445 = arith.mulf %1444, %1441 : vector<1x128xf32>
    %1446 = arith.addf %1443, %1445 : vector<1x128xf32>
    %1447 = arith.subf %1419, %1441 : vector<1x128xf32>
    %1448 = arith.mulf %1428, %1441 : vector<1x128xf32>
    %1449 = arith.addf %1447, %1448 : vector<1x128xf32>
    %1450 = arith.divf %1446, %1449 : vector<1x128xf32>
    %1451 = arith.mulf %1428, %1439 : vector<1x128xf32>
    %cst_380 = arith.constant 1.000000e+00 : f32
    %1452 = vector.broadcast %cst_380 : f32 to vector<1x128xf32>
    %1453 = arith.subf %1452, %1441 : vector<1x128xf32>
    %1454 = arith.mulf %1451, %1453 : vector<1x128xf32>
    %1455 = arith.mulf %1421, %1402 : vector<1x128xf32>
    %1456 = arith.subf %1441, %1419 : vector<1x128xf32>
    %1457 = arith.mulf %1455, %1456 : vector<1x128xf32>
    %1458 = arith.addf %1454, %1457 : vector<1x128xf32>
    %cst_381 = arith.constant 1.000000e+00 : f32
    %1459 = vector.broadcast %cst_381 : f32 to vector<1x128xf32>
    %1460 = arith.subf %1459, %1441 : vector<1x128xf32>
    %1461 = arith.mulf %1428, %1460 : vector<1x128xf32>
    %1462 = arith.subf %1441, %1419 : vector<1x128xf32>
    %1463 = arith.mulf %1421, %1462 : vector<1x128xf32>
    %1464 = arith.addf %1461, %1463 : vector<1x128xf32>
    %1465 = arith.divf %1458, %1464 : vector<1x128xf32>
    %1466 = arith.cmpf ole, %1441, %1419 : vector<1x128xf32>
    %1467 = arith.select %1466, %1450, %1465 : vector<1x128xi1>, vector<1x128xf32>
    %cst_382 = arith.constant -3.000000e+00 : f32
    %1468 = vector.broadcast %cst_382 : f32 to vector<1x128xf32>
    %1469 = arith.cmpf oge, %1109, %1468 : vector<1x128xf32>
    %cst_383 = arith.constant 3.000000e+00 : f32
    %1470 = vector.broadcast %cst_383 : f32 to vector<1x128xf32>
    %1471 = arith.cmpf ole, %1109, %1470 : vector<1x128xf32>
    %1472 = arith.andi %1469, %1471 : vector<1x128xi1>
    %1473 = arith.select %1472, %1467, %1109 : vector<1x128xi1>, vector<1x128xf32>
    %c6 = arith.constant 6 : index
    %c0_384 = arith.constant 0 : index
    %1474 = vector.load %arg9[%c6, %c0_384] : memref<8x128xf32, #tpu.memory_space<vmem>>, vector<1x128xf32>
    tpu.vector_store %arg9[%c6, %c0_384], %1257 {strides = array<i32>} : memref<8x128xf32, #tpu.memory_space<vmem>>, vector<1x128xf32>,
    %c7 = arith.constant 7 : index
    %c0_385 = arith.constant 0 : index
    %1475 = vector.load %arg9[%c7, %c0_385] : memref<8x128xf32, #tpu.memory_space<vmem>>, vector<1x128xf32>
    tpu.vector_store %arg9[%c7, %c0_385], %1473 {strides = array<i32>} : memref<8x128xf32, #tpu.memory_space<vmem>>, vector<1x128xf32>,
    return
  }
  func.func @transform_0(%arg0: i32) -> (i32, i32) {
    %c0_i32 = arith.constant 0 : i32
    %c0_i32_0 = arith.constant 0 : i32
    return %c0_i32, %arg0 : i32, i32
  }
  func.func @transform_1(%arg0: i32) -> (i32, i32) {
    %c0_i32 = arith.constant 0 : i32
    %c0_i32_0 = arith.constant 0 : i32
    %c0_i32_1 = arith.constant 0 : i32
    return %c0_i32, %c0_i32_0 : i32, i32
  }
  func.func @transform_2(%arg0: i32) -> (i32, i32) {
    %c0_i32 = arith.constant 0 : i32
    %c0_i32_0 = arith.constant 0 : i32
    %c0_i32_1 = arith.constant 0 : i32
    return %c0_i32, %c0_i32_0 : i32, i32
  }
  func.func @transform_3(%arg0: i32) -> (i32, i32) {
    %c0_i32 = arith.constant 0 : i32
    %c0_i32_0 = arith.constant 0 : i32
    %c0_i32_1 = arith.constant 0 : i32
    return %c0_i32, %c0_i32_0 : i32, i32
  }
  func.func @transform_4(%arg0: i32) -> (i32, i32) {
    %c0_i32 = arith.constant 0 : i32
    %c0_i32_0 = arith.constant 0 : i32
    %c0_i32_1 = arith.constant 0 : i32
    return %c0_i32, %c0_i32_0 : i32, i32
  }
  func.func @transform_5(%arg0: i32) -> (i32, i32) {
    %c0_i32 = arith.constant 0 : i32
    %c0_i32_0 = arith.constant 0 : i32
    %c0_i32_1 = arith.constant 0 : i32
    return %c0_i32, %c0_i32_0 : i32, i32
  }
  func.func @transform_6(%arg0: i32) -> (i32, i32) {
    %c0_i32 = arith.constant 0 : i32
    %c0_i32_0 = arith.constant 0 : i32
    %c0_i32_1 = arith.constant 0 : i32
    return %c0_i32, %c0_i32_0 : i32, i32
  }
  func.func @transform_7(%arg0: i32) -> (i32, i32) {
    %c0_i32 = arith.constant 0 : i32
    %c0_i32_0 = arith.constant 0 : i32
    %c0_i32_1 = arith.constant 0 : i32
    return %c0_i32, %c0_i32_0 : i32, i32
  }
  func.func @transform_8(%arg0: i32) -> (i32, i32) {
    %c0_i32 = arith.constant 0 : i32
    %c0_i32_0 = arith.constant 0 : i32
    return %c0_i32, %arg0 : i32, i32
  }
}

</mosaic_0001>

<bundles_post_ra>
// kernel: tpu_custom_call.1
= control target key start
LH: loop header
LB: loop body
LE: loop exit
PB: predicated region body
PF: predicated region fallthrough
CT: control target
= control target key end

     0   :  { %v3601_v2 = vmov 0   ;;  %s4442_s0 = inlined_call_operand.vmem [shape: f32[2,128], index: 0, kind: input, shape index: {}]   ;;  %s4443_s1 = inlined_call_operand.vmem [shape: f32[32,1], index: 1, kind: input, shape index: {}]   ;;  %s4444_s2 = inlined_call_operand.vmem [shape: f32[32,1], index: 2, kind: input, shape index: {}]   ;;  %s4445_s3 = inlined_call_operand.vmem [shape: f32[32,32], index: 3, kind: input, shape index: {}]   ;;  %s4446_s4 = inlined_call_operand.vmem [shape: f32[32,1], index: 4, kind: input, shape index: {}]   ;;  %s4447_s5 = inlined_call_operand.vmem [shape: f32[32,32], index: 5, kind: input, shape index: {}]   ;;  %s4448_s6 = inlined_call_operand.vmem [shape: f32[32,1], index: 6, kind: input, shape index: {}]   ;;  %s4449_s7 = inlined_call_operand.vmem [shape: f32[32,1], index: 7, kind: input, shape index: {}]   ;;  %s4450_s8 = inlined_call_operand.hbm [shape: f32[8,128], index: 8, kind: output, shape index: {}]  }
   0x1   :  { %v36_v0 = vld [vmem:[%s4444_s2] sm:$0xff]  ;;  %3387 = vset.pattern.permute.xlu1 %v3601_v2  ;;  %3386 = vset.pattern.permute.xlu0 %v3601_v2  ;;  %v37_v3 = vld [vmem:[%s4444_s2 + $0x8] sm:$0xff]  ;;  %v35_v5 = vld [vmem:[%s4443_s1 + $0x18] sm:$0xff] }
   0x2   :  { %v32_v1 = vld [vmem:[%s4443_s1] sm:$0xff]  ;;  %274 = vperm.xlu1 %3387, %v36_v0   ;;  %v33_v4 = vld [vmem:[%s4443_s1 + $0x8] sm:$0xff]  ;;  %v34_v6 = vld [vmem:[%s4443_s1 + $0x10] sm:$0xff] }
   0x3   :  { %250 = vperm.xlu0 %3386, %v32_v1  }
   0x6   :  { %279 = vperm.xlu1 %3387, %v37_v3  }
   0x7   :  { %255 = vperm.xlu0 %3386, %v33_v4  }
   0x8   :  { %13 = vsyncpa [#allocation3], 0  ;;  %v39_v7 = vld [vmem:[%s4444_s2 + $0x18] sm:$0xff]  ;;  %v38_v8 = vld [vmem:[%s4444_s2 + $0x10] sm:$0xff]  ;;  %vm320_vm0 = vcmask 261120   ;;  %v60_v23 = vlaneseq  ;;  %v3602_v54 = vmov 0.0  }
   0x9   :  { %v45_v9 = vld [vmem:[%s4446_s4 + $0x8] sm:$0xff]  ;;  %v44_v10 = vld [vmem:[%s4446_s4] sm:$0xff]  ;;  %v47_v11 = vld [vmem:[%s4446_s4 + $0x18] sm:$0xff]  ;;  %vm84_vm1 = vcmask 1046528  }
   0xa   :  { %265 = vperm.xlu1 %3387, %v35_v5   ;;  %v46_v12 = vld [vmem:[%s4446_s4 + $0x10] sm:$0xff]  ;;  %v56_v13 = vld [vmem:[%s4449_s7] sm:$0xff]  ;;  %v57_v17 = vld [vmem:[%s4449_s7 + $0x8] sm:$0xff]  ;;  %v3717_v24 = vshrl.u32 %v60_v23, 7 }
   0xb   :  { %260 = vperm.xlu0 %3386, %v34_v6   ;;  %v40_v14 = vld [vmem:[%s4445_s3] sm:$0xff]  ;;  %v72_v15 = vadd.f32 1e-06, %v56_v13  ;;  %v58_v16 = vld [vmem:[%s4449_s7 + $0x10] sm:$0xff]  ;;  %v59_v18 = vld [vmem:[%s4449_s7 + $0x18] sm:$0xff] }
   0xc   :  { %3174 = vmatprep.mubr.msk.f32.mxu0 %vm320_vm0, %v40_v14  ;;  %v52_v19 = vld [vmem:[%s4448_s6] sm:$0xff]  ;;  %v54_v20 = vld [vmem:[%s4448_s6 + $0x10] sm:$0xff]  ;;  %v53_v21 = vld [vmem:[%s4448_s6 + $0x8] sm:$0xff]  ;;  %v3720_v25 = vsub.s32 0, %v3717_v24 }
   0xd   :  { %v55_v22 = vld [vmem:[%s4448_s6 + $0x18] sm:$0xff]  ;;  %v3725_v26 = vld [vmem:[%s4442_s0] sm:$0x1]  ;;  %v41_v52 = vld [vmem:[%s4445_s3 + $0x8] sm:$0xff] }
   0xe   :  { %289 = vperm.xlu1 %3387, %v39_v7   ;;  %v76_v27 = vrot.slane %v3725_v26, %v3720_v25  ;;  %v42_v53 = vld [vmem:[%s4445_s3 + $0x10] sm:$0xff]  ;;  %v43_v56 = vld [vmem:[%s4445_s3 + $0x18] sm:$0xff]  ;;  %vm67_vm3 = vcmp.ge.f32.partialorder %v3725_v26, -2.999999  ;;  %vm69_vm4 = vcmp.ge.f32.partialorder %v3725_v26, 3.000001 }
   0xf   :  { %284 = vperm.xlu0 %3386, %v38_v8   ;;  %v68_v62 = vsel %vm67_vm3, 1, %v3601_v2  ;;  %v70_v63 = vsel %vm69_vm4, 1, %v3601_v2  ;;  %vm244_vm13 = vcmp.ge.f32.partialorder %v3725_v26, -3.0  ;;  %vm245_vm14 = vcmp.le.f32.partialorder %v3725_v26, 3.0 }
  0x10   :  { %v71_v1 = vadd.s32 %v70_v63, %v68_v62  ;;  %vm246_vm15 = vmand %vm244_vm13, %vm245_vm14 }
  0x12   :  { %307 = vperm.xlu1 %3387, %v45_v9  }
  0x13   :  { %302 = vperm.xlu0 %3386, %v44_v10  }
  0x16   :  { %317 = vperm.xlu1 %3387, %v47_v11  }
  0x17   :  { %312 = vperm.xlu0 %3386, %v46_v12  }
  0x1a   :  { %164 = vperm.xlu1 %3387, %v58_v16  }
  0x1b   :  { %79 = vperm.xlu0 %3386, %v72_v15  }
  0x1e   :  { %139 = vperm.xlu1 %3387, %v57_v17  }
  0x1f   :  { %117 = vperm.xlu0 %3386, %v56_v13  }
  0x22   :  { %187 = vperm.xlu1 %3387, %v59_v18  }
  0x23   :  { %424 = vperm.xlu0 %3386, %v52_v19  }
  0x26   :  { %434 = vperm.xlu1 %3387, %v54_v20  }
  0x27   :  { %429 = vperm.xlu0 %3386, %v53_v21  }
  0x2b   :  { %439 = vperm.xlu0 %3386, %v55_v22  }
  0x81   :  { %v3729_v28 = vpop.permute.xlu1 %274 }
  0x82   :  { %v3731_v29 = vpop.permute.xlu0 %250 }
  0x83   :  { %v268_v30 = vmul.f32 %v3731_v29, %v76_v27 }
  0x85   :  { %v3734_v31 = vpop.permute.xlu1 %279  ;;  %v292_v34 = vadd.f32 %v3729_v28, %v268_v30 }
  0x86   :  { %v3736_v32 = vpop.permute.xlu0 %255 }
  0x87   :  { %v269_v33 = vmul.f32 %v3736_v32, %v76_v27  ;;  %v296_v38 = vmax.f32 %v292_v34, 0.0 }
  0x89   :  { %v293_v35 = vadd.f32 %v3734_v31, %v269_v33  ;;  %v3741_v36 = vpop.permute.xlu1 %265 }
  0x8a   :  { %v3743_v37 = vpop.permute.xlu0 %260  ;;  %v271_v40 = vmul.f32 %v3741_v36, %v76_v27 }
  0x8b   :  { %v297_v39 = vmax.f32 %v293_v35, 0.0  ;;  %v270_v41 = vmul.f32 %v3743_v37, %v76_v27 }
  0x8d   :  { %v3318_v42 = vpack.c.bf16 %v297_v39, %v296_v38  ;;  %v3747_v43 = vpop.permute.xlu1 %289 }
  0x8e   :  { %v3749_v44 = vpop.permute.xlu0 %284  ;;  %v295_v45 = vadd.f32 %v3747_v43, %v271_v40 }
  0x8f   :  { %v294_v46 = vadd.f32 %v3749_v44, %v270_v41  ;;  %3319 = vmatprep.subr.bf16.mxu0 %v3318_v42 }
  0x90   :  { %3321 = vmatpush3.bf16.msra.mxu0 %v3318_v42  ;;  %v299_v48 = vmax.f32 %v295_v45, 0.0 }
  0x91   :  { %v298_v47 = vmax.f32 %v294_v46, 0.0  ;;  %v3779_v4 = vpop.permute.xlu1 %307 }
  0x92   :  { %v3753_v49 = vpop.permute.xlu0 %302 }
  0x93   :  { %v3322_v50 = vpack.c.bf16 %v299_v48, %v298_v47 }
  0x95   :  { %3323 = vmatprep.subr.bf16.mxu0 %v3322_v50  ;;  %v3781_v8 = vpop.permute.xlu1 %317 }
  0x96   :  { %v3755_v51 = vpop.permute.xlu0 %312  ;;  %3325 = vmatpush3.bf16.msra.mxu0 %v3322_v50 }
  0x97   :  { %3194 = vmatprep.subr.mxu0 %v3602_v54 }
  0x99   :  { %3175 = vmatmul.mubr.msk.f32.vlgmr.msra.gmra.mrb[0].mxu0 %vm320_vm0, %v41_v52  ;;  %v3788_v13 = vpop.permute.xlu1 %164 }
  0x9a   :  { %v3765_v55 = vpop.permute.xlu0 %79  ;;  %3177 = vmatprep.mubr.msk.f32.mxu0 %vm320_vm0, %v42_v53 }
  0x9b   :  { %vm82_vm2 = vcmp.ge.f32.partialorder %v76_v27, %v3765_v55 }
  0x9c   :  { %v83_v57 = vsel %vm82_vm2, 1, %v3601_v2 }
  0x9d   :  { %v85_v58 = vsel %vm84_vm1, %v83_v57, 0  ;;  %3178 = vmatmul.mubr.msk.f32.gmra.mrb[2].mxu0 %vm320_vm0, %v43_v56  ;;  %v3800_v22 = vpop.permute.xlu1 %139 }
  0x9e   :  { %v86_v59 = vrot.slane %v85_v58, 4  ;;  %v3792_v15 = vpop.permute.xlu0 %117 }
  0xa0   :  { %v87_v60 = vadd.s32 %v86_v59, %v85_v58 }
  0xa2   :  { %v88_v61 = vrot.slane %v87_v60, 2 }
  0xa4   :  { %v89_v0 = vadd.s32 %v88_v61, %v87_v60 }
  0xa6   :  { %v90_v3 = vrot.slane %v89_v0, 1 }
  0xa8   :  { %v91_v5 = vadd.s32 %v90_v3, %v89_v0  ;;  %v3807_v3 = vpop.permute.xlu1 %187 }
  0xaa   :  { %v92_v6 = vadd.s32 %v91_v5, %v71_v1 }
  0xac   :  { %v3006_v7 = vadd.s32 4294967295, %v92_v6 }
  0xae   :  { %vm94_vm5 = vcmp.gt.s32.totalorder %v3006_v7, 0 }
  0xaf   :  { %v95_v9 = vsel %vm94_vm5, %v3006_v7, 0 }
  0xb0   :  { %vm96_vm6 = vcmp.lt.s32.totalorder %v95_v9, 7 }
  0xb1   :  { %v3783_v10 = vsel %vm96_vm6, %v95_v9, 7 }
  0xb2   :  { %v101_v11 = vrot.slane %v3783_v10, %v3720_v25  ;;  %v3008_v12 = vadd.s32 4294967295, %v3783_v10  ;;  %vm113_vm9 = vcmp.eq.s32.totalorder %v3783_v10, 0  ;;  %vm114_vm10 = vcmp.eq.s32.totalorder %v3783_v10, 7 }
  0xb4   :  { %vm102_vm7 = vcmp.eq.s32.totalorder %v3717_v24, %v101_v11  ;;  %v109_v14 = vrot.slane %v3008_v12, %v3720_v25 }
  0xb5   :  { %v3007_v16 = vsel %vm102_vm7, 1.0, %v3602_v54 }
  0xb6   :  { %vm110_vm8 = vcmp.eq.s32.totalorder %v3717_v24, %v109_v14  ;;  %v128_v17 = vmul.f32 %v3007_v16, %v3792_v15  ;;  %v176_v18 = vmul.f32 %v3007_v16, %v3788_v13  ;;  %v150_v42 = vmul.f32 %v3007_v16, %v3800_v22 }
  0xb7   :  { %v3009_v19 = vsel %vm110_vm8, 1.0, %v3602_v54  ;;  %v190_v11 = vmul.f32 %v3007_v16, %v3807_v3 }
  0xb8   :  { %v120_v20 = vmul.f32 %v3009_v19, %v3792_v15  ;;  %v129_v21 = vrot.slane %v128_v17, 4  ;;  %v167_v27 = vmul.f32 %v3009_v19, %v3788_v13  ;;  %v177_v30 = vsel %vm84_vm1, %v176_v18, 0.0 }
  0xb9   :  { %v142_v35 = vmul.f32 %v3009_v19, %v3800_v22  ;;  %v178_v39 = vrot.slane %v177_v30, 4  ;;  %v151_v57 = vrot.slane %v150_v42, 4 }
  0xba   :  { %v121_v33 = vrot.slane %v120_v20, 4  ;;  %v130_v34 = vadd.f32 %v129_v21, %v128_v17  ;;  %v168_v38 = vsel %vm84_vm1, %v167_v27, 0.0  ;;  %v191_v27 = vrot.slane %v190_v11, 4 }
  0xbb   :  { %v169_v45 = vrot.slane %v168_v38, 4  ;;  %v179_v46 = vadd.f32 %v178_v39, %v177_v30  ;;  %v143_v50 = vrot.slane %v142_v35, 4  ;;  %v152_v1 = vadd.f32 %v151_v57, %v150_v42 }
  0xbc   :  { %v122_v40 = vadd.f32 %v121_v33, %v120_v20  ;;  %v131_v41 = vrot.slane %v130_v34, 2  ;;  %v192_v16 = vadd.f32 %v191_v27, %v190_v11 }
  0xbd   :  { %v170_v52 = vadd.f32 %v169_v45, %v168_v38  ;;  %v180_v53 = vrot.slane %v179_v46, 2  ;;  %v144_v61 = vadd.f32 %v143_v50, %v142_v35  ;;  %v153_v17 = vrot.slane %v152_v1, 2 }
  0xbe   :  { %v123_v47 = vrot.slane %v122_v40, 2  ;;  %v132_v48 = vadd.f32 %v131_v41, %v130_v34  ;;  %v193_v41 = vrot.slane %v192_v16, 2 }
  0xbf   :  { %v181_v59 = vadd.f32 %v180_v53, %v179_v46  ;;  %v171_v62 = vrot.slane %v170_v52, 2  ;;  %v145_v7 = vrot.slane %v144_v61, 2  ;;  %v154_v30 = vadd.f32 %v153_v17, %v152_v1 }
  0xc0   :  { %v124_v56 = vadd.f32 %v123_v47, %v122_v40  ;;  %v133_v58 = vrot.slane %v132_v48, 1  ;;  %v194_v47 = vadd.f32 %v193_v41, %v192_v16 }
  0xc1   :  { %v182_v63 = vrot.slane %v181_v59, 1  ;;  %v172_v9 = vadd.f32 %v171_v62, %v170_v52  ;;  %v146_v20 = vadd.f32 %v145_v7, %v144_v61  ;;  %v155_v35 = vrot.slane %v154_v30, 1 }
  0xc2   :  { %v125_v60 = vrot.slane %v124_v56, 1  ;;  %v134_v5 = vadd.f32 %v133_v58, %v132_v48  ;;  %v195_v53 = vrot.slane %v194_v47, 1 }
  0xc3   :  { %v183_v6 = vadd.f32 %v182_v63, %v181_v59  ;;  %v173_v21 = vrot.slane %v172_v9, 1  ;;  %v147_v33 = vrot.slane %v146_v20, 1  ;;  %v156_v45 = vadd.f32 %v155_v35, %v154_v30 }
  0xc4   :  { %v126_v0 = vadd.f32 %v125_v60, %v124_v56  ;;  %v135_v18 = vsel %vm114_vm10, 3.0, %v134_v5  ;;  %v196_v57 = vadd.f32 %v195_v53, %v194_v47 }
  0xc5   :  { %v184_v14 = vsel %vm114_vm10, 1.0, %v183_v6  ;;  %v174_v34 = vadd.f32 %v173_v21, %v172_v9  ;;  %v148_v39 = vadd.f32 %v147_v33, %v146_v20  ;;  %v157_v50 = vsel %vm114_vm10, 3.0, %v156_v45 }
  0xc6   :  { %v127_v12 = vsel %vm113_vm9, -3.0, %v126_v0  ;;  %3388 = vrcp.f32 %v184_v14  ;;  %v207_v62 = vsub.f32 1.0, %v196_v57 }
  0xc7   :  { %v136_v19 = vsub.f32 %v135_v18, %v127_v12  ;;  %v175_v40 = vsel %vm113_vm9, 1.0, %v174_v34  ;;  %v149_v46 = vsel %vm113_vm9, -3.0, %v148_v39  ;;  %v220_v5 = vsub.f32 %v3725_v26, %v127_v12 }
  0xc8   :  { %v158_v52 = vsub.f32 %v157_v50, %v149_v46  ;;  %v206_v6 = vmul.f32 %v196_v57, %v175_v40 }
  0xc9   :  { %3390 = vrcp.f32 %v136_v19 }
  0xd0   :  { %v3389_v38 = vpop.eup %3388 }
  0xd1   :  { %v198_v42 = vmul.f32 %v3389_v38, %v175_v40  ;;  %v213_v38 = vmul.f32 %v207_v62, %v149_v46 }
  0xd3   :  { %3392 = vrsqrt.f32 %v198_v42  ;;  %v3391_v48 = vpop.eup %3390  ;;  %vm201_vm11 = vcmp.eq.f32.partialorder %v198_v42, inf  ;;  %v204_v60 = vand.u32 2147483648, %v198_v42  ;;  %vm203_vm12 = vcmp.eq.f32.partialorder %v198_v42, 0.0 }
  0xd4   :  { %v161_v56 = vmul.f32 %v3391_v48, %v158_v52  ;;  %v221_v9 = vmul.f32 %v3391_v48, %v220_v5 }
  0xd6   :  { %3394 = vrcp.f32 %v161_v56  ;;  %v231_v19 = vsub.f32 1.0, %v221_v9  ;;  %v234_v20 = vsub.f32 %v221_v9, %v196_v57  ;;  %v222_v21 = vsub.f32 %v196_v57, %v221_v9 }
  0xd7   :  { %vm242_vm2 = vcmp.le.f32.partialorder %v221_v9, %v196_v57 }
  0xdd   :  { %v3393_v58 = vpop.eup %3392 }
  0xde   :  { %v200_v59 = vmul.f32 %v3393_v58, %v198_v42 }
  0xe0   :  { %v202_v61 = vsel %vm201_vm11, %v198_v42, %v200_v59  ;;  %v3395_v17 = vpop.eup %3394  ;;  %v223_v42 = vmul.f32 %v222_v21, %v149_v46 }
  0xe1   :  { %v205_v63 = vsel %vm203_vm12, %v204_v60, %v202_v61 }
  0xe2   :  { %v208_v0 = vmul.f32 %v207_v62, %v205_v63  ;;  %v214_v1 = vmul.f32 %v205_v63, %v196_v57  ;;  %v238_v33 = vmul.f32 %v234_v20, %v205_v63  ;;  %v233_v40 = vmul.f32 %v205_v63, %v157_v50  ;;  %v48_v57 = vld [vmem:[%s4447_s5] sm:$0xff] }
  0xe3   :  { %3188 = vmatprep.mubr.msk.f32.mxu1 %vm320_vm0, %v48_v57 }
  0xe4   :  { %v209_v10 = vmul.f32 %v208_v0, %v184_v14  ;;  %v217_v7 = vadd.f32 %v214_v1, %v207_v62  ;;  %v215_v34 = vmul.f32 %v214_v1, %v157_v50  ;;  %v235_v48 = vmul.f32 %v234_v20, %v233_v40 }
  0xe6   :  { %v210_v11 = vadd.f32 %v209_v10, %v206_v6  ;;  %3396 = vrcp.f32 %v217_v7  ;;  %v216_v12 = vadd.f32 %v215_v34, %v213_v38 }
  0xe8   :  { %v212_v18 = vmul.f32 %v3395_v17, %v210_v11 }
  0xea   :  { %v227_v27 = vmul.f32 %v221_v9, %v212_v18  ;;  %v237_v30 = vmul.f32 %v231_v19, %v212_v18 }
  0xec   :  { %v228_v16 = vadd.f32 %v227_v27, %v222_v21  ;;  %v239_v35 = vadd.f32 %v238_v33, %v237_v30 }
  0xee   :  { %3398 = vrcp.f32 %v228_v16 }
  0xef   :  { %3400 = vrcp.f32 %v239_v35 }
  0xf0   :  { %v3397_v14 = vpop.eup %3396 }
  0xf1   :  { %v219_v39 = vmul.f32 %v3397_v14, %v216_v12 }
  0xf3   :  { %v224_v41 = vmul.f32 %v219_v39, %v212_v18 }
  0xf5   :  { %v225_v45 = vmul.f32 %v224_v41, %v221_v9  ;;  %v232_v47 = vmul.f32 %v231_v19, %v224_v41 }
  0xf7   :  { %v226_v52 = vadd.f32 %v225_v45, %v223_v42  ;;  %v236_v53 = vadd.f32 %v235_v48, %v232_v47 }
  0xf8   :  { %v3399_v56 = vpop.eup %3398 }
  0xf9   :  { %v3401_v58 = vpop.eup %3400  ;;  %v230_v59 = vmul.f32 %v3399_v56, %v226_v52 }
  0xfa   :  { %v241_v60 = vmul.f32 %v3401_v58, %v236_v53 }
  0xfc   :  { %v243_v61 = vsel %vm242_vm2, %v230_v59, %v241_v60 }
  0xfd   :  { %v3828_v50 = vsel %vm246_vm15, %v243_v61, %v3725_v26 }
  0xfe   :  { %v3832_v46 = vrot.slane %v3828_v50, %v3720_v25  ;;  %898 = vst [vmem:[#allocation2] sm:$0x1] %v3828_v50  ;;  %vm900_vm4 = vcmp.ge.f32.partialorder %v3828_v50, -2.999999  ;;  %vm902_vm5 = vcmp.ge.f32.partialorder %v3828_v50, 3.000001 }
  0xff   :  { %v901_v6 = vsel %vm900_vm4, 1, %v3601_v2  ;;  %v903_v10 = vsel %vm902_vm5, 1, %v3601_v2  ;;  %vm1050_vm14 = vcmp.ge.f32.partialorder %v3828_v50, -3.0  ;;  %vm1051_vm15 = vcmp.le.f32.partialorder %v3828_v50, 3.0 }
 0x100   :  { %vm909_vm3 = vcmp.ge.f32.partialorder %v3832_v46, %v3765_v55  ;;  %v904_v9 = vadd.s32 %v903_v10, %v901_v6 }
 0x101   :  { %v910_v62 = vsel %vm909_vm3, 1, %v3601_v2  ;;  %vm1052_vm3 = vmand %vm1050_vm14, %vm1051_vm15 }
 0x102   :  { %v911_v63 = vsel %vm84_vm1, %v910_v62, 0 }
 0x103   :  { %v912_v0 = vrot.slane %v911_v63, 4 }
 0x105   :  { %v913_v26 = vadd.s32 %v912_v0, %v911_v63 }
 0x107   :  { %v914_v1 = vrot.slane %v913_v26, 2 }
 0x109   :  { %v915_v5 = vadd.s32 %v914_v1, %v913_v26 }
 0x10b   :  { %v916_v7 = vrot.slane %v915_v5, 1 }
 0x10d   :  { %v917_v11 = vadd.s32 %v916_v7, %v915_v5 }
 0x10f   :  { %v918_v17 = vadd.s32 %v917_v11, %v904_v9 }
 0x111   :  { %v3026_v18 = vadd.s32 4294967295, %v918_v17 }
 0x113   :  { %vm920_vm6 = vcmp.gt.s32.totalorder %v3026_v18, 0 }
 0x114   :  { %v921_v19 = vsel %vm920_vm6, %v3026_v18, 0 }
 0x115   :  { %vm922_vm7 = vcmp.lt.s32.totalorder %v921_v19, 7 }
 0x116   :  { %v3847_v20 = vsel %vm922_vm7, %v921_v19, 7 }
 0x117   :  { %v927_v21 = vrot.slane %v3847_v20, %v3720_v25  ;;  %v3028_v27 = vadd.s32 4294967295, %v3847_v20  ;;  %vm939_vm10 = vcmp.eq.s32.totalorder %v3847_v20, 0  ;;  %vm940_vm11 = vcmp.eq.s32.totalorder %v3847_v20, 7 }
 0x119   :  { %vm928_vm8 = vcmp.eq.s32.totalorder %v3717_v24, %v927_v21  ;;  %v935_v30 = vrot.slane %v3028_v27, %v3720_v25 }
 0x11a   :  { %v3027_v33 = vsel %vm928_vm8, 1.0, %v3602_v54 }
 0x11b   :  { %vm936_vm9 = vcmp.eq.s32.totalorder %v3717_v24, %v935_v30  ;;  %v949_v34 = vmul.f32 %v3027_v33, %v3792_v15  ;;  %v987_v16 = vmul.f32 %v3027_v33, %v3788_v13  ;;  %v966_v53 = vmul.f32 %v3027_v33, %v3800_v22 }
 0x11c   :  { %v3029_v35 = vsel %vm936_vm9, 1.0, %v3602_v54  ;;  %v996_v27 = vmul.f32 %v3027_v33, %v3807_v3 }
 0x11d   :  { %v941_v38 = vmul.f32 %v3029_v35, %v3792_v15  ;;  %v950_v12 = vrot.slane %v949_v34, 4  ;;  %v978_v14 = vmul.f32 %v3029_v35, %v3788_v13  ;;  %v988_v39 = vsel %vm84_vm1, %v987_v16, 0.0 }
 0x11e   :  { %v958_v42 = vmul.f32 %v3029_v35, %v3800_v22  ;;  %v989_v47 = vrot.slane %v988_v39, 4  ;;  %v967_v57 = vrot.slane %v966_v53, 4 }
 0x11f   :  { %v942_v40 = vrot.slane %v941_v38, 4  ;;  %v951_v41 = vadd.f32 %v950_v12, %v949_v34  ;;  %v979_v45 = vsel %vm84_vm1, %v978_v14, 0.0 }
 0x120   :  { %v980_v56 = vrot.slane %v979_v45, 4  ;;  %v990_v58 = vadd.f32 %v989_v47, %v988_v39  ;;  %v959_v61 = vrot.slane %v958_v42, 4  ;;  %v968_v11 = vadd.f32 %v967_v57, %v966_v53 }
 0x121   :  { %v943_v48 = vadd.f32 %v942_v40, %v941_v38  ;;  %v952_v52 = vrot.slane %v951_v41, 2  ;;  %v997_v39 = vrot.slane %v996_v27, 4 }
 0x122   :  { %v981_v62 = vadd.f32 %v980_v56, %v979_v45  ;;  %v991_v63 = vrot.slane %v990_v58, 2  ;;  %v960_v6 = vadd.f32 %v959_v61, %v958_v42  ;;  %v969_v16 = vrot.slane %v968_v11, 2 }
 0x123   :  { %v944_v59 = vrot.slane %v943_v48, 2  ;;  %v953_v60 = vadd.f32 %v952_v52, %v951_v41  ;;  %v998_v33 = vadd.f32 %v997_v39, %v996_v27 }
 0x124   :  { %v992_v1 = vadd.f32 %v991_v63, %v990_v58  ;;  %v982_v10 = vrot.slane %v981_v62, 2  ;;  %v961_v19 = vrot.slane %v960_v6, 2  ;;  %v970_v40 = vadd.f32 %v969_v16, %v968_v11 }
 0x125   :  { %v945_v0 = vadd.f32 %v944_v59, %v943_v48  ;;  %v954_v26 = vrot.slane %v953_v60, 1  ;;  %v999_v53 = vrot.slane %v998_v33, 2 }
 0x126   :  { %v993_v7 = vrot.slane %v992_v1, 1  ;;  %v983_v21 = vadd.f32 %v982_v10, %v981_v62  ;;  %v962_v12 = vadd.f32 %v961_v19, %v960_v6  ;;  %v971_v45 = vrot.slane %v970_v40, 1 }
 0x127   :  { %v946_v5 = vrot.slane %v945_v0, 1  ;;  %v955_v17 = vadd.f32 %v954_v26, %v953_v60  ;;  %v1000_v60 = vadd.f32 %v999_v53, %v998_v33 }
 0x128   :  { %v994_v18 = vadd.f32 %v993_v7, %v992_v1  ;;  %v984_v14 = vrot.slane %v983_v21, 1  ;;  %v963_v41 = vrot.slane %v962_v12, 1  ;;  %v972_v58 = vadd.f32 %v971_v45, %v970_v40 }
 0x129   :  { %v947_v9 = vadd.f32 %v946_v5, %v945_v0  ;;  %v956_v35 = vsel %vm940_vm11, 3.0, %v955_v17  ;;  %v1001_v0 = vrot.slane %v1000_v60, 1 }
 0x12a   :  { %v995_v34 = vsel %vm940_vm11, 1.0, %v994_v18  ;;  %v985_v42 = vadd.f32 %v984_v14, %v983_v21  ;;  %v964_v48 = vadd.f32 %v963_v41, %v962_v12  ;;  %v973_v62 = vsel %vm940_vm11, 3.0, %v972_v58 }
 0x12b   :  { %v948_v30 = vsel %vm939_vm10, -3.0, %v947_v9  ;;  %3402 = vrcp.f32 %v995_v34  ;;  %v1002_v26 = vadd.f32 %v1001_v0, %v1000_v60 }
 0x12c   :  { %v957_v38 = vsub.f32 %v956_v35, %v948_v30  ;;  %v986_v52 = vsel %vm939_vm10, 1.0, %v985_v42  ;;  %v965_v59 = vsel %vm939_vm10, -3.0, %v964_v48  ;;  %v1026_v18 = vsub.f32 %v3828_v50, %v948_v30 }
 0x12d   :  { %v974_v63 = vsub.f32 %v973_v62, %v965_v59  ;;  %v1013_v7 = vsub.f32 1.0, %v1002_v26  ;;  %v1012_v19 = vmul.f32 %v1002_v26, %v986_v52 }
 0x12e   :  { %3404 = vrcp.f32 %v957_v38 }
 0x12f   :  { %v1019_v48 = vmul.f32 %v1013_v7, %v965_v59 }
 0x135   :  { %v3403_v47 = vpop.eup %3402 }
 0x136   :  { %v1004_v56 = vmul.f32 %v3403_v47, %v986_v52 }
 0x138   :  { %3406 = vrsqrt.f32 %v1004_v56  ;;  %v3405_v61 = vpop.eup %3404  ;;  %vm1007_vm12 = vcmp.eq.f32.partialorder %v1004_v56, inf  ;;  %v1010_v6 = vand.u32 2147483648, %v1004_v56  ;;  %vm1009_vm13 = vcmp.eq.f32.partialorder %v1004_v56, 0.0 }
 0x139   :  { %v977_v57 = vmul.f32 %v3405_v61, %v974_v63  ;;  %v1027_v27 = vmul.f32 %v3405_v61, %v1026_v18 }
 0x13b   :  { %3408 = vrcp.f32 %v977_v57  ;;  %v1037_v12 = vsub.f32 1.0, %v1027_v27  ;;  %v1040_v14 = vsub.f32 %v1027_v27, %v1002_v26  ;;  %v1028_v39 = vsub.f32 %v1002_v26, %v1027_v27 }
 0x13c   :  { %vm1048_vm2 = vcmp.le.f32.partialorder %v1027_v27, %v1002_v26 }
 0x13d   :  { %v1029_v58 = vmul.f32 %v1028_v39, %v965_v59 }
 0x142   :  { %v3407_v1 = vpop.eup %3406 }
 0x143   :  { %v1006_v5 = vmul.f32 %v3407_v1, %v1004_v56 }
 0x145   :  { %v1008_v10 = vsel %vm1007_vm12, %v1004_v56, %v1006_v5  ;;  %v3409_v35 = vpop.eup %3408 }
 0x146   :  { %v1011_v9 = vsel %vm1009_vm13, %v1010_v6, %v1008_v10 }
 0x147   :  { %v1014_v11 = vmul.f32 %v1013_v7, %v1011_v9  ;;  %v1020_v17 = vmul.f32 %v1011_v9, %v1002_v26  ;;  %v1044_v42 = vmul.f32 %v1040_v14, %v1011_v9  ;;  %v1039_v53 = vmul.f32 %v1011_v9, %v973_v62 }
 0x149   :  { %v1015_v20 = vmul.f32 %v1014_v11, %v995_v34  ;;  %v1023_v21 = vadd.f32 %v1020_v17, %v1013_v7  ;;  %v1021_v33 = vmul.f32 %v1020_v17, %v973_v62  ;;  %v1041_v63 = vmul.f32 %v1040_v14, %v1039_v53  ;;  %v3906_v53 = vld [vmem:[%s4447_s5 + $0x8] sm:$0xff] }
 0x14b   :  { %v1016_v16 = vadd.f32 %v1015_v20, %v1012_v19  ;;  %3410 = vrcp.f32 %v1023_v21  ;;  %v1022_v30 = vadd.f32 %v1021_v33, %v1019_v48 }
 0x14d   :  { %v1018_v38 = vmul.f32 %v3409_v35, %v1016_v16 }
 0x14f   :  { %v1033_v40 = vmul.f32 %v1027_v27, %v1018_v38  ;;  %v1043_v41 = vmul.f32 %v1037_v12, %v1018_v38 }
 0x151   :  { %v1034_v45 = vadd.f32 %v1033_v40, %v1028_v39  ;;  %v1045_v47 = vadd.f32 %v1044_v42, %v1043_v41 }
 0x153   :  { %3412 = vrcp.f32 %v1034_v45 }
 0x154   :  { %3414 = vrcp.f32 %v1045_v47 }
 0x155   :  { %v3411_v34 = vpop.eup %3410 }
 0x156   :  { %v1025_v52 = vmul.f32 %v3411_v34, %v1022_v30 }
 0x158   :  { %v1030_v56 = vmul.f32 %v1025_v52, %v1018_v38 }
 0x15a   :  { %v1031_v60 = vmul.f32 %v1030_v56, %v1027_v27  ;;  %v1038_v61 = vmul.f32 %v1037_v12, %v1030_v56 }
 0x15c   :  { %v1032_v0 = vadd.f32 %v1031_v60, %v1029_v58  ;;  %v1042_v57 = vadd.f32 %v1041_v63, %v1038_v61  ;;  %v3911_v58 = vld [vmem:[%s4447_s5 + $0x10] sm:$0xff]  ;;  %v3921_v61 = vld [vmem:[%s4447_s5 + $0x18] sm:$0xff] }
 0x15d   :  { %v3413_v1 = vpop.eup %3412 }
 0x15e   :  { %v3415_v5 = vpop.eup %3414  ;;  %v1036_v6 = vmul.f32 %v3413_v1, %v1032_v0 }
 0x15f   :  { %v1047_v10 = vmul.f32 %v3415_v5, %v1042_v57 }
 0x161   :  { %v1049_v7 = vsel %vm1048_vm2, %v1036_v6, %v1047_v10 }
 0x162   :  { %v3884_v62 = vsel %vm1052_vm3, %v1049_v7, %v3828_v50 }
 0x163   :  { %v3888_v59 = vrot.slane %v3884_v62, %v3720_v25  ;;  %1595 = vst [vmem:[#allocation2 + $0x2] sm:$0x1] %v3884_v62  ;;  %vm1597_vm5 = vcmp.ge.f32.partialorder %v3884_v62, -2.999999  ;;  %vm1599_vm6 = vcmp.ge.f32.partialorder %v3884_v62, 3.000001 }
 0x164   :  { %v1598_v41 = vsel %vm1597_vm5, 1, %v3601_v2  ;;  %v1600_v42 = vsel %vm1599_vm6, 1, %v3601_v2  ;;  %vm1747_vm15 = vcmp.ge.f32.partialorder %v3884_v62, -3.0  ;;  %vm1748_vm2 = vcmp.le.f32.partialorder %v3884_v62, 3.0 }
 0x165   :  { %vm1606_vm4 = vcmp.ge.f32.partialorder %v3888_v59, %v3765_v55  ;;  %v1601_v48 = vadd.s32 %v1600_v42, %v1598_v41 }
 0x166   :  { %v1607_v9 = vsel %vm1606_vm4, 1, %v3601_v2  ;;  %vm1749_vm4 = vmand %vm1747_vm15, %vm1748_vm2 }
 0x167   :  { %v1608_v11 = vsel %vm84_vm1, %v1607_v9, 0 }
 0x168   :  { %v1609_v17 = vrot.slane %v1608_v11, 4 }
 0x16a   :  { %v1610_v50 = vadd.s32 %v1609_v17, %v1608_v11 }
 0x16c   :  { %v3176_v26 = vpop.f32.mrb[0].mxu0  ;;  %v1611_v27 = vrot.slane %v1610_v50, 2 }
 0x16d   :  { %v405_v18 = vadd.f32 %v3176_v26, %v3779_v4  ;;  %v399_v19 = vpop.f32.mrb[1].mxu0 }
 0x16e   :  { %v400_v20 = vadd.f32 %v399_v19, %v3753_v49  ;;  %v1612_v14 = vadd.s32 %v1611_v27, %v1610_v50 }
 0x16f   :  { %v419_v21 = vmax.f32 %v405_v18, 0.0 }
 0x170   :  { %v418_v16 = vmax.f32 %v400_v20, 0.0  ;;  %v3179_v35 = vpop.f32.mrb[2].mxu0  ;;  %v1613_v45 = vrot.slane %v1612_v14, 1 }
 0x171   :  { %v415_v38 = vadd.f32 %v3179_v35, %v3781_v8  ;;  %v409_v12 = vpop.f32.mrb[3].mxu0 }
 0x172   :  { %v410_v39 = vadd.f32 %v409_v12, %v3755_v51  ;;  %v3326_v40 = vpack.c.bf16 %v419_v21, %v418_v16  ;;  %v1614_v30 = vadd.s32 %v1613_v45, %v1612_v14 }
 0x173   :  { %v421_v33 = vmax.f32 %v415_v38, 0.0 }
 0x174   :  { %v420_v47 = vmax.f32 %v410_v39, 0.0  ;;  %3327 = vmatprep.subr.bf16.mxu1 %v3326_v40  ;;  %v1615_v52 = vadd.s32 %v1614_v30, %v1601_v48 }
 0x175   :  { %3329 = vmatpush3.bf16.msra.mxu1 %v3326_v40 }
 0x176   :  { %v3330_v34 = vpack.c.bf16 %v421_v33, %v420_v47  ;;  %v3046_v56 = vadd.s32 4294967295, %v1615_v52 }
 0x178   :  { %3331 = vmatprep.subr.bf16.mxu1 %v3330_v34  ;;  %vm1617_vm7 = vcmp.gt.s32.totalorder %v3046_v56, 0 }
 0x179   :  { %3333 = vmatpush3.bf16.msra.mxu1 %v3330_v34  ;;  %v1618_v60 = vsel %vm1617_vm7, %v3046_v56, 0 }
 0x17a   :  { %3199 = vmatprep.subr.mxu1 %v3602_v54  ;;  %vm1619_vm8 = vcmp.lt.s32.totalorder %v1618_v60, 7 }
 0x17b   :  { %v3923_v63 = vsel %vm1619_vm8, %v1618_v60, 7 }
 0x17c   :  { %3189 = vmatmul.mubr.msk.f32.vlgmr.msra.gmra.mrb[0].mxu1 %vm320_vm0, %v3906_v53  ;;  %v1624_v0 = vrot.slane %v3923_v63, %v3720_v25  ;;  %v3048_v57 = vadd.s32 4294967295, %v3923_v63  ;;  %vm1636_vm11 = vcmp.eq.s32.totalorder %v3923_v63, 0  ;;  %vm1637_vm12 = vcmp.eq.s32.totalorder %v3923_v63, 7 }
 0x17d   :  { %3191 = vmatprep.mubr.msk.f32.mxu1 %vm320_vm0, %v3911_v58 }
 0x17e   :  { %vm1625_vm9 = vcmp.eq.s32.totalorder %v3717_v24, %v1624_v0  ;;  %v1632_v1 = vrot.slane %v3048_v57, %v3720_v25 }
 0x17f   :  { %v3047_v5 = vsel %vm1625_vm9, 1.0, %v3602_v54 }
 0x180   :  { %3192 = vmatmul.mubr.msk.f32.gmra.mrb[2].mxu1 %vm320_vm0, %v3921_v61  ;;  %vm1633_vm10 = vcmp.eq.s32.totalorder %v3717_v24, %v1632_v1  ;;  %v1646_v6 = vmul.f32 %v3047_v5, %v3792_v15  ;;  %v1684_v10 = vmul.f32 %v3047_v5, %v3788_v13  ;;  %v1663_v35 = vmul.f32 %v3047_v5, %v3800_v22 }
 0x181   :  { %v3049_v7 = vsel %vm1633_vm10, 1.0, %v3602_v54 }
 0x182   :  { %v1638_v9 = vmul.f32 %v3049_v7, %v3792_v15  ;;  %v1647_v11 = vrot.slane %v1646_v6, 4  ;;  %v1675_v17 = vmul.f32 %v3049_v7, %v3788_v13  ;;  %v1685_v26 = vsel %vm84_vm1, %v1684_v10, 0.0 }
 0x183   :  { %v1655_v50 = vmul.f32 %v3049_v7, %v3800_v22  ;;  %v1686_v21 = vrot.slane %v1685_v26, 4  ;;  %v1664_v45 = vrot.slane %v1663_v35, 4  ;;  %v1693_v7 = vmul.f32 %v3047_v5, %v3807_v3 }
 0x184   :  { %v1639_v18 = vrot.slane %v1638_v9, 4  ;;  %v1648_v19 = vadd.f32 %v1647_v11, %v1646_v6  ;;  %v1676_v20 = vsel %vm84_vm1, %v1675_v17, 0.0 }
 0x185   :  { %v1677_v38 = vrot.slane %v1676_v20, 4  ;;  %v1687_v12 = vadd.f32 %v1686_v21, %v1685_v26  ;;  %v1656_v40 = vrot.slane %v1655_v50, 4  ;;  %v1665_v0 = vadd.f32 %v1664_v45, %v1663_v35 }
 0x186   :  { %v1640_v27 = vadd.f32 %v1639_v18, %v1638_v9  ;;  %v1649_v16 = vrot.slane %v1648_v19, 2 }
 0x187   :  { %v1678_v41 = vadd.f32 %v1677_v38, %v1676_v20  ;;  %v1688_v42 = vrot.slane %v1687_v12, 2  ;;  %v1657_v34 = vadd.f32 %v1656_v40, %v1655_v50  ;;  %v1666_v17 = vrot.slane %v1665_v0, 2 }
 0x188   :  { %v1641_v14 = vrot.slane %v1640_v27, 2  ;;  %v1650_v39 = vadd.f32 %v1649_v16, %v1648_v19  ;;  %v1694_v20 = vrot.slane %v1693_v7, 4 }
 0x189   :  { %v1689_v48 = vadd.f32 %v1688_v42, %v1687_v12  ;;  %v1679_v52 = vrot.slane %v1678_v41, 2  ;;  %v1658_v6 = vrot.slane %v1657_v34, 2  ;;  %v1667_v21 = vadd.f32 %v1666_v17, %v1665_v0 }
 0x18a   :  { %v1642_v33 = vadd.f32 %v1641_v14, %v1640_v27  ;;  %v1651_v47 = vrot.slane %v1650_v39, 1  ;;  %v1695_v5 = vadd.f32 %v1694_v20, %v1693_v7 }
 0x18b   :  { %v1690_v56 = vrot.slane %v1689_v48, 1  ;;  %v1680_v10 = vadd.f32 %v1679_v52, %v1678_v41  ;;  %v1659_v19 = vadd.f32 %v1658_v6, %v1657_v34  ;;  %v1668_v35 = vrot.slane %v1667_v21, 1 }
 0x18c   :  { %v1643_v30 = vrot.slane %v1642_v33, 1  ;;  %v1652_v57 = vadd.f32 %v1651_v47, %v1650_v39  ;;  %v1696_v39 = vrot.slane %v1695_v5, 2 }
 0x18d   :  { %v1691_v1 = vadd.f32 %v1690_v56, %v1689_v48  ;;  %v1681_v50 = vrot.slane %v1680_v10, 1  ;;  %v1660_v27 = vrot.slane %v1659_v19, 1  ;;  %v1669_v41 = vadd.f32 %v1668_v35, %v1667_v21 }
 0x18e   :  { %v1644_v60 = vadd.f32 %v1643_v30, %v1642_v33  ;;  %v1653_v26 = vsel %vm1637_vm12, 3.0, %v1652_v57  ;;  %v1697_v33 = vadd.f32 %v1696_v39, %v1695_v5 }
 0x18f   :  { %v1692_v11 = vsel %vm1637_vm12, 1.0, %v1691_v1  ;;  %v1682_v16 = vadd.f32 %v1681_v50, %v1680_v10  ;;  %v1661_v12 = vadd.f32 %v1660_v27, %v1659_v19  ;;  %v1670_v47 = vsel %vm1637_vm12, 3.0, %v1669_v41 }
 0x190   :  { %v1645_v9 = vsel %vm1636_vm11, -3.0, %v1644_v60  ;;  %3416 = vrcp.f32 %v1692_v11  ;;  %v1698_v30 = vrot.slane %v1697_v33, 1 }
 0x191   :  { %v1654_v18 = vsub.f32 %v1653_v26, %v1645_v9  ;;  %v1683_v14 = vsel %vm1636_vm11, 1.0, %v1682_v16  ;;  %v1662_v42 = vsel %vm1636_vm11, -3.0, %v1661_v12  ;;  %v1723_v17 = vsub.f32 %v3884_v62, %v1645_v9 }
 0x192   :  { %v1671_v48 = vsub.f32 %v1670_v47, %v1662_v42  ;;  %v1699_v52 = vadd.f32 %v1698_v30, %v1697_v33 }
 0x193   :  { %3418 = vrcp.f32 %v1654_v18 }
 0x194   :  { %v1710_v1 = vsub.f32 1.0, %v1699_v52  ;;  %v1709_v26 = vmul.f32 %v1699_v52, %v1683_v14 }
 0x196   :  { %v1716_v33 = vmul.f32 %v1710_v1, %v1662_v42 }
 0x19a   :  { %v3417_v38 = vpop.eup %3416 }
 0x19b   :  { %v1701_v40 = vmul.f32 %v3417_v38, %v1683_v14 }
 0x19d   :  { %3420 = vrsqrt.f32 %v1701_v40  ;;  %v3419_v45 = vpop.eup %3418  ;;  %vm1704_vm13 = vcmp.eq.f32.partialorder %v1701_v40, inf  ;;  %v1707_v0 = vand.u32 2147483648, %v1701_v40  ;;  %vm1706_vm14 = vcmp.eq.f32.partialorder %v1701_v40, 0.0 }
 0x19e   :  { %v1674_v34 = vmul.f32 %v3419_v45, %v1671_v48  ;;  %v1724_v19 = vmul.f32 %v3419_v45, %v1723_v17 }
 0x1a0   :  { %3422 = vrcp.f32 %v1674_v34  ;;  %v1734_v27 = vsub.f32 1.0, %v1724_v19  ;;  %v1737_v16 = vsub.f32 %v1724_v19, %v1699_v52  ;;  %v1725_v5 = vsub.f32 %v1699_v52, %v1724_v19 }
 0x1a1   :  { %vm1745_vm3 = vcmp.le.f32.partialorder %v1724_v19, %v1699_v52 }
 0x1a2   :  { %v1726_v30 = vmul.f32 %v1725_v5, %v1662_v42 }
 0x1a7   :  { %v3421_v56 = vpop.eup %3420 }
 0x1a8   :  { %v1703_v60 = vmul.f32 %v3421_v56, %v1701_v40 }
 0x1aa   :  { %v1705_v57 = vsel %vm1704_vm13, %v1701_v40, %v1703_v60  ;;  %v3423_v20 = vpop.eup %3422 }
 0x1ab   :  { %v1708_v6 = vsel %vm1706_vm14, %v1707_v0, %v1705_v57  ;;  %vm3603_vm14 = vmmov 0  }
 0x1ac   :  { %v1711_v10 = vmul.f32 %v1710_v1, %v1708_v6  ;;  %v1717_v7 = vmul.f32 %v1708_v6, %v1699_v52  ;;  %v1741_v12 = vmul.f32 %v1737_v16, %v1708_v6  ;;  %v1736_v45 = vmul.f32 %v1708_v6, %v1670_v47  ;;  %3196 = vmatprep.mubr.msk.f32.mxu0 %vm3603_vm14, %v3602_v54 }
 0x1ad   :  { %3201 = vmatprep.mubr.msk.f32.mxu1 %vm3603_vm14, %v3602_v54 }
 0x1ae   :  { %v1712_v63 = vmul.f32 %v1711_v10, %v1692_v11  ;;  %v1720_v18 = vadd.f32 %v1717_v7, %v1710_v1  ;;  %v1718_v39 = vmul.f32 %v1717_v7, %v1670_v47  ;;  %v1738_v60 = vmul.f32 %v1737_v16, %v1736_v45 }
 0x1b0   :  { %v1713_v50 = vadd.f32 %v1712_v63, %v1709_v26  ;;  %3424 = vrcp.f32 %v1720_v18  ;;  %v1719_v9 = vadd.f32 %v1718_v39, %v1716_v33 }
 0x1b2   :  { %v1715_v21 = vmul.f32 %v3423_v20, %v1713_v50 }
 0x1b4   :  { %v1730_v35 = vmul.f32 %v1724_v19, %v1715_v21  ;;  %v1740_v38 = vmul.f32 %v1734_v27, %v1715_v21 }
 0x1b6   :  { %v1731_v40 = vadd.f32 %v1730_v35, %v1725_v5  ;;  %v1742_v41 = vadd.f32 %v1741_v12, %v1740_v38 }
 0x1b8   :  { %3426 = vrcp.f32 %v1731_v40 }
 0x1b9   :  { %3428 = vrcp.f32 %v1742_v41 }
 0x1ba   :  { %v3425_v11 = vpop.eup %3424 }
 0x1bb   :  { %v1722_v14 = vmul.f32 %v3425_v11, %v1719_v9 }
 0x1bd   :  { %v1727_v48 = vmul.f32 %v1722_v14, %v1715_v21 }
 0x1bf   :  { %v1728_v34 = vmul.f32 %v1727_v48, %v1724_v19  ;;  %v1735_v56 = vmul.f32 %v1734_v27, %v1727_v48 }
 0x1c1   :  { %v1729_v0 = vadd.f32 %v1728_v34, %v1726_v30  ;;  %v1739_v57 = vadd.f32 %v1738_v60, %v1735_v56 }
 0x1c2   :  { %v3427_v10 = vpop.eup %3426 }
 0x1c3   :  { %v3429_v17 = vpop.eup %3428  ;;  %v1733_v26 = vmul.f32 %v3427_v10, %v1729_v0 }
 0x1c4   :  { %v1744_v1 = vmul.f32 %v3429_v17, %v1739_v57 }
 0x1c6   :  { %v1746_v7 = vsel %vm1745_vm3, %v1733_v26, %v1744_v1 }
 0x1c7   :  { %v3962_v47 = vsel %vm1749_vm4, %v1746_v7, %v3884_v62 }
 0x1c8   :  { %v3966_v42 = vrot.slane %v3962_v47, %v3720_v25  ;;  %2292 = vst [vmem:[#allocation2 + $0x4] sm:$0x1] %v3962_v47  ;;  %vm2294_vm6 = vcmp.ge.f32.partialorder %v3962_v47, -2.999999  ;;  %vm2296_vm7 = vcmp.ge.f32.partialorder %v3962_v47, 3.000001 }
 0x1c9   :  { %v2295_v50 = vsel %vm2294_vm6, 1, %v3601_v2  ;;  %v2297_v20 = vsel %vm2296_vm7, 1, %v3601_v2  ;;  %vm2444_vm3 = vcmp.ge.f32.partialorder %v3962_v47, -3.0  ;;  %vm2445_vm4 = vcmp.le.f32.partialorder %v3962_v47, 3.0 }
 0x1ca   :  { %vm2303_vm5 = vcmp.ge.f32.partialorder %v3966_v42, %v3765_v55  ;;  %v2298_v27 = vadd.s32 %v2297_v20, %v2295_v50  ;;  %vm2446_vm6 = vmand %vm2444_vm3, %vm2445_vm4 }
 0x1cb   :  { %v2304_v6 = vsel %vm2303_vm5, 1, %v3601_v2 }
 0x1cc   :  { %v2305_v63 = vsel %vm84_vm1, %v2304_v6, 0 }
 0x1cd   :  { %v2306_v18 = vrot.slane %v2305_v63, 4 }
 0x1cf   :  { %v2307_v52 = vadd.s32 %v2306_v18, %v2305_v63 }
 0x1d1   :  { %v2308_v62 = vrot.slane %v2307_v52, 2 }
 0x1d3   :  { %v2309_v19 = vadd.s32 %v2308_v62, %v2307_v52 }
 0x1d5   :  { %v2310_v21 = vrot.slane %v2309_v19, 1 }
 0x1d7   :  { %v2311_v16 = vadd.s32 %v2310_v21, %v2309_v19 }
 0x1d9   :  { %v2312_v55 = vadd.s32 %v2311_v16, %v2298_v27 }
 0x1db   :  { %v3066_v5 = vadd.s32 4294967295, %v2312_v55 }
 0x1dd   :  { %vm2314_vm8 = vcmp.gt.s32.totalorder %v3066_v5, 0 }
 0x1de   :  { %v2315_v35 = vsel %vm2314_vm8, %v3066_v5, 0  ;;  %vm577_vm8 = vcmask 64512  }
 0x1df   :  { %vm2316_vm9 = vcmp.lt.s32.totalorder %v2315_v35, 7 }
 0x1e0   :  { %v3977_v38 = vsel %vm2316_vm9, %v2315_v35, 7 }
 0x1e1   :  { %v2321_v12 = vrot.slane %v3977_v38, %v3720_v25  ;;  %v3068_v39 = vadd.s32 4294967295, %v3977_v38  ;;  %vm2333_vm12 = vcmp.eq.s32.totalorder %v3977_v38, 0  ;;  %vm2334_vm13 = vcmp.eq.s32.totalorder %v3977_v38, 7 }
 0x1e3   :  { %vm2322_vm10 = vcmp.eq.s32.totalorder %v3717_v24, %v2321_v12  ;;  %v2329_v40 = vrot.slane %v3068_v39, %v3720_v25 }
 0x1e4   :  { %v3067_v41 = vsel %vm2322_vm10, 1.0, %v3602_v54 }
 0x1e5   :  { %vm2330_vm11 = vcmp.eq.s32.totalorder %v3717_v24, %v2329_v40  ;;  %v2343_v33 = vmul.f32 %v3067_v41, %v3792_v15  ;;  %v2381_v9 = vmul.f32 %v3067_v41, %v3788_v13  ;;  %v2360_v26 = vmul.f32 %v3067_v41, %v3800_v22 }
 0x1e6   :  { %v3069_v11 = vsel %vm2330_vm11, 1.0, %v3602_v54  ;;  %v2390_v40 = vmul.f32 %v3067_v41, %v3807_v3 }
 0x1e7   :  { %v2335_v14 = vmul.f32 %v3069_v11, %v3792_v15  ;;  %v2344_v45 = vrot.slane %v2343_v33, 4  ;;  %v2372_v48 = vmul.f32 %v3069_v11, %v3788_v13  ;;  %v2382_v30 = vsel %vm84_vm1, %v2381_v9, 0.0 }
 0x1e8   :  { %v2352_v60 = vmul.f32 %v3069_v11, %v3800_v22  ;;  %v2383_v57 = vrot.slane %v2382_v30, 4  ;;  %v2361_v62 = vrot.slane %v2360_v26, 4 }
 0x1e9   :  { %v2336_v34 = vrot.slane %v2335_v14, 4  ;;  %v2345_v56 = vadd.f32 %v2344_v45, %v2343_v33  ;;  %v2373_v0 = vsel %vm84_vm1, %v2372_v48, 0.0 }
 0x1ea   :  { %v2374_v1 = vrot.slane %v2373_v0, 4  ;;  %v2384_v7 = vadd.f32 %v2383_v57, %v2382_v30  ;;  %v2353_v63 = vrot.slane %v2352_v60, 4  ;;  %v2362_v5 = vadd.f32 %v2361_v62, %v2360_v26 }
 0x1eb   :  { %v2337_v10 = vadd.f32 %v2336_v34, %v2335_v14  ;;  %v2346_v17 = vrot.slane %v2345_v56, 2  ;;  %v2391_v34 = vrot.slane %v2390_v40, 4 }
 0x1ec   :  { %v2375_v18 = vadd.f32 %v2374_v1, %v2373_v0  ;;  %v2385_v13 = vrot.slane %v2384_v7, 2  ;;  %v2354_v21 = vadd.f32 %v2353_v63, %v2352_v60  ;;  %v2363_v11 = vrot.slane %v2362_v5, 2 }
 0x1ed   :  { %v2338_v6 = vrot.slane %v2337_v10, 2  ;;  %v2347_v15 = vadd.f32 %v2346_v17, %v2345_v56  ;;  %v2392_v3 = vadd.f32 %v2391_v34, %v2390_v40 }
 0x1ee   :  { %v2386_v50 = vadd.f32 %v2385_v13, %v2384_v7  ;;  %v2376_v27 = vrot.slane %v2375_v18, 2  ;;  %v2355_v12 = vrot.slane %v2354_v21, 2  ;;  %v2364_v56 = vadd.f32 %v2363_v11, %v2362_v5 }
 0x1ef   :  { %v2339_v52 = vadd.f32 %v2338_v6, %v2337_v10  ;;  %v2348_v19 = vrot.slane %v2347_v15, 1  ;;  %v2393_v26 = vrot.slane %v2392_v3, 2 }
 0x1f0   :  { %v2387_v16 = vrot.slane %v2386_v50, 1  ;;  %v2377_v39 = vadd.f32 %v2376_v27, %v2375_v18  ;;  %v2356_v48 = vadd.f32 %v2355_v12, %v2354_v21  ;;  %v2365_v41 = vrot.slane %v2364_v56, 1 }
 0x1f1   :  { %v2340_v20 = vrot.slane %v2339_v52, 1  ;;  %v2349_v22 = vadd.f32 %v2348_v19, %v2347_v15  ;;  %v2394_v15 = vadd.f32 %v2393_v26, %v2392_v3 }
 0x1f2   :  { %v2388_v35 = vadd.f32 %v2387_v16, %v2386_v50  ;;  %v2378_v30 = vrot.slane %v2377_v39, 1  ;;  %v2357_v60 = vrot.slane %v2356_v48, 1  ;;  %v2366_v7 = vadd.f32 %v2365_v41, %v2364_v56 }
 0x1f3   :  { %v2341_v55 = vadd.f32 %v2340_v20, %v2339_v52  ;;  %v2350_v14 = vsel %vm2334_vm13, 3.0, %v2349_v22  ;;  %v2395_v52 = vrot.slane %v2394_v15, 1 }
 0x1f4   :  { %v2389_v9 = vsel %vm2334_vm13, 1.0, %v2388_v35  ;;  %v2379_v0 = vadd.f32 %v2378_v30, %v2377_v39  ;;  %v2358_v10 = vadd.f32 %v2357_v60, %v2356_v48  ;;  %v2367_v18 = vsel %vm2334_vm13, 3.0, %v2366_v7 }
 0x1f5   :  { %v2342_v33 = vsel %vm2333_vm12, -3.0, %v2341_v55  ;;  %3430 = vrcp.f32 %v2389_v9  ;;  %v2396_v19 = vadd.f32 %v2395_v52, %v2394_v15 }
 0x1f6   :  { %v2351_v45 = vsub.f32 %v2350_v14, %v2342_v33  ;;  %v2380_v17 = vsel %vm2333_vm12, 1.0, %v2379_v0  ;;  %v2359_v6 = vsel %vm2333_vm12, -3.0, %v2358_v10  ;;  %v2420_v22 = vsub.f32 %v3962_v47, %v2342_v33 }
 0x1f7   :  { %v2368_v13 = vsub.f32 %v2367_v18, %v2359_v6  ;;  %v2407_v38 = vsub.f32 1.0, %v2396_v19  ;;  %v2406_v35 = vmul.f32 %v2396_v19, %v2380_v17 }
 0x1f8   :  { %3432 = vrcp.f32 %v2351_v45 }
 0x1f9   :  { %v2413_v10 = vmul.f32 %v2407_v38, %v2359_v6 }
 0x1ff   :  { %v3431_v57 = vpop.eup %3430 }
 0x200   :  { %v2398_v1 = vmul.f32 %v3431_v57, %v2380_v17 }
 0x202   :  { %3434 = vrsqrt.f32 %v2398_v1  ;;  %v3433_v63 = vpop.eup %3432  ;;  %vm2401_vm15 = vcmp.eq.f32.partialorder %v2398_v1, inf  ;;  %v2404_v21 = vand.u32 2147483648, %v2398_v1  ;;  %vm2403_vm2 = vcmp.eq.f32.partialorder %v2398_v1, 0.0 }
 0x203   :  { %v2371_v62 = vmul.f32 %v3433_v63, %v2368_v13  ;;  %v2421_v40 = vmul.f32 %v3433_v63, %v2420_v22 }
 0x205   :  { %3436 = vrcp.f32 %v2371_v62  ;;  %v2431_v48 = vsub.f32 1.0, %v2421_v40  ;;  %v2434_v30 = vsub.f32 %v2421_v40, %v2396_v19  ;;  %v2422_v34 = vsub.f32 %v2396_v19, %v2421_v40 }
 0x206   :  { %vm2442_vm5 = vcmp.le.f32.partialorder %v2421_v40, %v2396_v19 }
 0x207   :  { %v2423_v7 = vmul.f32 %v2422_v34, %v2359_v6  ;;  %v4018_v6 = vpop.permute.xlu0 %424 }
 0x20c   :  { %v3435_v50 = vpop.eup %3434 }
 0x20d   :  { %v2400_v20 = vmul.f32 %v3435_v50, %v2398_v1 }
 0x20f   :  { %v2402_v27 = vsel %vm2401_vm15, %v2398_v1, %v2400_v20  ;;  %v3437_v14 = vpop.eup %3436 }
 0x210   :  { %v2405_v16 = vsel %vm2403_vm2, %v2404_v21, %v2402_v27 }
 0x211   :  { %v2408_v55 = vmul.f32 %v2407_v38, %v2405_v16  ;;  %v2414_v5 = vmul.f32 %v2405_v16, %v2396_v19  ;;  %v2438_v0 = vmul.f32 %v2434_v30, %v2405_v16  ;;  %v2433_v26 = vmul.f32 %v2405_v16, %v2367_v18  ;;  %v4020_v16 = vpop.permute.xlu0 %429 }
 0x213   :  { %v2409_v12 = vmul.f32 %v2408_v55, %v2389_v9  ;;  %v2417_v39 = vadd.f32 %v2414_v5, %v2407_v38  ;;  %v2415_v3 = vmul.f32 %v2414_v5, %v2367_v18  ;;  %v2435_v13 = vmul.f32 %v2434_v30, %v2433_v26 }
 0x215   :  { %v2410_v11 = vadd.f32 %v2409_v12, %v2406_v35  ;;  %3438 = vrcp.f32 %v2417_v39  ;;  %v2416_v33 = vadd.f32 %v2415_v3, %v2413_v10 }
 0x217   :  { %v2412_v45 = vmul.f32 %v3437_v14, %v2410_v11 }
 0x219   :  { %v2427_v56 = vmul.f32 %v2421_v40, %v2412_v45  ;;  %v2437_v60 = vmul.f32 %v2431_v48, %v2412_v45 }
 0x21b   :  { %v2428_v41 = vadd.f32 %v2427_v56, %v2422_v34  ;;  %v2439_v57 = vadd.f32 %v2438_v0, %v2437_v60 }
 0x21d   :  { %3440 = vrcp.f32 %v2428_v41 }
 0x21e   :  { %3442 = vrcp.f32 %v2439_v57 }
 0x21f   :  { %v3439_v9 = vpop.eup %3438 }
 0x220   :  { %v2419_v17 = vmul.f32 %v3439_v9, %v2416_v33 }
 0x222   :  { %v2424_v1 = vmul.f32 %v2419_v17, %v2412_v45 }
 0x224   :  { %v2425_v15 = vmul.f32 %v2424_v1, %v2421_v40  ;;  %v2432_v63 = vmul.f32 %v2431_v48, %v2424_v1 }
 0x226   :  { %v2426_v52 = vadd.f32 %v2425_v15, %v2423_v7  ;;  %v2436_v62 = vadd.f32 %v2435_v13, %v2432_v63 }
 0x227   :  { %v3441_v50 = vpop.eup %3440 }
 0x228   :  { %v3443_v20 = vpop.eup %3442  ;;  %v2430_v21 = vmul.f32 %v3441_v50, %v2426_v52 }
 0x229   :  { %v2441_v27 = vmul.f32 %v3443_v20, %v2436_v62 }
 0x22b   :  { %v2443_v38 = vsel %vm2442_vm5, %v2430_v21, %v2441_v27  ;;  %v1054_v27 = vmul.f32 %v3832_v46, %v3731_v29 }
 0x22c   :  { %v2447_v18 = vsel %vm2446_vm6, %v2443_v38, %v3962_v47  ;;  %v1055_v38 = vmul.f32 %v3832_v46, %v3736_v32 }
 0x22d   :  { %2989 = vst [vmem:[#allocation2 + $0x6] sm:$0x1] %v2447_v18  ;;  %v1056_v18 = vmul.f32 %v3832_v46, %v3743_v37 }
 0x24f   :  { %v3190_v55 = vpop.f32.mrb[0].mxu1 }
 0x250   :  { %v526_v5 = vadd.f32 %v3190_v55, %v4020_v16  ;;  %v520_v22 = vpop.f32.mrb[1].mxu1  ;;  %v1057_v55 = vmul.f32 %v3832_v46, %v3741_v36 }
 0x251   :  { %v521_v35 = vadd.f32 %v520_v22, %v4018_v6  ;;  %v1058_v22 = vadd.f32 %v1054_v27, %v3729_v28  ;;  %v4101_v27 = vld [vmem:[%s4442_s0 + $0x1] sm:$0x1] }
 0x252   :  { %v558_v12 = vrot.slane %v526_v5, 4  ;;  %vm743_vm10 = vcmp.ge.f32.partialorder %v4101_v27, -2.999999  ;;  %vm745_vm11 = vcmp.ge.f32.partialorder %v4101_v27, 3.000001 }
 0x253   :  { %v539_v39 = vrot.slane %v521_v35, 4  ;;  %v4024_v11 = vpop.f32.mrb[2].mxu1 }
 0x254   :  { %v559_v19 = vmax.f32 %v526_v5, %v558_v12  ;;  %v4026_v40 = vpop.f32.mrb[3].mxu1 }
 0x255   :  { %v540_v14 = vmax.f32 %v521_v35, %v539_v39 }
 0x256   :  { %v560_v47 = vrot.slane %v559_v19, 2 }
 0x257   :  { %v541_v45 = vrot.slane %v540_v14, 2 }
 0x258   :  { %v561_v48 = vmax.f32 %v559_v19, %v560_v47  ;;  %v1061_v47 = vadd.f32 %v1057_v55, %v3747_v43 }
 0x259   :  { %v542_v30 = vmax.f32 %v540_v14, %v541_v45  ;;  %v1060_v14 = vadd.f32 %v1056_v18, %v3749_v44 }
 0x25a   :  { %v562_v34 = vrot.slane %v561_v48, 1 }
 0x25b   :  { %v543_v56 = vrot.slane %v542_v30, 1 }
 0x25c   :  { %v563_v60 = vmax.f32 %v561_v48, %v562_v34 }
 0x25d   :  { %v544_v0 = vmax.f32 %v542_v30, %v543_v56  ;;  %v1062_v30 = vmax.f32 %v1058_v22, 0.0 }
 0x25e   :  { %v564_v3 = vsub.f32 %v526_v5, %v563_v60  ;;  %v63_v5 = vand.u32 127, %v60_v23  ;;  %v1064_v23 = vmax.f32 %v1060_v14, 0.0  ;;  %v1065_v60 = vmax.f32 %v1061_v47, 0.0 }
 0x25f   :  { %v545_v41 = vsub.f32 %v521_v35, %v544_v0  ;;  %v1059_v35 = vadd.f32 %v1055_v38, %v3734_v31 }
 0x260   :  { %v565_v57 = vmul.f32 1.442695, %v564_v3  ;;  %vm64_vm7 = vcmp.le.s32.totalorder %v63_v5, %v3717_v24 }
 0x261   :  { %v546_v10 = vmul.f32 1.442695, %v545_v41  ;;  %v1063_v34 = vmax.f32 %v1059_v35, 0.0  ;;  %v4043_v3 = vsel %vm64_vm7, 1.0, %v3602_v54 }
 0x262   :  { %3444 = vpow2.f32 %v565_v57  ;;  %v3338_v57 = vpack.c.bf16 %v1065_v60, %v1064_v23 }
 0x263   :  { %3446 = vpow2.f32 %v546_v10  ;;  %v3334_v41 = vpack.c.bf16 %v1063_v34, %v1062_v30  ;;  %v4052_v10 = vld [vmem:[%s4445_s3] sm:$0xff] }
 0x26c   :  { %v3445_v33 = vpop.eup %3444 }
 0x26d   :  { %v3447_v9 = vpop.eup %3446  ;;  %v567_v17 = vrot.slane %v3445_v33, 4 }
 0x26e   :  { %v548_v26 = vrot.slane %v3447_v9, 4 }
 0x26f   :  { %v568_v1 = vadd.f32 %v3445_v33, %v567_v17  ;;  %v4074_v17 = vld [vmem:[%s4445_s3 + $0x10] sm:$0xff] }
 0x270   :  { %v549_v7 = vadd.f32 %v3447_v9, %v548_v26  ;;  %v4081_v26 = vld [vmem:[%s4445_s3 + $0x18] sm:$0xff] }
 0x271   :  { %v569_v15 = vrot.slane %v568_v1, 2 }
 0x272   :  { %v550_v63 = vrot.slane %v549_v7, 2 }
 0x273   :  { %v570_v13 = vadd.f32 %v569_v15, %v568_v1  ;;  %v4087_v1 = vpop.permute.xlu1 %434 }
 0x274   :  { %v551_v52 = vadd.f32 %v550_v63, %v549_v7  ;;  %v4091_v7 = vadd.f32 %v4026_v40, %v4087_v1  ;;  %v4094_v63 = vpop.permute.xlu0 %439 }
 0x275   :  { %v571_v62 = vrot.slane %v570_v13, 1 }
 0x276   :  { %v552_v50 = vrot.slane %v551_v52, 1  ;;  %v726_v15 = vand.u32 2147483647, %v4091_v7 }
 0x277   :  { %v572_v20 = vadd.f32 %v571_v62, %v570_v13  ;;  %v536_v13 = vadd.f32 %v4024_v11, %v4094_v63  ;;  %v752_v11 = vrot.slane %v4101_v27, %v3720_v25 }
 0x278   :  { %v553_v21 = vadd.f32 %v552_v50, %v551_v52  ;;  %v727_v52 = vsub.f32 0.0, %v726_v15 }
 0x279   :  { %3448 = vrcp.f32 %v572_v20  ;;  %v735_v62 = vsub.f32 0.0, %v536_v13 }
 0x27a   :  { %3450 = vrcp.f32 %v553_v21  ;;  %v728_v50 = vmul.f32 1.442695, %v727_v52 }
 0x27b   :  { %v736_v20 = vmul.f32 1.442695, %v735_v62  ;;  %v744_v62 = vsel %vm743_vm10, 1, %v3601_v2  ;;  %vm895_vm10 = vcmp.le.f32.partialorder %v4101_v27, 3.0 }
 0x27c   :  { %3452 = vpow2.f32 %v728_v50  ;;  %v746_v50 = vsel %vm745_vm11, 1, %v3601_v2 }
 0x27d   :  { %3454 = vpow2.f32 %v736_v20 }
 0x283   :  { %v3449_v12 = vpop.eup %3448 }
 0x284   :  { %v3451_v39 = vpop.eup %3450  ;;  %v574_v19 = vmul.f32 %v3449_v12, %v3445_v33  ;;  %v4059_v33 = vld [vmem:[%s4447_s5] sm:$0xff] }
 0x285   :  { %v555_v45 = vmul.f32 %v3451_v39, %v3447_v9  ;;  %v4067_v9 = vld [vmem:[%s4445_s3 + $0x8] sm:$0xff] }
 0x286   :  { %v575_v48 = vmul.f32 0.992, %v574_v19  ;;  %v3453_v22 = vpop.eup %3452 }
 0x287   :  { %v556_v46 = vmul.f32 0.992, %v555_v45  ;;  %v730_v12 = vadd.f32 1.0, %v3453_v22  ;;  %v3455_v39 = vpop.eup %3454 }
 0x288   :  { %v576_v56 = vadd.f32 0.001, %v575_v48 }
 0x289   :  { %v557_v0 = vadd.f32 0.001, %v556_v46  ;;  %v738_v46 = vadd.f32 1.0, %v3455_v39  ;;  %3456 = vlog2.f32 %v730_v12 }
 0x28a   :  { %3200 = vmatpush3.msra.mxu1 %v576_v56 }
 0x28b   :  { %3195 = vmatpush3.msra.mxu0 %v557_v0  ;;  %3202 = vmatmul.mubr.msk.f32.vlgmr.msra.gmra.mrb[4].mxu1 %vm577_vm8, %v4043_v3  ;;  %3458 = vrcp.f32 %v738_v46 }
 0x28c   :  { %3197 = vmatmul.mubr.msk.f32.vlgmr.msra.gmra.mrb[4].mxu0 %vm577_vm8, %v4043_v3  ;;  %3335 = vmatprep.subr.bf16.mxu0 %v3334_v41 }
 0x28d   :  { %3337 = vmatpush3.bf16.msra.mxu0 %v3334_v41  ;;  %3212 = vmatprep.mubr.msk.f32.mxu0 %vm320_vm0, %v4052_v10 }
 0x28e   :  { %3339 = vmatprep.subr.bf16.mxu0 %v3338_v57  ;;  %3226 = vmatprep.mubr.msk.f32.mxu1 %vm320_vm0, %v4059_v33 }
 0x291   :  { %3341 = vmatpush3.bf16.msra.mxu0 %v3338_v57 }
 0x292   :  { %3232 = vmatprep.subr.mxu0 %v3602_v54 }
 0x294   :  { %3213 = vmatmul.mubr.msk.f32.vlgmr.msra.gmra.mrb[6].mxu0 %vm320_vm0, %v4067_v9 }
 0x295   :  { %3215 = vmatprep.mubr.msk.f32.mxu0 %vm320_vm0, %v4074_v17 }
 0x298   :  { %3216 = vmatmul.mubr.msk.f32.gmra.mrb[8].mxu0 %vm320_vm0, %v4081_v26 }
 0x299   :  { %3234 = vmatprep.mubr.msk.f32.mxu0 %vm3603_vm14, %v3602_v54 }
 0x35e   :  { %v717_v21 = vpop.f32.mrb[4].mxu1 }
 0x35f   :  { %v647_v40 = vpop.f32.mrb[4].mxu0  ;;  %v3203_v38 = vpop.f32.mrb[5].mxu1 }
 0x360   :  { %v721_v18 = vmul.f32 6.0, %v647_v40  ;;  %v3198_v55 = vpop.f32.mrb[5].mxu0 }
 0x362   :  { %v4103_v5 = vadd.f32 -3.0, %v721_v18  ;;  %v747_v18 = vadd.s32 %v746_v50, %v744_v62 }
 0x364   :  { %v748_v35 = vadd.f32 1e-06, %v4103_v5 }
 0x366   :  { %vm753_vm9 = vcmp.ge.f32.partialorder %v752_v11, %v748_v35  ;;  %v3457_v35 = vpop.eup %3456 }
 0x367   :  { %v754_v19 = vsel %vm753_vm9, 1, %v3601_v2  ;;  %v3214_v14 = vpop.f32.mrb[6].mxu0  ;;  %v732_v39 = vmul.f32 0.6931472, %v3457_v35  ;;  %vm894_vm9 = vcmp.ge.f32.partialorder %v4101_v27, -3.0 }
 0x368   :  { %v755_v47 = vsel %vm84_vm1, %v754_v19, 0  ;;  %v1138_v45 = vadd.f32 %v3214_v14, %v3779_v4  ;;  %v1132_v48 = vpop.f32.mrb[7].mxu0  ;;  %v3459_v14 = vpop.eup %3458  ;;  %vm896_vm11 = vmand %vm894_vm9, %vm895_vm10 }
 0x369   :  { %v756_v30 = vrot.slane %v755_v47, 4  ;;  %v1133_v34 = vadd.f32 %v1132_v48, %v3753_v49  ;;  %v723_v48 = vmul.f32 6.0, %v717_v21 }
 0x36a   :  { %v1152_v56 = vmax.f32 %v1138_v45, 0.0 }
 0x36b   :  { %v757_v23 = vadd.s32 %v756_v30, %v755_v47  ;;  %v1151_v60 = vmax.f32 %v1133_v34, 0.0  ;;  %v3217_v0 = vpop.f32.mrb[8].mxu0  ;;  %v725_v47 = vmax.f32 %v4091_v7, 0.0  ;;  %v741_v30 = vmul.f32 0.95, %v3459_v14 }
 0x36c   :  { %v1148_v41 = vadd.f32 %v3217_v0, %v3781_v8  ;;  %v1142_v57 = vpop.f32.mrb[9].mxu0  ;;  %v3021_v7 = vadd.f32 -3.0, %v723_v48 }
 0x36d   :  { %v758_v15 = vrot.slane %v757_v23, 2  ;;  %v3342_v13 = vpack.c.bf16 %v1152_v56, %v1151_v60  ;;  %v1143_v52 = vadd.f32 %v1142_v57, %v3755_v51  ;;  %v733_v34 = vadd.f32 %v732_v39, %v725_v47 }
 0x36e   :  { %v1154_v20 = vmax.f32 %v1148_v41, 0.0  ;;  %v742_v56 = vadd.f32 0.025, %v741_v30 }
 0x36f   :  { %v759_v40 = vadd.s32 %v758_v15, %v757_v23  ;;  %v1153_v38 = vmax.f32 %v1143_v52, 0.0  ;;  %3343 = vmatprep.subr.bf16.mxu1 %v3342_v13  ;;  %v734_v23 = vadd.f32 0.001, %v733_v34 }
 0x370   :  { %3345 = vmatpush3.bf16.msra.mxu1 %v3342_v13 }
 0x371   :  { %v760_v55 = vrot.slane %v759_v40, 1  ;;  %v3346_v11 = vpack.c.bf16 %v1154_v20, %v1153_v38 }
 0x373   :  { %v761_v22 = vadd.s32 %v760_v55, %v759_v40  ;;  %3347 = vmatprep.subr.bf16.mxu1 %v3346_v11 }
 0x374   :  { %3349 = vmatpush3.bf16.msra.mxu1 %v3346_v11 }
 0x375   :  { %v762_v12 = vadd.s32 %v761_v22, %v747_v18  ;;  %3237 = vmatprep.subr.mxu1 %v3602_v54 }
 0x377   :  { %v3022_v19 = vadd.s32 4294967295, %v762_v12  ;;  %3227 = vmatmul.mubr.msk.f32.vlgmr.msra.gmra.mrb[6].mxu1 %vm320_vm0, %v3906_v53 }
 0x378   :  { %3229 = vmatprep.mubr.msk.f32.mxu1 %vm320_vm0, %v3911_v58 }
 0x379   :  { %vm764_vm12 = vcmp.gt.s32.totalorder %v3022_v19, 0 }
 0x37a   :  { %v765_v45 = vsel %vm764_vm12, %v3022_v19, 0 }
 0x37b   :  { %vm766_vm13 = vcmp.lt.s32.totalorder %v765_v45, 7  ;;  %3230 = vmatmul.mubr.msk.f32.gmra.mrb[8].mxu1 %vm320_vm0, %v3921_v61 }
 0x37c   :  { %v4126_v46 = vsel %vm766_vm13, %v765_v45, 7  ;;  %3239 = vmatprep.mubr.msk.f32.mxu1 %vm3603_vm14, %v3602_v54 }
 0x37d   :  { %v771_v53 = vrot.slane %v4126_v46, %v3720_v25  ;;  %v3024_v58 = vadd.s32 4294967295, %v4126_v46  ;;  %vm784_vm3 = vcmp.eq.s32.totalorder %v4126_v46, 7  ;;  %vm783_vm4 = vcmp.eq.s32.totalorder %v4126_v46, 0 }
 0x37f   :  { %vm772_vm15 = vcmp.eq.s32.totalorder %v3717_v24, %v771_v53  ;;  %v779_v21 = vrot.slane %v3024_v58, %v3720_v25 }
 0x380   :  { %v3023_v60 = vsel %vm772_vm15, 1.0, %v3602_v54 }
 0x381   :  { %v793_v61 = vmul.f32 %v3023_v60, %v4103_v5  ;;  %v831_v0 = vmul.f32 %v3023_v60, %v734_v23  ;;  %v840_v41 = vmul.f32 %v3023_v60, %v742_v56  ;;  %vm780_vm2 = vcmp.eq.s32.totalorder %v3717_v24, %v779_v21 }
 0x382   :  { %v3025_v57 = vsel %vm780_vm2, 1.0, %v3602_v54  ;;  %v810_v15 = vmul.f32 %v3023_v60, %v3021_v7 }
 0x383   :  { %v794_v13 = vrot.slane %v793_v61, 4  ;;  %v832_v52 = vsel %vm84_vm1, %v831_v0, 0.0  ;;  %v841_v62 = vrot.slane %v840_v41, 4  ;;  %v785_v50 = vmul.f32 %v3025_v57, %v4103_v5 }
 0x384   :  { %v833_v20 = vrot.slane %v832_v52, 4  ;;  %v802_v40 = vmul.f32 %v3025_v57, %v3021_v7  ;;  %v811_v38 = vrot.slane %v810_v15, 4  ;;  %v822_v18 = vmul.f32 %v3025_v57, %v734_v23 }
 0x385   :  { %v795_v55 = vadd.f32 %v794_v13, %v793_v61  ;;  %v842_v11 = vadd.f32 %v841_v62, %v840_v41  ;;  %v786_v22 = vrot.slane %v785_v50, 4 }
 0x386   :  { %v834_v35 = vadd.f32 %v833_v20, %v832_v52  ;;  %v803_v12 = vrot.slane %v802_v40, 4  ;;  %v812_v39 = vadd.f32 %v811_v38, %v810_v15  ;;  %v823_v19 = vsel %vm84_vm1, %v822_v18, 0.0 }
 0x387   :  { %v796_v14 = vrot.slane %v795_v55, 2  ;;  %v843_v47 = vrot.slane %v842_v11, 2  ;;  %v787_v45 = vadd.f32 %v786_v22, %v785_v50  ;;  %v824_v48 = vrot.slane %v823_v19, 4 }
 0x388   :  { %v835_v30 = vrot.slane %v834_v35, 2  ;;  %v804_v34 = vadd.f32 %v803_v12, %v802_v40  ;;  %v813_v53 = vrot.slane %v812_v39, 2 }
 0x389   :  { %v797_v5 = vadd.f32 %v796_v14, %v795_v55  ;;  %v844_v58 = vadd.f32 %v843_v47, %v842_v11  ;;  %v788_v7 = vrot.slane %v787_v45, 2  ;;  %v825_v56 = vadd.f32 %v824_v48, %v823_v19 }
 0x38a   :  { %v836_v23 = vadd.f32 %v835_v30, %v834_v35  ;;  %v805_v21 = vrot.slane %v804_v34, 2  ;;  %v814_v60 = vadd.f32 %v813_v53, %v812_v39 }
 0x38b   :  { %v798_v61 = vrot.slane %v797_v5, 1  ;;  %v845_v0 = vrot.slane %v844_v58, 1  ;;  %v789_v41 = vadd.f32 %v788_v7, %v787_v45  ;;  %v826_v57 = vrot.slane %v825_v56, 2 }
 0x38c   :  { %v806_v15 = vadd.f32 %v805_v21, %v804_v34  ;;  %v815_v13 = vrot.slane %v814_v60, 1  ;;  %v837_v52 = vrot.slane %v836_v23, 1 }
 0x38d   :  { %v799_v62 = vadd.f32 %v798_v61, %v797_v5  ;;  %v4142_v50 = vadd.f32 %v845_v0, %v844_v58  ;;  %v790_v20 = vrot.slane %v789_v41, 1  ;;  %v827_v40 = vadd.f32 %v826_v57, %v825_v56 }
 0x38e   :  { %v807_v38 = vrot.slane %v806_v15, 1  ;;  %v816_v18 = vadd.f32 %v815_v13, %v814_v60  ;;  %v838_v55 = vadd.f32 %v837_v52, %v836_v23 }
 0x38f   :  { %v791_v11 = vadd.f32 %v790_v20, %v789_v41  ;;  %v828_v22 = vrot.slane %v827_v40, 1  ;;  %v857_v35 = vsub.f32 1.0, %v4142_v50  ;;  %v800_v47 = vsel %vm784_vm3, 3.0, %v799_v62 }
 0x390   :  { %v808_v12 = vadd.f32 %v807_v38, %v806_v15  ;;  %v817_v39 = vsel %vm784_vm3, 3.0, %v816_v18  ;;  %v839_v19 = vsel %vm784_vm3, 1.0, %v838_v55 }
 0x391   :  { %v792_v14 = vsel %vm783_vm4, -3.0, %v791_v11  ;;  %v829_v45 = vadd.f32 %v828_v22, %v827_v40  ;;  %3460 = vrcp.f32 %v839_v19 }
 0x392   :  { %v801_v48 = vsub.f32 %v800_v47, %v792_v14  ;;  %v809_v30 = vsel %vm783_vm4, -3.0, %v808_v12  ;;  %v870_v23 = vsub.f32 %v4101_v27, %v792_v14 }
 0x393   :  { %v818_v34 = vsub.f32 %v817_v39, %v809_v30  ;;  %v830_v53 = vsel %vm783_vm4, 1.0, %v829_v45  ;;  %v863_v5 = vmul.f32 %v857_v35, %v809_v30 }
 0x394   :  { %3462 = vrcp.f32 %v801_v48  ;;  %v856_v58 = vmul.f32 %v4142_v50, %v830_v53 }
 0x39b   :  { %v3461_v7 = vpop.eup %3460 }
 0x39c   :  { %v848_v56 = vmul.f32 %v3461_v7, %v830_v53 }
 0x39e   :  { %v3463_v46 = vpop.eup %3462  ;;  %3464 = vrsqrt.f32 %v848_v56  ;;  %vm851_vm6 = vcmp.eq.f32.partialorder %v848_v56, inf  ;;  %v854_v13 = vand.u32 2147483648, %v848_v56  ;;  %vm853_vm7 = vcmp.eq.f32.partialorder %v848_v56, 0.0 }
 0x39f   :  { %v821_v21 = vmul.f32 %v3463_v46, %v818_v34  ;;  %v871_v60 = vmul.f32 %v3463_v46, %v870_v23 }
 0x3a1   :  { %v872_v61 = vsub.f32 %v4142_v50, %v871_v60  ;;  %v884_v0 = vsub.f32 %v871_v60, %v4142_v50  ;;  %vm892_vm5 = vcmp.le.f32.partialorder %v871_v60, %v4142_v50  ;;  %3466 = vrcp.f32 %v821_v21 }
 0x3a3   :  { %v873_v41 = vmul.f32 %v872_v61, %v809_v30  ;;  %v881_v30 = vsub.f32 1.0, %v871_v60 }
 0x3a8   :  { %v3465_v57 = vpop.eup %3464 }
 0x3a9   :  { %v850_v15 = vmul.f32 %v3465_v57, %v848_v56 }
 0x3ab   :  { %v852_v52 = vsel %vm851_vm6, %v848_v56, %v850_v15  ;;  %v3467_v45 = vpop.eup %3466 }
 0x3ac   :  { %v855_v62 = vsel %vm853_vm7, %v854_v13, %v852_v52 }
 0x3ad   :  { %v858_v20 = vmul.f32 %v857_v35, %v855_v62  ;;  %v864_v40 = vmul.f32 %v855_v62, %v4142_v50  ;;  %v883_v38 = vmul.f32 %v855_v62, %v817_v39  ;;  %v888_v18 = vmul.f32 %v884_v0, %v855_v62 }
 0x3af   :  { %v859_v55 = vmul.f32 %v858_v20, %v839_v19  ;;  %v865_v11 = vmul.f32 %v864_v40, %v817_v39  ;;  %v867_v22 = vadd.f32 %v864_v40, %v857_v35  ;;  %v885_v12 = vmul.f32 %v884_v0, %v883_v38 }
 0x3b1   :  { %v860_v14 = vadd.f32 %v859_v55, %v856_v58  ;;  %v866_v47 = vadd.f32 %v865_v11, %v863_v5  ;;  %3468 = vrcp.f32 %v867_v22 }
 0x3b3   :  { %v862_v48 = vmul.f32 %v3467_v45, %v860_v14 }
 0x3b5   :  { %v877_v34 = vmul.f32 %v871_v60, %v862_v48  ;;  %v887_v53 = vmul.f32 %v881_v30, %v862_v48 }
 0x3b7   :  { %v878_v7 = vadd.f32 %v877_v34, %v872_v61  ;;  %v889_v56 = vadd.f32 %v888_v18, %v887_v53 }
 0x3b9   :  { %3470 = vrcp.f32 %v878_v7 }
 0x3ba   :  { %3472 = vrcp.f32 %v889_v56 }
 0x3bb   :  { %v3469_v23 = vpop.eup %3468 }
 0x3bc   :  { %v869_v46 = vmul.f32 %v3469_v23, %v866_v47 }
 0x3be   :  { %v874_v21 = vmul.f32 %v869_v46, %v862_v48 }
 0x3c0   :  { %v875_v57 = vmul.f32 %v874_v21, %v871_v60  ;;  %v882_v19 = vmul.f32 %v881_v30, %v874_v21 }
 0x3c2   :  { %v876_v39 = vadd.f32 %v875_v57, %v873_v41  ;;  %v886_v35 = vadd.f32 %v885_v12, %v882_v19 }
 0x3c3   :  { %v3471_v5 = vpop.eup %3470 }
 0x3c4   :  { %v3473_v58 = vpop.eup %3472  ;;  %v880_v0 = vmul.f32 %v3471_v5, %v876_v39 }
 0x3c5   :  { %v891_v15 = vmul.f32 %v3473_v58, %v886_v35 }
 0x3c7   :  { %v893_v61 = vsel %vm892_vm5, %v880_v0, %v891_v15 }
 0x3c8   :  { %v4158_v13 = vsel %vm896_vm11, %v893_v61, %v4101_v27 }
 0x3c9   :  { %899 = vst [vmem:[#allocation2 + $0x1] sm:$0x1] %v4158_v13  ;;  %vm1440_vm13 = vcmp.ge.f32.partialorder %v4158_v13, -2.999999  ;;  %vm1442_vm15 = vcmp.ge.f32.partialorder %v4158_v13, 3.000001 }
 0x44a   :  { %v3228_v52 = vpop.f32.mrb[6].mxu1 }
 0x44b   :  { %v1227_v41 = vadd.f32 %v3228_v52, %v4020_v16  ;;  %v1221_v62 = vpop.f32.mrb[7].mxu1 }
 0x44c   :  { %v1222_v20 = vadd.f32 %v1221_v62, %v4018_v6  ;;  %v1752_v62 = vmul.f32 %v3888_v59, %v3736_v32 }
 0x44d   :  { %v1259_v40 = vrot.slane %v1227_v41, 4 }
 0x44e   :  { %v1240_v38 = vrot.slane %v1222_v20, 4  ;;  %v4163_v18 = vpop.f32.mrb[8].mxu1 }
 0x44f   :  { %v1260_v55 = vmax.f32 %v1227_v41, %v1259_v40  ;;  %v4165_v11 = vpop.f32.mrb[9].mxu1  ;;  %v1754_v40 = vmul.f32 %v3888_v59, %v3741_v36 }
 0x450   :  { %v1241_v50 = vmax.f32 %v1222_v20, %v1240_v38 }
 0x451   :  { %v1261_v60 = vrot.slane %v1260_v55, 2 }
 0x452   :  { %v1242_v22 = vrot.slane %v1241_v50, 2 }
 0x453   :  { %v1262_v27 = vmax.f32 %v1260_v55, %v1261_v60  ;;  %v1756_v55 = vadd.f32 %v1752_v62, %v3734_v31 }
 0x454   :  { %v1243_v12 = vmax.f32 %v1241_v50, %v1242_v22 }
 0x455   :  { %v1263_v14 = vrot.slane %v1262_v27, 1 }
 0x456   :  { %v1244_v47 = vrot.slane %v1243_v12, 1 }
 0x457   :  { %v1264_v45 = vmax.f32 %v1262_v27, %v1263_v14 }
 0x458   :  { %v1245_v48 = vmax.f32 %v1243_v12, %v1244_v47  ;;  %v1758_v12 = vadd.f32 %v1754_v40, %v3747_v43 }
 0x459   :  { %v1265_v30 = vsub.f32 %v1227_v41, %v1264_v45  ;;  %v1751_v41 = vmul.f32 %v3888_v59, %v3731_v29 }
 0x45a   :  { %v1246_v34 = vsub.f32 %v1222_v20, %v1245_v48  ;;  %v1753_v20 = vmul.f32 %v3888_v59, %v3743_v37  ;;  %v1760_v48 = vmax.f32 %v1756_v55, 0.0 }
 0x45b   :  { %v1266_v53 = vmul.f32 1.442695, %v1265_v30  ;;  %v1755_v38 = vadd.f32 %v1751_v41, %v3729_v28 }
 0x45c   :  { %v1247_v7 = vmul.f32 1.442695, %v1246_v34  ;;  %v1757_v27 = vadd.f32 %v1753_v20, %v3749_v44 }
 0x45d   :  { %3474 = vpow2.f32 %v1266_v53  ;;  %v1759_v45 = vmax.f32 %v1755_v38, 0.0 }
 0x45e   :  { %3476 = vpow2.f32 %v1247_v7  ;;  %v1761_v53 = vmax.f32 %v1757_v27, 0.0  ;;  %v1762_v7 = vmax.f32 %v1758_v12, 0.0 }
 0x467   :  { %v3475_v56 = vpop.eup %3474 }
 0x468   :  { %v3477_v23 = vpop.eup %3476  ;;  %v1268_v46 = vrot.slane %v3475_v56, 4 }
 0x469   :  { %v1249_v21 = vrot.slane %v3477_v23, 4 }
 0x46a   :  { %v1269_v57 = vadd.f32 %v3475_v56, %v1268_v46  ;;  %v3350_v46 = vpack.c.bf16 %v1760_v48, %v1759_v45 }
 0x46b   :  { %v1250_v19 = vadd.f32 %v3477_v23, %v1249_v21 }
 0x46c   :  { %v1270_v39 = vrot.slane %v1269_v57, 2 }
 0x46d   :  { %v1251_v35 = vrot.slane %v1250_v19, 2 }
 0x46e   :  { %v1271_v5 = vadd.f32 %v1270_v39, %v1269_v57 }
 0x46f   :  { %v1252_v58 = vadd.f32 %v1251_v35, %v1250_v19 }
 0x470   :  { %v1272_v0 = vrot.slane %v1271_v5, 1 }
 0x471   :  { %v1253_v15 = vrot.slane %v1252_v58, 1 }
 0x472   :  { %v1273_v61 = vadd.f32 %v1272_v0, %v1271_v5 }
 0x473   :  { %v1254_v52 = vadd.f32 %v1253_v15, %v1252_v58  ;;  %v1449_v15 = vrot.slane %v4158_v13, %v3720_v25 }
 0x474   :  { %3478 = vrcp.f32 %v1273_v61 }
 0x475   :  { %3480 = vrcp.f32 %v1254_v52 }
 0x47e   :  { %v3479_v50 = vpop.eup %3478 }
 0x47f   :  { %v3481_v60 = vpop.eup %3480  ;;  %v1275_v22 = vmul.f32 %v3479_v50, %v3475_v56  ;;  %v3354_v56 = vpack.c.bf16 %v1762_v7, %v1761_v53 }
 0x480   :  { %v1256_v14 = vmul.f32 %v3481_v60, %v3477_v23  ;;  %v1237_v23 = vadd.f32 %v4163_v18, %v4094_v63 }
 0x481   :  { %v1276_v47 = vmul.f32 0.992, %v1275_v22 }
 0x482   :  { %v1257_v30 = vmul.f32 0.992, %v1256_v14 }
 0x483   :  { %v1277_v34 = vadd.f32 0.001, %v1276_v47 }
 0x484   :  { %v1258_v59 = vadd.f32 0.001, %v1257_v30 }
 0x485   :  { %3238 = vmatpush3.msra.mxu1 %v1277_v34 }
 0x486   :  { %3233 = vmatpush3.msra.mxu0 %v1258_v59  ;;  %3240 = vmatmul.mubr.msk.f32.vlgmr.msra.gmra.mrb[10].mxu1 %vm577_vm8, %v4043_v3  ;;  %v1441_v59 = vsel %vm1440_vm13, 1, %v3601_v2  ;;  %vm1592_vm13 = vcmp.le.f32.partialorder %v4158_v13, 3.0 }
 0x487   :  { %3235 = vmatmul.mubr.msk.f32.vlgmr.msra.gmra.mrb[10].mxu0 %vm577_vm8, %v4043_v3  ;;  %3351 = vmatprep.subr.bf16.mxu0 %v3350_v46 }
 0x488   :  { %3353 = vmatpush3.bf16.msra.mxu0 %v3350_v46  ;;  %3250 = vmatprep.mubr.msk.f32.mxu0 %vm320_vm0, %v4052_v10  ;;  %v4198_v10 = vadd.f32 %v4165_v11, %v4087_v1  ;;  %v1443_v46 = vsel %vm1442_vm15, 1, %v3601_v2 }
 0x489   :  { %3355 = vmatprep.subr.bf16.mxu0 %v3354_v56  ;;  %3264 = vmatprep.mubr.msk.f32.mxu1 %vm320_vm0, %v4059_v33 }
 0x48a   :  { %v1423_v33 = vand.u32 2147483647, %v4198_v10 }
 0x48c   :  { %3357 = vmatpush3.bf16.msra.mxu0 %v3354_v56  ;;  %v1424_v21 = vsub.f32 0.0, %v1423_v33 }
 0x48d   :  { %3270 = vmatprep.subr.mxu0 %v3602_v54 }
 0x48e   :  { %v1425_v57 = vmul.f32 1.442695, %v1424_v21 }
 0x48f   :  { %3251 = vmatmul.mubr.msk.f32.vlgmr.msra.gmra.mrb[12].mxu0 %vm320_vm0, %v4067_v9  ;;  %v1432_v9 = vsub.f32 0.0, %v1237_v23  ;;  %v1444_v23 = vadd.s32 %v1443_v46, %v1441_v59 }
 0x490   :  { %3253 = vmatprep.mubr.msk.f32.mxu0 %vm320_vm0, %v4074_v17  ;;  %3482 = vpow2.f32 %v1425_v57 }
 0x491   :  { %v1433_v19 = vmul.f32 1.442695, %v1432_v9 }
 0x493   :  { %3254 = vmatmul.mubr.msk.f32.gmra.mrb[14].mxu0 %vm320_vm0, %v4081_v26  ;;  %3484 = vpow2.f32 %v1433_v19 }
 0x494   :  { %3272 = vmatprep.mubr.msk.f32.mxu0 %vm3603_vm14, %v3602_v54 }
 0x49a   :  { %v3483_v11 = vpop.eup %3482 }
 0x49b   :  { %v1427_v18 = vadd.f32 1.0, %v3483_v11  ;;  %v1422_v11 = vmax.f32 %v4198_v10, 0.0 }
 0x49d   :  { %v3485_v61 = vpop.eup %3484  ;;  %3486 = vlog2.f32 %v1427_v18 }
 0x49e   :  { %v1435_v50 = vadd.f32 1.0, %v3485_v61 }
 0x4a0   :  { %3488 = vrcp.f32 %v1435_v50 }
 0x4a7   :  { %v3487_v9 = vpop.eup %3486 }
 0x4a8   :  { %v1429_v19 = vmul.f32 0.6931472, %v3487_v9 }
 0x4aa   :  { %v1430_v61 = vadd.f32 %v1429_v19, %v1422_v11 }
 0x559   :  { %v1414_v17 = vpop.f32.mrb[10].mxu1 }
 0x55a   :  { %v1344_v26 = vpop.f32.mrb[10].mxu0  ;;  %v3241_v39 = vpop.f32.mrb[11].mxu1 }
 0x55b   :  { %v1418_v35 = vmul.f32 6.0, %v1344_v26  ;;  %v3236_v5 = vpop.f32.mrb[11].mxu0  ;;  %v4222_v39 = vld [vmem:[%s4447_s5 + $0x8] sm:$0xff] }
 0x55c   :  { %v4229_v5 = vld [vmem:[%s4447_s5 + $0x10] sm:$0xff] }
 0x55d   :  { %v4203_v58 = vadd.f32 -3.0, %v1418_v35  ;;  %v3489_v35 = vpop.eup %3488 }
 0x55e   :  { %v1438_v18 = vmul.f32 0.95, %v3489_v35 }
 0x55f   :  { %v1445_v0 = vadd.f32 1e-06, %v4203_v58 }
 0x561   :  { %vm1450_vm12 = vcmp.ge.f32.partialorder %v1449_v15, %v1445_v0  ;;  %v1420_v15 = vmul.f32 6.0, %v1414_v17 }
 0x562   :  { %v1451_v52 = vsel %vm1450_vm12, 1, %v3601_v2  ;;  %v3252_v41 = vpop.f32.mrb[12].mxu0  ;;  %vm1591_vm12 = vcmp.ge.f32.partialorder %v4158_v13, -3.0 }
 0x563   :  { %v1452_v62 = vsel %vm84_vm1, %v1451_v52, 0  ;;  %v1835_v20 = vadd.f32 %v3252_v41, %v3779_v4  ;;  %v1829_v40 = vpop.f32.mrb[13].mxu0  ;;  %v4237_v52 = vld [vmem:[%s4447_s5 + $0x18] sm:$0xff]  ;;  %vm1593_vm15 = vmand %vm1591_vm12, %vm1592_vm13 }
 0x564   :  { %v1453_v38 = vrot.slane %v1452_v62, 4  ;;  %v1830_v55 = vadd.f32 %v1829_v40, %v3753_v49  ;;  %v1431_v40 = vadd.f32 0.001, %v1430_v61 }
 0x565   :  { %v1849_v60 = vmax.f32 %v1835_v20, 0.0  ;;  %v1439_v20 = vadd.f32 0.025, %v1438_v18 }
 0x566   :  { %v1454_v22 = vadd.s32 %v1453_v38, %v1452_v62  ;;  %v1848_v27 = vmax.f32 %v1830_v55, 0.0  ;;  %v3255_v12 = vpop.f32.mrb[14].mxu0  ;;  %v3041_v62 = vadd.f32 -3.0, %v1420_v15 }
 0x567   :  { %v1845_v14 = vadd.f32 %v3255_v12, %v3781_v8  ;;  %v1839_v47 = vpop.f32.mrb[15].mxu0 }
 0x568   :  { %v1455_v45 = vrot.slane %v1454_v22, 2  ;;  %v3358_v48 = vpack.c.bf16 %v1849_v60, %v1848_v27  ;;  %v1840_v30 = vadd.f32 %v1839_v47, %v3755_v51 }
 0x569   :  { %v1851_v34 = vmax.f32 %v1845_v14, 0.0 }
 0x56a   :  { %v1456_v53 = vadd.s32 %v1455_v45, %v1454_v22  ;;  %v1850_v7 = vmax.f32 %v1840_v30, 0.0  ;;  %3359 = vmatprep.subr.bf16.mxu1 %v3358_v48 }
 0x56b   :  { %3361 = vmatpush3.bf16.msra.mxu1 %v3358_v48 }
 0x56c   :  { %v1457_v56 = vrot.slane %v1456_v53, 1  ;;  %v3362_v33 = vpack.c.bf16 %v1851_v34, %v1850_v7 }
 0x56e   :  { %v1458_v21 = vadd.s32 %v1457_v56, %v1456_v53  ;;  %3363 = vmatprep.subr.bf16.mxu1 %v3362_v33 }
 0x56f   :  { %3365 = vmatpush3.bf16.msra.mxu1 %v3362_v33 }
 0x570   :  { %v1459_v57 = vadd.s32 %v1458_v21, %v1444_v23  ;;  %3275 = vmatprep.subr.mxu1 %v3602_v54 }
 0x572   :  { %v3042_v26 = vadd.s32 4294967295, %v1459_v57  ;;  %3265 = vmatmul.mubr.msk.f32.vlgmr.msra.gmra.mrb[12].mxu1 %vm320_vm0, %v4222_v39 }
 0x573   :  { %3267 = vmatprep.mubr.msk.f32.mxu1 %vm320_vm0, %v4229_v5 }
 0x574   :  { %vm1461_vm2 = vcmp.gt.s32.totalorder %v3042_v26, 0 }
 0x575   :  { %v1462_v0 = vsel %vm1461_vm2, %v3042_v26, 0 }
 0x576   :  { %vm1463_vm3 = vcmp.lt.s32.totalorder %v1462_v0, 7  ;;  %3268 = vmatmul.mubr.msk.f32.gmra.mrb[14].mxu1 %vm320_vm0, %v4237_v52 }
 0x577   :  { %v4241_v41 = vsel %vm1463_vm3, %v1462_v0, 7  ;;  %3277 = vmatprep.mubr.msk.f32.mxu1 %vm3603_vm14, %v3602_v54 }
 0x578   :  { %v1468_v10 = vrot.slane %v4241_v41, %v3720_v25  ;;  %v3044_v17 = vadd.s32 4294967295, %v4241_v41  ;;  %vm1481_vm6 = vcmp.eq.s32.totalorder %v4241_v41, 7  ;;  %vm1480_vm7 = vcmp.eq.s32.totalorder %v4241_v41, 0 }
 0x57a   :  { %vm1469_vm4 = vcmp.eq.s32.totalorder %v3717_v24, %v1468_v10  ;;  %v1476_v38 = vrot.slane %v3044_v17, %v3720_v25 }
 0x57b   :  { %v3043_v55 = vsel %vm1469_vm4, 1.0, %v3602_v54 }
 0x57c   :  { %v1490_v50 = vmul.f32 %v3043_v55, %v4203_v58  ;;  %v1528_v60 = vmul.f32 %v3043_v55, %v1431_v40  ;;  %v1537_v22 = vmul.f32 %v3043_v55, %v1439_v20  ;;  %vm1477_vm5 = vcmp.eq.s32.totalorder %v3717_v24, %v1476_v38 }
 0x57d   :  { %v3045_v27 = vsel %vm1477_vm5, 1.0, %v3602_v54  ;;  %v1507_v12 = vmul.f32 %v3043_v55, %v3041_v62 }
 0x57e   :  { %v1491_v14 = vrot.slane %v1490_v50, 4  ;;  %v1529_v47 = vsel %vm84_vm1, %v1528_v60, 0.0  ;;  %v1538_v45 = vrot.slane %v1537_v22, 4  ;;  %v1482_v48 = vmul.f32 %v3045_v27, %v4203_v58 }
 0x57f   :  { %v1530_v30 = vrot.slane %v1529_v47, 4  ;;  %v1499_v34 = vmul.f32 %v3045_v27, %v3041_v62  ;;  %v1508_v53 = vrot.slane %v1507_v12, 4  ;;  %v1519_v7 = vmul.f32 %v3045_v27, %v1431_v40 }
 0x580   :  { %v1492_v59 = vadd.f32 %v1491_v14, %v1490_v50  ;;  %v1539_v46 = vadd.f32 %v1538_v45, %v1537_v22  ;;  %v1483_v56 = vrot.slane %v1482_v48, 4 }
 0x581   :  { %v1531_v33 = vadd.f32 %v1530_v30, %v1529_v47  ;;  %v1500_v23 = vrot.slane %v1499_v34, 4  ;;  %v1509_v21 = vadd.f32 %v1508_v53, %v1507_v12  ;;  %v1520_v9 = vsel %vm84_vm1, %v1519_v7, 0.0 }
 0x582   :  { %v1493_v57 = vrot.slane %v1492_v59, 2  ;;  %v1540_v19 = vrot.slane %v1539_v46, 2  ;;  %v1484_v26 = vadd.f32 %v1483_v56, %v1482_v48  ;;  %v1521_v35 = vrot.slane %v1520_v9, 4 }
 0x583   :  { %v1532_v11 = vrot.slane %v1531_v33, 2  ;;  %v1501_v0 = vadd.f32 %v1500_v23, %v1499_v34  ;;  %v1510_v15 = vrot.slane %v1509_v21, 2 }
 0x584   :  { %v1494_v58 = vadd.f32 %v1493_v57, %v1492_v59  ;;  %v1541_v18 = vadd.f32 %v1540_v19, %v1539_v46  ;;  %v1485_v61 = vrot.slane %v1484_v26, 2  ;;  %v1522_v10 = vadd.f32 %v1521_v35, %v1520_v9 }
 0x585   :  { %v1533_v17 = vadd.f32 %v1532_v11, %v1531_v33  ;;  %v1502_v62 = vrot.slane %v1501_v0, 2  ;;  %v1511_v20 = vadd.f32 %v1510_v15, %v1509_v21 }
 0x586   :  { %v1495_v40 = vrot.slane %v1494_v58, 1  ;;  %v1542_v38 = vrot.slane %v1541_v18, 1  ;;  %v1486_v55 = vadd.f32 %v1485_v61, %v1484_v26  ;;  %v1523_v50 = vrot.slane %v1522_v10, 2 }
 0x587   :  { %v1503_v60 = vadd.f32 %v1502_v62, %v1501_v0  ;;  %v1512_v22 = vrot.slane %v1511_v20, 1  ;;  %v1534_v27 = vrot.slane %v1533_v17, 1 }
 0x588   :  { %v1496_v12 = vadd.f32 %v1495_v40, %v1494_v58  ;;  %v4257_v14 = vadd.f32 %v1542_v38, %v1541_v18  ;;  %v1487_v47 = vrot.slane %v1486_v55, 1  ;;  %v1524_v45 = vadd.f32 %v1523_v50, %v1522_v10 }
 0x589   :  { %v1504_v48 = vrot.slane %v1503_v60, 1  ;;  %v1513_v30 = vadd.f32 %v1512_v22, %v1511_v20  ;;  %v1535_v34 = vadd.f32 %v1534_v27, %v1533_v17 }
 0x58a   :  { %v1488_v53 = vadd.f32 %v1487_v47, %v1486_v55  ;;  %v1525_v7 = vrot.slane %v1524_v45, 1  ;;  %v1554_v59 = vsub.f32 1.0, %v4257_v14  ;;  %v1497_v21 = vsel %vm1481_vm6, 3.0, %v1496_v12 }
 0x58b   :  { %v1505_v46 = vadd.f32 %v1504_v48, %v1503_v60  ;;  %v1514_v56 = vsel %vm1481_vm6, 3.0, %v1513_v30  ;;  %v1536_v33 = vsel %vm1481_vm6, 1.0, %v1535_v34 }
 0x58c   :  { %v1489_v23 = vsel %vm1480_vm7, -3.0, %v1488_v53  ;;  %v1526_v9 = vadd.f32 %v1525_v7, %v1524_v45  ;;  %3490 = vrcp.f32 %v1536_v33 }
 0x58d   :  { %v1498_v57 = vsub.f32 %v1497_v21, %v1489_v23  ;;  %v1506_v19 = vsel %vm1480_vm7, -3.0, %v1505_v46  ;;  %v1567_v18 = vsub.f32 %v4158_v13, %v1489_v23 }
 0x58e   :  { %v1515_v26 = vsub.f32 %v1514_v56, %v1506_v19  ;;  %v1527_v35 = vsel %vm1480_vm7, 1.0, %v1526_v9  ;;  %v1560_v11 = vmul.f32 %v1554_v59, %v1506_v19 }
 0x58f   :  { %3492 = vrcp.f32 %v1498_v57  ;;  %v1553_v0 = vmul.f32 %v4257_v14, %v1527_v35 }
 0x596   :  { %v3491_v15 = vpop.eup %3490 }
 0x597   :  { %v1545_v58 = vmul.f32 %v3491_v15, %v1527_v35 }
 0x599   :  { %v3493_v41 = vpop.eup %3492  ;;  %3494 = vrsqrt.f32 %v1545_v58  ;;  %vm1548_vm10 = vcmp.eq.f32.partialorder %v1545_v58, inf  ;;  %v1551_v55 = vand.u32 2147483648, %v1545_v58  ;;  %vm1550_vm11 = vcmp.eq.f32.partialorder %v1545_v58, 0.0 }
 0x59a   :  { %v1518_v61 = vmul.f32 %v3493_v41, %v1515_v26  ;;  %v1568_v10 = vmul.f32 %v3493_v41, %v1567_v18 }
 0x59c   :  { %v1569_v17 = vsub.f32 %v4257_v14, %v1568_v10  ;;  %v1581_v62 = vsub.f32 %v1568_v10, %v4257_v14  ;;  %vm1589_vm9 = vcmp.le.f32.partialorder %v1568_v10, %v4257_v14  ;;  %3496 = vrcp.f32 %v1518_v61 }
 0x59d   :  { %v1578_v21 = vsub.f32 1.0, %v1568_v10 }
 0x59e   :  { %v1570_v20 = vmul.f32 %v1569_v17, %v1506_v19 }
 0x5a3   :  { %v3495_v40 = vpop.eup %3494 }
 0x5a4   :  { %v1547_v38 = vmul.f32 %v3495_v40, %v1545_v58 }
 0x5a6   :  { %v1549_v50 = vsel %vm1548_vm10, %v1545_v58, %v1547_v38  ;;  %v3497_v46 = vpop.eup %3496 }
 0x5a7   :  { %v1552_v60 = vsel %vm1550_vm11, %v1551_v55, %v1549_v50 }
 0x5a8   :  { %v1555_v22 = vmul.f32 %v1554_v59, %v1552_v60  ;;  %v1561_v27 = vmul.f32 %v1552_v60, %v4257_v14  ;;  %v1580_v12 = vmul.f32 %v1552_v60, %v1514_v56  ;;  %v1585_v47 = vmul.f32 %v1581_v62, %v1552_v60 }
 0x5aa   :  { %v1556_v45 = vmul.f32 %v1555_v22, %v1536_v33  ;;  %v1562_v48 = vmul.f32 %v1561_v27, %v1514_v56  ;;  %v1564_v30 = vadd.f32 %v1561_v27, %v1554_v59  ;;  %v1582_v34 = vmul.f32 %v1581_v62, %v1580_v12 }
 0x5ac   :  { %v1557_v53 = vadd.f32 %v1556_v45, %v1553_v0  ;;  %v1563_v7 = vadd.f32 %v1562_v48, %v1560_v11  ;;  %3498 = vrcp.f32 %v1564_v30 }
 0x5ae   :  { %v1559_v23 = vmul.f32 %v3497_v46, %v1557_v53 }
 0x5b0   :  { %v1574_v9 = vmul.f32 %v1568_v10, %v1559_v23  ;;  %v1584_v57 = vmul.f32 %v1578_v21, %v1559_v23 }
 0x5b2   :  { %v1575_v19 = vadd.f32 %v1574_v9, %v1569_v17  ;;  %v1586_v26 = vadd.f32 %v1585_v47, %v1584_v57 }
 0x5b4   :  { %3500 = vrcp.f32 %v1575_v19 }
 0x5b5   :  { %3502 = vrcp.f32 %v1586_v26 }
 0x5b6   :  { %v3499_v35 = vpop.eup %3498 }
 0x5b7   :  { %v1566_v15 = vmul.f32 %v3499_v35, %v1563_v7 }
 0x5b9   :  { %v1571_v58 = vmul.f32 %v1566_v15, %v1559_v23 }
 0x5bb   :  { %v1572_v18 = vmul.f32 %v1571_v58, %v1568_v10  ;;  %v1579_v33 = vmul.f32 %v1578_v21, %v1571_v58 }
 0x5bd   :  { %v1573_v56 = vadd.f32 %v1572_v18, %v1570_v20  ;;  %v1583_v59 = vadd.f32 %v1582_v34, %v1579_v33 }
 0x5be   :  { %v3501_v41 = vpop.eup %3500 }
 0x5bf   :  { %v3503_v0 = vpop.eup %3502  ;;  %v1577_v11 = vmul.f32 %v3501_v41, %v1573_v56 }
 0x5c0   :  { %v1588_v61 = vmul.f32 %v3503_v0, %v1583_v59 }
 0x5c2   :  { %v1590_v17 = vsel %vm1589_vm9, %v1577_v11, %v1588_v61  ;;  %v2448_v61 = vmul.f32 %v3966_v42, %v3731_v29 }
 0x5c3   :  { %v4273_v62 = vsel %vm1593_vm15, %v1590_v17, %v4158_v13  ;;  %v2449_v17 = vmul.f32 %v3966_v42, %v3736_v32 }
 0x5c4   :  { %1596 = vst [vmem:[#allocation2 + $0x3] sm:$0x1] %v4273_v62  ;;  %vm2137_vm3 = vcmp.ge.f32.partialorder %v4273_v62, -2.999999  ;;  %vm2139_vm4 = vcmp.ge.f32.partialorder %v4273_v62, 3.000001 }
 0x5c5   :  { %vm2288_vm13 = vcmp.ge.f32.partialorder %v4273_v62, -3.0  ;;  %vm2289_vm15 = vcmp.le.f32.partialorder %v4273_v62, 3.0 }
 0x645   :  { %v3266_v40 = vpop.f32.mrb[12].mxu1 }
 0x646   :  { %v1924_v20 = vadd.f32 %v3266_v40, %v4020_v16  ;;  %v1918_v38 = vpop.f32.mrb[13].mxu1  ;;  %v2450_v40 = vmul.f32 %v3966_v42, %v3743_v37 }
 0x647   :  { %v1919_v55 = vadd.f32 %v1918_v38, %v4018_v6  ;;  %v2452_v38 = vadd.f32 %v2448_v61, %v3729_v28 }
 0x648   :  { %v1956_v50 = vrot.slane %v1924_v20, 4 }
 0x649   :  { %v1937_v60 = vrot.slane %v1919_v55, 4  ;;  %v4278_v22 = vpop.f32.mrb[14].mxu1  ;;  %v2456_v32 = vmax.f32 %v2452_v38, 0.0 }
 0x64a   :  { %v1957_v27 = vmax.f32 %v1924_v20, %v1956_v50  ;;  %v4280_v12 = vpop.f32.mrb[15].mxu1 }
 0x64b   :  { %v1938_v14 = vmax.f32 %v1919_v55, %v1937_v60 }
 0x64c   :  { %v1958_v10 = vrot.slane %v1957_v27, 2 }
 0x64d   :  { %v1939_v47 = vrot.slane %v1938_v14, 2 }
 0x64e   :  { %v1959_v13 = vmax.f32 %v1957_v27, %v1958_v10 }
 0x64f   :  { %v1940_v45 = vmax.f32 %v1938_v14, %v1939_v47  ;;  %v2454_v14 = vadd.f32 %v2450_v40, %v3749_v44  ;;  %v3573_v44 = vld [vmem:[%s4447_s5] sm:$0xff] }
 0x650   :  { %v1960_v48 = vrot.slane %v1959_v13, 1 }
 0x651   :  { %v1941_v30 = vrot.slane %v1940_v45, 1 }
 0x652   :  { %v1961_v34 = vmax.f32 %v1959_v13, %v1960_v48  ;;  %v2458_v48 = vmax.f32 %v2454_v14, 0.0 }
 0x653   :  { %v1942_v53 = vmax.f32 %v1940_v45, %v1941_v30 }
 0x654   :  { %v1962_v7 = vsub.f32 %v1924_v20, %v1961_v34  ;;  %v2451_v20 = vmul.f32 %v3966_v42, %v3741_v36  ;;  %v3574_v42 = vld [vmem:[%s4445_s3 + $0x8] sm:$0xff]  ;;  %v3575_v34 = vld [vmem:[%s4445_s3 + $0x10] sm:$0xff] }
 0x655   :  { %v1943_v46 = vsub.f32 %v1919_v55, %v1942_v53  ;;  %v2453_v55 = vadd.f32 %v2449_v17, %v3734_v31  ;;  %v3576_v53 = vld [vmem:[%s4445_s3 + $0x18] sm:$0xff] }
 0x656   :  { %v1963_v23 = vmul.f32 1.442695, %v1962_v7  ;;  %v2455_v29 = vadd.f32 %v2451_v20, %v3747_v43  ;;  %v3572_v43 = vld [vmem:[%s4445_s3] sm:$0xff]  ;;  %v4323_v7 = vadd.f32 %v4280_v12, %v4087_v1  ;;  %s3604_s3 = smov [#allocation2]  }
 0x657   :  { %v1944_v21 = vmul.f32 1.442695, %v1943_v46  ;;  %v2457_v13 = vmax.f32 %v2453_v55, 0.0  ;;  %s2997_s5 = sshll.u32 %s3604_s3, 4  ;;  %s2998_s5 = int_to_ptr.vmem [resolvable:$true] %s2997_s5 }
 0x658   :  { %3504 = vpow2.f32 %v1963_v23  ;;  %v2459_v30 = vmax.f32 %v2455_v29, 0.0  ;;  %v2120_v46 = vand.u32 2147483647, %v4323_v7  ;;  %v1934_v23 = vadd.f32 %v4278_v22, %v4094_v63  ;;  %s3577_s11 = scalar_lea.vmem %s2998_s5, 128  ;;  %p3582_p1 = scmp.lt.s32.totalorder %s2998_s5, %s2998_s5 }
 0x659   :  { %3506 = vpow2.f32 %v1944_v21  ;;  %v3366_v28 = vpack.c.bf16 %v2457_v13, %v2456_v32  ;;  %p3578_p0 = scmp.ne.s32.totalorder %s2998_s5, %s3577_s11  ;;  %p3583_p2 = scmp.lt.s32.totalorder %s3577_s11, %s3577_s11 }
 0x65a   :  { %v3370_v31 = vpack.c.bf16 %v2459_v30, %v2458_v48  ;;  %v2121_v21 = vsub.f32 0.0, %v2120_v46  ;;  %v2140_v48 = vsel %vm2139_vm4, 1, %v3601_v2 }
 0x65b   :  { %p3584_p3 = por %p3583_p2, %p3582_p1 }
 0x65d   :  { %p3585_p4 = pnand %p3584_p3, %p3578_p0 }
 0x662   :  { %v3505_v9 = vpop.eup %3504 }
 0x663   :  { %v3507_v57 = vpop.eup %3506  ;;  %v1965_v19 = vrot.slane %v3505_v9, 4 }
 0x664   :  { %v1946_v26 = vrot.slane %v3507_v57, 4 }
 0x665   :  { %v1966_v35 = vadd.f32 %v3505_v9, %v1965_v19 }
 0x666   :  { %v1947_v15 = vadd.f32 %v3507_v57, %v1946_v26 }
 0x667   :  { %v1967_v58 = vrot.slane %v1966_v35, 2 }
 0x668   :  { %v1948_v18 = vrot.slane %v1947_v15, 2 }
 0x669   :  { %v1968_v33 = vadd.f32 %v1967_v58, %v1966_v35 }
 0x66a   :  { %v1949_v56 = vadd.f32 %v1948_v18, %v1947_v15 }
 0x66b   :  { %v1969_v59 = vrot.slane %v1968_v33, 1 }
 0x66c   :  { %v1950_v41 = vrot.slane %v1949_v56, 1 }
 0x66d   :  { %v1970_v0 = vadd.f32 %v1969_v59, %v1968_v33  ;;  %v2146_v59 = vrot.slane %v4273_v62, %v3720_v25 }
 0x66e   :  { %v1951_v11 = vadd.f32 %v1950_v41, %v1949_v56 }
 0x66f   :  { %3508 = vrcp.f32 %v1970_v0 }
 0x670   :  { %3510 = vrcp.f32 %v1951_v11 }
 0x679   :  { %v3509_v50 = vpop.eup %3508 }
 0x67a   :  { %v3511_v60 = vpop.eup %3510  ;;  %v1972_v27 = vmul.f32 %v3509_v50, %v3505_v9  ;;  %v2129_v9 = vsub.f32 0.0, %v1934_v23 }
 0x67b   :  { %v1953_v10 = vmul.f32 %v3511_v60, %v3507_v57  ;;  %v2122_v57 = vmul.f32 1.442695, %v2121_v21 }
 0x67c   :  { %v1973_v47 = vmul.f32 0.992, %v1972_v27  ;;  %v2130_v19 = vmul.f32 1.442695, %v2129_v9 }
 0x67d   :  { %v1954_v45 = vmul.f32 0.992, %v1953_v10  ;;  %3512 = vpow2.f32 %v2122_v57 }
 0x67e   :  { %v1974_v37 = vadd.f32 0.001, %v1973_v47  ;;  %3514 = vpow2.f32 %v2130_v19 }
 0x67f   :  { %v1955_v36 = vadd.f32 0.001, %v1954_v45 }
 0x680   :  { %3276 = vmatpush3.msra.mxu1 %v1974_v37  ;;  %v2138_v37 = vsel %vm2137_vm3, 1, %v3601_v2 }
 0x681   :  { %3271 = vmatpush3.msra.mxu0 %v1955_v36  ;;  %3278 = vmatmul.mubr.msk.f32.vlgmr.msra.gmra.mrb[16].mxu1 %vm577_vm8, %v4043_v3 }
 0x682   :  { %3273 = vmatmul.mubr.msk.f32.vlgmr.msra.gmra.mrb[16].mxu0 %vm577_vm8, %v4043_v3  ;;  %3367 = vmatprep.subr.bf16.mxu0 %v3366_v28 }
 0x683   :  { %3369 = vmatpush3.bf16.msra.mxu0 %v3366_v28  ;;  %3288 = vmatprep.mubr.msk.f32.mxu0 %vm320_vm0, %v3572_v43 }
 0x684   :  { %3371 = vmatprep.subr.bf16.mxu0 %v3370_v31  ;;  %3302 = vmatprep.mubr.msk.f32.mxu1 %vm320_vm0, %v3573_v44 }
 0x687   :  { %3373 = vmatpush3.bf16.msra.mxu0 %v3370_v31  ;;  %v3513_v12 = vpop.eup %3512 }
 0x688   :  { %3308 = vmatprep.subr.mxu0 %v3602_v54  ;;  %v2124_v22 = vadd.f32 1.0, %v3513_v12  ;;  %v3515_v41 = vpop.eup %3514 }
 0x689   :  { %v2132_v55 = vadd.f32 1.0, %v3515_v41 }
 0x68a   :  { %3289 = vmatmul.mubr.msk.f32.vlgmr.msra.gmra.mrb[18].mxu0 %vm320_vm0, %v3574_v42  ;;  %3516 = vlog2.f32 %v2124_v22 }
 0x68b   :  { %3291 = vmatprep.mubr.msk.f32.mxu0 %vm320_vm0, %v3575_v34  ;;  %3518 = vrcp.f32 %v2132_v55  ;;  %v2119_v34 = vmax.f32 %v4323_v7, 0.0 }
 0x68e   :  { %3292 = vmatmul.mubr.msk.f32.gmra.mrb[20].mxu0 %vm320_vm0, %v3576_v53 }
 0x68f   :  { %3310 = vmatprep.mubr.msk.f32.mxu0 %vm3603_vm14, %v3602_v54 }
 0x694   :  { %v3517_v31 = vpop.eup %3516 }
 0x695   :  { %v3519_v42 = vpop.eup %3518 }
 0x696   :  { %v2135_v23 = vmul.f32 0.95, %v3519_v42 }
 0x698   :  { %v2136_v57 = vadd.f32 0.025, %v2135_v23 }
 0x754   :  { %v2111_v26 = vpop.f32.mrb[16].mxu1 }
 0x755   :  { %v2041_v35 = vpop.f32.mrb[16].mxu0  ;;  %v3279_v15 = vpop.f32.mrb[17].mxu1  ;;  %v2117_v46 = vmul.f32 6.0, %v2111_v26 }
 0x756   :  { %v2115_v58 = vmul.f32 6.0, %v2041_v35  ;;  %v3274_v18 = vpop.f32.mrb[17].mxu0 }
 0x757   :  { %v3061_v7 = vadd.f32 -3.0, %v2117_v46 }
 0x758   :  { %v4328_v33 = vadd.f32 -3.0, %v2115_v58 }
 0x75a   :  { %v2142_v56 = vadd.f32 1e-06, %v4328_v33 }
 0x75c   :  { %vm2147_vm2 = vcmp.ge.f32.partialorder %v2146_v59, %v2142_v56 }
 0x75d   :  { %v2148_v0 = vsel %vm2147_vm2, 1, %v3601_v2  ;;  %v3290_v11 = vpop.f32.mrb[18].mxu0  ;;  %vm2290_vm2 = vmand %vm2288_vm13, %vm2289_vm15 }
 0x75e   :  { %v2149_v61 = vsel %vm84_vm1, %v2148_v0, 0  ;;  %v2532_v17 = vadd.f32 %v3290_v11, %v3779_v4  ;;  %v2526_v40 = vpop.f32.mrb[19].mxu0 }
 0x75f   :  { %v2150_v20 = vrot.slane %v2149_v61, 4  ;;  %v2527_v38 = vadd.f32 %v2526_v40, %v3753_v49 }
 0x760   :  { %v2546_v50 = vmax.f32 %v2532_v17, 0.0 }
 0x761   :  { %v2151_v60 = vadd.s32 %v2150_v20, %v2149_v61  ;;  %v2545_v27 = vmax.f32 %v2527_v38, 0.0  ;;  %v3293_v14 = vpop.f32.mrb[20].mxu0 }
 0x762   :  { %v2542_v29 = vadd.f32 %v3293_v14, %v3781_v8  ;;  %v2536_v10 = vpop.f32.mrb[21].mxu0  ;;  %v2141_v8 = vadd.s32 %v2140_v48, %v2138_v37 }
 0x763   :  { %v2152_v47 = vrot.slane %v2151_v60, 2  ;;  %v3374_v32 = vpack.c.bf16 %v2546_v50, %v2545_v27  ;;  %v2537_v4 = vadd.f32 %v2536_v10, %v3755_v51  ;;  %v2126_v51 = vmul.f32 0.6931472, %v3517_v31 }
 0x764   :  { %v2548_v13 = vmax.f32 %v2542_v29, 0.0 }
 0x765   :  { %v2153_v49 = vadd.s32 %v2152_v47, %v2151_v60  ;;  %v2547_v45 = vmax.f32 %v2537_v4, 0.0  ;;  %3375 = vmatprep.subr.bf16.mxu1 %v3374_v32  ;;  %v2127_v21 = vadd.f32 %v2126_v51, %v2119_v34 }
 0x766   :  { %3377 = vmatpush3.bf16.msra.mxu1 %v3374_v32 }
 0x767   :  { %v2154_v30 = vrot.slane %v2153_v49, 1  ;;  %v3378_v36 = vpack.c.bf16 %v2548_v13, %v2547_v45  ;;  %v2128_v19 = vadd.f32 0.001, %v2127_v21 }
 0x769   :  { %v2155_v28 = vadd.s32 %v2154_v30, %v2153_v49  ;;  %3379 = vmatprep.subr.bf16.mxu1 %v3378_v36 }
 0x76a   :  { %3381 = vmatpush3.bf16.msra.mxu1 %v3378_v36 }
 0x76b   :  { %v2156_v43 = vadd.s32 %v2155_v28, %v2141_v8  ;;  %3313 = vmatprep.subr.mxu1 %v3602_v54 }
 0x76d   :  { %v3062_v44 = vadd.s32 4294967295, %v2156_v43  ;;  %3303 = vmatmul.mubr.msk.f32.vlgmr.msra.gmra.mrb[18].mxu1 %vm320_vm0, %v4222_v39 }
 0x76e   :  { %3305 = vmatprep.mubr.msk.f32.mxu1 %vm320_vm0, %v4229_v5 }
 0x76f   :  { %vm2158_vm5 = vcmp.gt.s32.totalorder %v3062_v44, 0 }
 0x770   :  { %v2159_v53 = vsel %vm2158_vm5, %v3062_v44, 0 }
 0x771   :  { %vm2160_vm6 = vcmp.lt.s32.totalorder %v2159_v53, 7  ;;  %3306 = vmatmul.mubr.msk.f32.gmra.mrb[20].mxu1 %vm320_vm0, %v4237_v52 }
 0x772   :  { %v4351_v9 = vsel %vm2160_vm6, %v2159_v53, 7  ;;  %3315 = vmatprep.mubr.msk.f32.mxu1 %vm3603_vm14, %v3602_v54 }
 0x773   :  { %v2165_v39 = vrot.slane %v4351_v9, %v3720_v25  ;;  %v3064_v5 = vadd.s32 4294967295, %v4351_v9  ;;  %vm2178_vm14 = vcmp.eq.s32.totalorder %v4351_v9, 7  ;;  %vm2177_vm9 = vcmp.eq.s32.totalorder %v4351_v9, 0 }
 0x775   :  { %vm2166_vm7 = vcmp.eq.s32.totalorder %v3717_v24, %v2165_v39  ;;  %v2173_v26 = vrot.slane %v3064_v5, %v3720_v25 }
 0x776   :  { %v3063_v35 = vsel %vm2166_vm7, 1.0, %v3602_v54 }
 0x777   :  { %v2187_v52 = vmul.f32 %v3063_v35, %v4328_v33  ;;  %v2225_v15 = vmul.f32 %v3063_v35, %v2128_v19  ;;  %v2234_v58 = vmul.f32 %v3063_v35, %v2136_v57  ;;  %vm2174_vm0 = vcmp.eq.s32.totalorder %v3717_v24, %v2173_v26 }
 0x778   :  { %v3065_v18 = vsel %vm2174_vm0, 1.0, %v3602_v54  ;;  %v2204_v12 = vmul.f32 %v3063_v35, %v3061_v7 }
 0x779   :  { %v2188_v56 = vrot.slane %v2187_v52, 4  ;;  %v2226_v59 = vsel %vm84_vm1, %v2225_v15, 0.0  ;;  %v2235_v22 = vrot.slane %v2234_v58, 4  ;;  %v2179_v41 = vmul.f32 %v3065_v18, %v4328_v33 }
 0x77a   :  { %v2227_v0 = vrot.slane %v2226_v59, 4  ;;  %v2196_v11 = vmul.f32 %v3065_v18, %v3061_v7  ;;  %v2205_v61 = vrot.slane %v2204_v12, 4  ;;  %v2216_v17 = vmul.f32 %v3065_v18, %v2128_v19 }
 0x77b   :  { %v2189_v40 = vadd.f32 %v2188_v56, %v2187_v52  ;;  %v2236_v20 = vadd.f32 %v2235_v22, %v2234_v58  ;;  %v2180_v38 = vrot.slane %v2179_v41, 4 }
 0x77c   :  { %v2228_v55 = vadd.f32 %v2227_v0, %v2226_v59  ;;  %v2197_v50 = vrot.slane %v2196_v11, 4  ;;  %v2206_v60 = vadd.f32 %v2205_v61, %v2204_v12  ;;  %v2217_v27 = vsel %vm84_vm1, %v2216_v17, 0.0 }
 0x77d   :  { %v2190_v14 = vrot.slane %v2189_v40, 2  ;;  %v2237_v29 = vrot.slane %v2236_v20, 2  ;;  %v2181_v10 = vadd.f32 %v2180_v38, %v2179_v41  ;;  %v2218_v47 = vrot.slane %v2217_v27, 4 }
 0x77e   :  { %v2229_v32 = vrot.slane %v2228_v55, 2  ;;  %v2198_v4 = vadd.f32 %v2197_v50, %v2196_v11  ;;  %v2207_v13 = vrot.slane %v2206_v60, 2 }
 0x77f   :  { %v2191_v33 = vadd.f32 %v2190_v14, %v2189_v40  ;;  %v2238_v49 = vadd.f32 %v2237_v29, %v2236_v20  ;;  %v2182_v45 = vrot.slane %v2181_v10, 2  ;;  %v2219_v37 = vadd.f32 %v2218_v47, %v2217_v27 }
 0x780   :  { %v2230_v48 = vadd.f32 %v2229_v32, %v2228_v55  ;;  %v2199_v30 = vrot.slane %v2198_v4, 2  ;;  %v2208_v36 = vadd.f32 %v2207_v13, %v2206_v60 }
 0x781   :  { %v2192_v8 = vrot.slane %v2191_v33, 1  ;;  %v2239_v28 = vrot.slane %v2238_v49, 1  ;;  %v2183_v31 = vadd.f32 %v2182_v45, %v2181_v10  ;;  %v2220_v43 = vrot.slane %v2219_v37, 2 }
 0x782   :  { %v2200_v51 = vadd.f32 %v2199_v30, %v2198_v4  ;;  %v2209_v44 = vrot.slane %v2208_v36, 1  ;;  %v2231_v42 = vrot.slane %v2230_v48, 1 }
 0x783   :  { %v2193_v34 = vadd.f32 %v2192_v8, %v2191_v33  ;;  %v4367_v53 = vadd.f32 %v2239_v28, %v2238_v49  ;;  %v2184_v46 = vrot.slane %v2183_v31, 1  ;;  %v2221_v23 = vadd.f32 %v2220_v43, %v2219_v37 }
 0x784   :  { %v2201_v21 = vrot.slane %v2200_v51, 1  ;;  %v2210_v39 = vadd.f32 %v2209_v44, %v2208_v36  ;;  %v2232_v5 = vadd.f32 %v2231_v42, %v2230_v48 }
 0x785   :  { %v2185_v7 = vadd.f32 %v2184_v46, %v2183_v31  ;;  %v2222_v57 = vrot.slane %v2221_v23, 1  ;;  %v2251_v19 = vsub.f32 1.0, %v4367_v53  ;;  %v2194_v58 = vsel %vm2178_vm14, 3.0, %v2193_v34 }
 0x786   :  { %v2202_v26 = vadd.f32 %v2201_v21, %v2200_v51  ;;  %v2211_v35 = vsel %vm2178_vm14, 3.0, %v2210_v39  ;;  %v2233_v52 = vsel %vm2178_vm14, 1.0, %v2232_v5 }
 0x787   :  { %v2186_v15 = vsel %vm2177_vm9, -3.0, %v2185_v7  ;;  %v2223_v18 = vadd.f32 %v2222_v57, %v2221_v23  ;;  %3520 = vrcp.f32 %v2233_v52 }
 0x788   :  { %v2195_v12 = vsub.f32 %v2194_v58, %v2186_v15  ;;  %v2203_v56 = vsel %vm2177_vm9, -3.0, %v2202_v26  ;;  %v2264_v17 = vsub.f32 %v4273_v62, %v2186_v15 }
 0x789   :  { %v2212_v59 = vsub.f32 %v2211_v35, %v2203_v56  ;;  %v2224_v22 = vsel %vm2177_vm9, 1.0, %v2223_v18  ;;  %v2257_v41 = vmul.f32 %v2251_v19, %v2203_v56 }
 0x78a   :  { %3522 = vrcp.f32 %v2195_v12  ;;  %v2250_v0 = vmul.f32 %v4367_v53, %v2224_v22 }
 0x791   :  { %v3521_v11 = vpop.eup %3520 }
 0x792   :  { %v2242_v61 = vmul.f32 %v3521_v11, %v2224_v22 }
 0x794   :  { %v3523_v9 = vpop.eup %3522  ;;  %3524 = vrsqrt.f32 %v2242_v61  ;;  %vm2245_vm11 = vcmp.eq.f32.partialorder %v2242_v61, inf  ;;  %v2248_v14 = vand.u32 2147483648, %v2242_v61  ;;  %vm2247_vm12 = vcmp.eq.f32.partialorder %v2242_v61, 0.0 }
 0x795   :  { %v2215_v40 = vmul.f32 %v3523_v9, %v2212_v59  ;;  %v2265_v20 = vmul.f32 %v3523_v9, %v2264_v17 }
 0x797   :  { %v2266_v38 = vsub.f32 %v4367_v53, %v2265_v20  ;;  %v2278_v55 = vsub.f32 %v2265_v20, %v4367_v53  ;;  %vm2286_vm10 = vcmp.le.f32.partialorder %v2265_v20, %v4367_v53  ;;  %3526 = vrcp.f32 %v2215_v40 }
 0x798   :  { %v2275_v28 = vsub.f32 1.0, %v2265_v20 }
 0x799   :  { %v2267_v50 = vmul.f32 %v2266_v38, %v2203_v56 }
 0x79e   :  { %v3525_v60 = vpop.eup %3524 }
 0x79f   :  { %v2244_v27 = vmul.f32 %v3525_v60, %v2242_v61 }
 0x7a1   :  { %v2246_v29 = vsel %vm2245_vm11, %v2242_v61, %v2244_v27  ;;  %v3527_v36 = vpop.eup %3526 }
 0x7a2   :  { %v2249_v10 = vsel %vm2247_vm12, %v2248_v14, %v2246_v29 }
 0x7a3   :  { %v2252_v47 = vmul.f32 %v2251_v19, %v2249_v10  ;;  %v2258_v32 = vmul.f32 %v2249_v10, %v4367_v53  ;;  %v2277_v4 = vmul.f32 %v2249_v10, %v2211_v35  ;;  %v2282_v13 = vmul.f32 %v2278_v55, %v2249_v10 }
 0x7a5   :  { %v2253_v33 = vmul.f32 %v2252_v47, %v2233_v52  ;;  %v2259_v49 = vmul.f32 %v2258_v32, %v2211_v35  ;;  %v2261_v45 = vadd.f32 %v2258_v32, %v2251_v19  ;;  %v2279_v37 = vmul.f32 %v2278_v55, %v2277_v4 }
 0x7a7   :  { %v2254_v48 = vadd.f32 %v2253_v33, %v2250_v0  ;;  %v2260_v30 = vadd.f32 %v2259_v49, %v2257_v41  ;;  %3528 = vrcp.f32 %v2261_v45 }
 0x7a9   :  { %v2256_v8 = vmul.f32 %v3527_v36, %v2254_v48 }
 0x7ab   :  { %v2271_v31 = vmul.f32 %v2265_v20, %v2256_v8  ;;  %v2281_v43 = vmul.f32 %v2275_v28, %v2256_v8 }
 0x7ad   :  { %v2272_v51 = vadd.f32 %v2271_v31, %v2266_v38  ;;  %v2283_v44 = vadd.f32 %v2282_v13, %v2281_v43 }
 0x7af   :  { %3530 = vrcp.f32 %v2272_v51 }
 0x7b0   :  { %3532 = vrcp.f32 %v2283_v44 }
 0x7b1   :  { %v3529_v42 = vpop.eup %3528 }
 0x7b2   :  { %v2263_v34 = vmul.f32 %v3529_v42, %v2260_v30 }
 0x7b4   :  { %v2268_v46 = vmul.f32 %v2263_v34, %v2256_v8 }
 0x7b6   :  { %v2269_v23 = vmul.f32 %v2268_v46, %v2265_v20  ;;  %v2276_v21 = vmul.f32 %v2275_v28, %v2268_v46 }
 0x7b8   :  { %v2270_v39 = vadd.f32 %v2269_v23, %v2267_v50  ;;  %v2280_v5 = vadd.f32 %v2279_v37, %v2276_v21 }
 0x7b9   :  { %v3531_v7 = vpop.eup %3530 }
 0x7ba   :  { %v3533_v57 = vpop.eup %3532  ;;  %v2274_v19 = vmul.f32 %v3531_v7, %v2270_v39 }
 0x7bb   :  { %v2285_v26 = vmul.f32 %v3533_v57, %v2280_v5 }
 0x7bd   :  { %v2287_v35 = vsel %vm2286_vm10, %v2274_v19, %v2285_v26 }
 0x7be   :  { %v4383_v52 = vsel %vm2290_vm2, %v2287_v35, %v4273_v62 }
 0x7bf   :  { %2293 = vst [vmem:[#allocation2 + $0x5] sm:$0x1] %v4383_v52  ;;  %vm2834_vm3 = vcmp.ge.f32.partialorder %v4383_v52, -2.999999  ;;  %vm2836_vm4 = vcmp.ge.f32.partialorder %v4383_v52, 3.000001 }
 0x7c0   :  { %vm2985_vm12 = vcmp.ge.f32.partialorder %v4383_v52, -3.0  ;;  %vm2986_vm13 = vcmp.le.f32.partialorder %v4383_v52, 3.0 }
 0x7c1   :  { %vm2987_vm15 = vmand %vm2985_vm12, %vm2986_vm13 }
 0x840   :  { %v3304_v15 = vpop.f32.mrb[18].mxu1 }
 0x841   :  { %v2621_v58 = vadd.f32 %v3304_v15, %v4020_v16  ;;  %v2615_v18 = vpop.f32.mrb[19].mxu1 }
 0x842   :  { %v2616_v12 = vadd.f32 %v2615_v18, %v4018_v6 }
 0x843   :  { %v2653_v56 = vrot.slane %v2621_v58, 4 }
 0x844   :  { %v2634_v59 = vrot.slane %v2616_v12, 4  ;;  %v3307_v22 = vpop.f32.mrb[20].mxu1 }
 0x845   :  { %v2654_v41 = vmax.f32 %v2621_v58, %v2653_v56  ;;  %v2625_v0 = vpop.f32.mrb[21].mxu1  ;;  %v2631_v46 = vadd.f32 %v3307_v22, %v4094_v63 }
 0x846   :  { %v2635_v11 = vmax.f32 %v2616_v12, %v2634_v59  ;;  %v2626_v42 = vadd.f32 %v2625_v0, %v4087_v1 }
 0x847   :  { %v2655_v53 = vrot.slane %v2654_v41, 2  ;;  %v2826_v21 = vsub.f32 0.0, %v2631_v46 }
 0x848   :  { %v2636_v61 = vrot.slane %v2635_v11, 2  ;;  %v2817_v34 = vand.u32 2147483647, %v2626_v42 }
 0x849   :  { %v2656_v17 = vmax.f32 %v2654_v41, %v2655_v53  ;;  %v2827_v5 = vmul.f32 1.442695, %v2826_v21  ;;  %v2835_v53 = vsel %vm2834_vm3, 1, %v3601_v2 }
 0x84a   :  { %v2637_v9 = vmax.f32 %v2635_v11, %v2636_v61  ;;  %v2818_v23 = vsub.f32 0.0, %v2817_v34  ;;  %v2837_v61 = vsel %vm2836_vm4, 1, %v3601_v2 }
 0x84b   :  { %v2657_v62 = vrot.slane %v2656_v17, 1 }
 0x84c   :  { %v2638_v40 = vrot.slane %v2637_v9, 1  ;;  %v2819_v39 = vmul.f32 1.442695, %v2818_v23 }
 0x84d   :  { %v2658_v20 = vmax.f32 %v2656_v17, %v2657_v62 }
 0x84e   :  { %v2639_v38 = vmax.f32 %v2637_v9, %v2638_v40  ;;  %v2838_v9 = vadd.s32 %v2837_v61, %v2835_v53 }
 0x84f   :  { %v2659_v55 = vsub.f32 %v2621_v58, %v2658_v20 }
 0x850   :  { %v2640_v50 = vsub.f32 %v2616_v12, %v2639_v38 }
 0x851   :  { %v2660_v16 = vmul.f32 1.442695, %v2659_v55 }
 0x852   :  { %v2641_v60 = vmul.f32 1.442695, %v2640_v50 }
 0x853   :  { %3534 = vpow2.f32 %v2660_v16  ;;  %v2816_v16 = vmax.f32 %v2626_v42, 0.0 }
 0x854   :  { %3536 = vpow2.f32 %v2641_v60 }
 0x85d   :  { %v3535_v6 = vpop.eup %3534 }
 0x85e   :  { %v3537_v27 = vpop.eup %3536  ;;  %v2662_v14 = vrot.slane %v3535_v6, 4 }
 0x85f   :  { %v2643_v29 = vrot.slane %v3537_v27, 4 }
 0x860   :  { %v2663_v10 = vadd.f32 %v3535_v6, %v2662_v14 }
 0x861   :  { %v2644_v47 = vadd.f32 %v3537_v27, %v2643_v29 }
 0x862   :  { %v2664_v32 = vrot.slane %v2663_v10, 2 }
 0x863   :  { %v2645_v4 = vrot.slane %v2644_v47, 2 }
 0x864   :  { %v2665_v13 = vadd.f32 %v2664_v32, %v2663_v10 }
 0x865   :  { %v2646_v33 = vadd.f32 %v2645_v4, %v2644_v47 }
 0x866   :  { %v2666_v49 = vrot.slane %v2665_v13, 1 }
 0x867   :  { %v2647_v45 = vrot.slane %v2646_v33, 1 }
 0x868   :  { %v2667_v37 = vadd.f32 %v2666_v49, %v2665_v13 }
 0x869   :  { %v2648_v48 = vadd.f32 %v2647_v45, %v2646_v33 }
 0x86a   :  { %3538 = vrcp.f32 %v2667_v37 }
 0x86b   :  { %3540 = vrcp.f32 %v2648_v48 }
 0x86c   :  { %3542 = vpow2.f32 %v2819_v39 }
 0x86d   :  { %3544 = vpow2.f32 %v2827_v5 }
 0x874   :  { %v3539_v30 = vpop.eup %3538 }
 0x875   :  { %v3541_v36 = vpop.eup %3540  ;;  %v2669_v8 = vmul.f32 %v3539_v30, %v3535_v6 }
 0x876   :  { %v2650_v28 = vmul.f32 %v3541_v36, %v3537_v27  ;;  %v3543_v58 = vpop.eup %3542 }
 0x877   :  { %v2670_v31 = vmul.f32 0.992, %v2669_v8  ;;  %v2821_v1 = vadd.f32 1.0, %v3543_v58  ;;  %v3545_v63 = vpop.eup %3544 }
 0x878   :  { %v2651_v43 = vmul.f32 0.992, %v2650_v28  ;;  %v2829_v22 = vadd.f32 1.0, %v3545_v63 }
 0x879   :  { %v2671_v51 = vadd.f32 0.001, %v2670_v31  ;;  %3546 = vlog2.f32 %v2821_v1 }
 0x87a   :  { %v2652_v44 = vadd.f32 0.001, %v2651_v43  ;;  %3548 = vrcp.f32 %v2829_v22 }
 0x87b   :  { %3314 = vmatpush3.msra.mxu1 %v2671_v51 }
 0x87c   :  { %3309 = vmatpush3.msra.mxu0 %v2652_v44  ;;  %3316 = vmatmul.mubr.msk.f32.vlgmr.msra.gmra.mrb[22].mxu1 %vm577_vm8, %v4043_v3 }
 0x87d   :  { %3311 = vmatmul.mubr.msk.f32.vlgmr.msra.gmra.mrb[22].mxu0 %vm577_vm8, %v4043_v3  ;;  %v2843_v3 = vrot.slane %v4383_v52, %v3720_v25 }
 0x883   :  { %v3547_v40 = vpop.eup %3546 }
 0x884   :  { %v2823_v38 = vmul.f32 0.6931472, %v3547_v40  ;;  %v3549_v50 = vpop.eup %3548 }
 0x885   :  { %v2832_v27 = vmul.f32 0.95, %v3549_v50 }
 0x886   :  { %v2824_v14 = vadd.f32 %v2823_v38, %v2816_v16 }
 0x887   :  { %v2833_v32 = vadd.f32 0.025, %v2832_v27 }
 0x888   :  { %v2825_v4 = vadd.f32 0.001, %v2824_v14 }
 0x94f   :  { %v2808_v7 = vpop.f32.mrb[22].mxu1 }
 0x950   :  { %v2738_v57 = vpop.f32.mrb[22].mxu0  ;;  %v3317_v19 = vpop.f32.mrb[23].mxu1  ;;  %v2814_v6 = vmul.f32 6.0, %v2808_v7 }
 0x951   :  { %v2812_v26 = vmul.f32 6.0, %v2738_v57  ;;  %v3312_v35 = vpop.f32.mrb[23].mxu0 }
 0x952   :  { %v3081_v47 = vadd.f32 -3.0, %v2814_v6 }
 0x953   :  { %v3080_v15 = vadd.f32 -3.0, %v2812_v26 }
 0x955   :  { %v2839_v18 = vadd.f32 1e-06, %v3080_v15 }
 0x957   :  { %vm2844_vm8 = vcmp.ge.f32.partialorder %v2843_v3, %v2839_v18 }
 0x958   :  { %v2845_v12 = vsel %vm2844_vm8, 1, %v3601_v2 }
 0x959   :  { %v2846_v56 = vsel %vm84_vm1, %v2845_v12, 0 }
 0x95a   :  { %v2847_v59 = vrot.slane %v2846_v56, 4 }
 0x95c   :  { %v2848_v41 = vadd.s32 %v2847_v59, %v2846_v56 }
 0x95e   :  { %v2849_v0 = vrot.slane %v2848_v41, 2 }
 0x960   :  { %v2850_v11 = vadd.s32 %v2849_v0, %v2848_v41 }
 0x962   :  { %v2851_v17 = vrot.slane %v2850_v11, 1 }
 0x964   :  { %v2852_v62 = vadd.s32 %v2851_v17, %v2850_v11 }
 0x966   :  { %v2853_v20 = vadd.s32 %v2852_v62, %v2838_v9 }
 0x968   :  { %v3082_v55 = vadd.s32 4294967295, %v2853_v20 }
 0x96a   :  { %vm2855_vm5 = vcmp.gt.s32.totalorder %v3082_v55, 0 }
 0x96b   :  { %v2856_v60 = vsel %vm2855_vm5, %v3082_v55, 0 }
 0x96c   :  { %vm2857_vm6 = vcmp.lt.s32.totalorder %v2856_v60, 7 }
 0x96d   :  { %v4402_v29 = vsel %vm2857_vm6, %v2856_v60, 7 }
 0x96e   :  { %v2862_v2 = vrot.slane %v4402_v29, %v3720_v25  ;;  %v3084_v10 = vadd.s32 4294967295, %v4402_v29  ;;  %vm2874_vm14 = vcmp.eq.s32.totalorder %v4402_v29, 0 }
 0x970   :  { %vm2863_vm7 = vcmp.eq.s32.totalorder %v3717_v24, %v2862_v2  ;;  %v2870_v13 = vrot.slane %v3084_v10, %v3720_v25 }
 0x971   :  { %v3083_v33 = vsel %vm2863_vm7, 1.0, %v3602_v54 }
 0x972   :  { %v2884_v49 = vmul.f32 %v3083_v33, %v3080_v15  ;;  %v2922_v45 = vmul.f32 %v3083_v33, %v2825_v4  ;;  %v2931_v37 = vmul.f32 %v3083_v33, %v2833_v32  ;;  %vm2871_vm0 = vcmp.eq.s32.totalorder %v3717_v24, %v2870_v13 }
 0x973   :  { %v3085_v48 = vsel %vm2871_vm0, 1.0, %v3602_v54  ;;  %v2901_v30 = vmul.f32 %v3083_v33, %v3081_v47 }
 0x974   :  { %v2885_v36 = vrot.slane %v2884_v49, 4  ;;  %v2923_v8 = vsel %vm84_vm1, %v2922_v45, 0.0  ;;  %v2932_v28 = vrot.slane %v2931_v37, 4  ;;  %v2876_v31 = vmul.f32 %v3085_v48, %v3080_v15 }
 0x975   :  { %v2924_v43 = vrot.slane %v2923_v8, 4  ;;  %v2893_v51 = vmul.f32 %v3085_v48, %v3081_v47  ;;  %v2902_v44 = vrot.slane %v2901_v30, 4  ;;  %v2913_v42 = vmul.f32 %v3085_v48, %v2825_v4 }
 0x976   :  { %v2886_v25 = vadd.f32 %v2885_v36, %v2884_v49  ;;  %v2933_v34 = vadd.f32 %v2932_v28, %v2931_v37  ;;  %v2877_v46 = vrot.slane %v2876_v31, 4 }
 0x977   :  { %v2925_v23 = vadd.f32 %v2924_v43, %v2923_v8  ;;  %v2894_v21 = vrot.slane %v2893_v51, 4  ;;  %v2903_v39 = vadd.f32 %v2902_v44, %v2901_v30  ;;  %v2914_v24 = vsel %vm84_vm1, %v2913_v42, 0.0 }
 0x978   :  { %v2887_v5 = vrot.slane %v2886_v25, 2  ;;  %v2934_v54 = vrot.slane %v2933_v34, 2  ;;  %v2878_v7 = vadd.f32 %v2877_v46, %v2876_v31  ;;  %v2915_v57 = vrot.slane %v2914_v24, 4 }
 0x979   :  { %v2926_v19 = vrot.slane %v2925_v23, 2  ;;  %v2895_v26 = vadd.f32 %v2894_v21, %v2893_v51  ;;  %v2904_v35 = vrot.slane %v2903_v39, 2  ;;  %vm2875_vm1 = vcmp.eq.s32.totalorder %v4402_v29, 7 }
 0x97a   :  { %v2888_v15 = vadd.f32 %v2887_v5, %v2886_v25  ;;  %v2935_v58 = vadd.f32 %v2934_v54, %v2933_v34  ;;  %v2879_v18 = vrot.slane %v2878_v7, 2  ;;  %v2916_v3 = vadd.f32 %v2915_v57, %v2914_v24 }
 0x97b   :  { %v2927_v1 = vadd.f32 %v2926_v19, %v2925_v23  ;;  %v2896_v63 = vrot.slane %v2895_v26, 2  ;;  %v2905_v12 = vadd.f32 %v2904_v35, %v2903_v39 }
 0x97c   :  { %v2889_v56 = vrot.slane %v2888_v15, 1  ;;  %v2936_v59 = vrot.slane %v2935_v58, 1  ;;  %v2880_v22 = vadd.f32 %v2879_v18, %v2878_v7  ;;  %v2917_v41 = vrot.slane %v2916_v3, 2 }
 0x97d   :  { %v2897_v0 = vadd.f32 %v2896_v63, %v2895_v26  ;;  %v2906_v11 = vrot.slane %v2905_v12, 1  ;;  %v2928_v53 = vrot.slane %v2927_v1, 1 }
 0x97e   :  { %v2890_v61 = vadd.f32 %v2889_v56, %v2888_v15  ;;  %v4414_v17 = vadd.f32 %v2936_v59, %v2935_v58  ;;  %v2881_v9 = vrot.slane %v2880_v22, 1  ;;  %v2918_v62 = vadd.f32 %v2917_v41, %v2916_v3 }
 0x97f   :  { %v2898_v40 = vrot.slane %v2897_v0, 1  ;;  %v2907_v20 = vadd.f32 %v2906_v11, %v2905_v12  ;;  %v2929_v38 = vadd.f32 %v2928_v53, %v2927_v1 }
 0x980   :  { %v2882_v55 = vadd.f32 %v2881_v9, %v2880_v22  ;;  %v2919_v50 = vrot.slane %v2918_v62, 1  ;;  %v2948_v16 = vsub.f32 1.0, %v4414_v17  ;;  %v2891_v2 = vsel %vm2875_vm1, 3.0, %v2890_v61 }
 0x981   :  { %v2899_v60 = vadd.f32 %v2898_v40, %v2897_v0  ;;  %v2908_v6 = vsel %vm2875_vm1, 3.0, %v2907_v20  ;;  %v2930_v27 = vsel %vm2875_vm1, 1.0, %v2929_v38 }
 0x982   :  { %v2883_v14 = vsel %vm2874_vm14, -3.0, %v2882_v55  ;;  %v2920_v10 = vadd.f32 %v2919_v50, %v2918_v62  ;;  %3550 = vrcp.f32 %v2930_v27 }
 0x983   :  { %v2892_v47 = vsub.f32 %v2891_v2, %v2883_v14  ;;  %v2900_v32 = vsel %vm2874_vm14, -3.0, %v2899_v60  ;;  %v2961_v48 = vsub.f32 %v4383_v52, %v2883_v14 }
 0x984   :  { %v2909_v4 = vsub.f32 %v2908_v6, %v2900_v32  ;;  %v2921_v13 = vsel %vm2874_vm14, 1.0, %v2920_v10  ;;  %v2954_v33 = vmul.f32 %v2948_v16, %v2900_v32 }
 0x985   :  { %3552 = vrcp.f32 %v2892_v47  ;;  %v2947_v49 = vmul.f32 %v4414_v17, %v2921_v13 }
 0x98c   :  { %v3551_v45 = vpop.eup %3550 }
 0x98d   :  { %v2939_v37 = vmul.f32 %v3551_v45, %v2921_v13 }
 0x98f   :  { %v3553_v29 = vpop.eup %3552  ;;  %3554 = vrsqrt.f32 %v2939_v37  ;;  %vm2942_vm10 = vcmp.eq.f32.partialorder %v2939_v37, inf  ;;  %v2945_v44 = vand.u32 2147483648, %v2939_v37  ;;  %vm2944_vm11 = vcmp.eq.f32.partialorder %v2939_v37, 0.0 }
 0x990   :  { %v2912_v30 = vmul.f32 %v3553_v29, %v2909_v4  ;;  %v2962_v36 = vmul.f32 %v3553_v29, %v2961_v48 }
 0x992   :  { %v2963_v8 = vsub.f32 %v4414_v17, %v2962_v36  ;;  %v2975_v28 = vsub.f32 %v2962_v36, %v4414_v17  ;;  %vm2983_vm9 = vcmp.le.f32.partialorder %v2962_v36, %v4414_v17  ;;  %3556 = vrcp.f32 %v2912_v30 }
 0x993   :  { %v2972_v35 = vsub.f32 1.0, %v2962_v36 }
 0x994   :  { %v2964_v31 = vmul.f32 %v2963_v8, %v2900_v32 }
 0x999   :  { %v3555_v43 = vpop.eup %3554 }
 0x99a   :  { %v2941_v51 = vmul.f32 %v3555_v43, %v2939_v37 }
 0x99c   :  { %v2943_v42 = vsel %vm2942_vm10, %v2939_v37, %v2941_v51  ;;  %v3557_v19 = vpop.eup %3556 }
 0x99d   :  { %v2946_v25 = vsel %vm2944_vm11, %v2945_v44, %v2943_v42 }
 0x99e   :  { %v2949_v34 = vmul.f32 %v2948_v16, %v2946_v25  ;;  %v2955_v46 = vmul.f32 %v2946_v25, %v4414_v17  ;;  %v2974_v23 = vmul.f32 %v2946_v25, %v2908_v6  ;;  %v2979_v21 = vmul.f32 %v2975_v28, %v2946_v25 }
 0x9a0   :  { %v2950_v39 = vmul.f32 %v2949_v34, %v2930_v27  ;;  %v2956_v24 = vmul.f32 %v2955_v46, %v2908_v6  ;;  %v2958_v5 = vadd.f32 %v2955_v46, %v2948_v16  ;;  %v2976_v54 = vmul.f32 %v2975_v28, %v2974_v23 }
 0x9a2   :  { %v2951_v7 = vadd.f32 %v2950_v39, %v2947_v49  ;;  %v2957_v57 = vadd.f32 %v2956_v24, %v2954_v33  ;;  %3558 = vrcp.f32 %v2958_v5 }
 0x9a4   :  { %v2953_v26 = vmul.f32 %v3557_v19, %v2951_v7 }
 0x9a6   :  { %v2968_v15 = vmul.f32 %v2962_v36, %v2953_v26  ;;  %v2978_v58 = vmul.f32 %v2972_v35, %v2953_v26 }
 0x9a8   :  { %v2969_v18 = vadd.f32 %v2968_v15, %v2963_v8  ;;  %v2980_v3 = vadd.f32 %v2979_v21, %v2978_v58 }
 0x9aa   :  { %3560 = vrcp.f32 %v2969_v18 }
 0x9ab   :  { %3562 = vrcp.f32 %v2980_v3 }
 0x9ac   :  { %v3559_v1 = vpop.eup %3558 }
 0x9ad   :  { %v2960_v63 = vmul.f32 %v3559_v1, %v2957_v57 }
 0x9af   :  { %v2965_v12 = vmul.f32 %v2960_v63, %v2953_v26 }
 0x9b1   :  { %v2966_v56 = vmul.f32 %v2965_v12, %v2962_v36  ;;  %v2973_v59 = vmul.f32 %v2972_v35, %v2965_v12 }
 0x9b3   :  { %v2967_v22 = vadd.f32 %v2966_v56, %v2964_v31  ;;  %v2977_v41 = vadd.f32 %v2976_v54, %v2973_v59 }
 0x9b4   :  { %v3561_v0 = vpop.eup %3560 }
 0x9b5   :  { %v3563_v11 = vpop.eup %3562  ;;  %v2971_v53 = vmul.f32 %v3561_v0, %v2967_v22 }
 0x9b6   :  { %v2982_v61 = vmul.f32 %v3563_v11, %v2977_v41 }
 0x9b8   :  { %v2984_v9 = vsel %vm2983_vm9, %v2971_v53, %v2982_v61 }
 0x9b9   :  { %v2988_v62 = vsel %vm2987_vm15, %v2984_v9, %v4383_v52 }
 0x9ba   :  { %2990 = vst [vmem:[#allocation2 + $0x7] sm:$0x1] %v2988_v62 }
 0x9bb   :  { %3588 = shalt.err (!%p3585_p4)
}
 0x9bc   :  { %s3589_s14 = scalar_lea.hbm %s4450_s8, 128 }
 0x9bd   :  { %p3590_p5 = scmp.ne.s32.totalorder %s4450_s8, %s3589_s14  ;;  %p3593_p6 = scmp.lt.u32.totalorder %s3589_s14, %s4450_s8 }
 0x9bf   :  { %p3595_p7 = pnand %p3593_p6, %p3590_p5 }
 0x9c1   :  { %3598 = shalt.err (!%p3595_p7)
}
 0x9c2   :  { %3000 = dma.vmem_to_hbm [thread:$0]  %s2998_s5, 128, %s4450_s8, [#allocation3]  }
 0x9c3   :  { %3599 = dma.done.wait [#allocation3], 128  }
 0x9c4   :  { %3600 = vsyncadd [#allocation3], 4294967168 }
 0x9c5   :  { %3004 = vsyncpa [#allocation3], 1 }

</bundles_post_ra>
